<compile_context>
chip_gen: v7x
topology: tpu7x:2x2x1
jax: 0.10.0
libtpu: 0.0.40
codegen_flags: <defaults>
</compile_context>

<pallas_src>
import numpy as np
import jax
import jax.numpy as jnp
from jax.experimental import pallas as pl
from jax.experimental.pallas import tpu as pltpu

WDT = jnp.bfloat16  # MXU operand dtype (f32 accumulation everywhere)


def _np(x):
    return np.asarray(x, dtype=np.float32)


# ----------------------------- Net structure (mirrors setup_node_list / _make_cnn_layers) ----

def build_structure(cfg):
    ncl, nl = cfg["num_cnn_layer"], cfg["num_layer"]
    nds, icn = cfg["num_downsampling"], cfg["init_channel_num"]
    assert ncl > nds  # equal-case branch in the torch source never populates nodes/time
    lm = ncl // nds
    ll = (lm + ncl % nds) // 2
    lf = lm + ncl % nds - ll
    group_num = nds + 1
    mask = [0] * nl
    for i in range(lf, ncl - (ll - 1)):
        mask[i] = 1 if (i - lf) % lm == 0 else 0
    times = 0
    dtime = [0] * nl
    for i in range(nl):
        if mask[i] == 1:
            times += 1
        dtime[i] = times
    nodes = []
    for _ in range(lf):
        nodes.append(icn)
    for i in range(1, group_num - 1):
        for _ in range(lm):
            nodes.append(icn * 2 ** i)
    for _ in range(ll):
        nodes.append(icn * 2 ** nds)
    for _ in range(ncl, nl - 1):
        nodes.append(icn * 2 ** nds)
    nodes.append(cfg["num_outputs"])
    return dict(mask=mask, dtime=dtime, nodes=nodes)


def cnn_block_shapes(cfg, struct):
    nodes, mask = struct["nodes"], struct["mask"]
    blocks = []
    for i in range(cfg["num_cnn_layer"]):
        if i < cfg["num_dense_layer"]:
            in_planes = cfg["num_inputs"] + sum(nodes[:i])
        else:
            in_planes = sum(nodes[i - j - 1] for j in range(cfg["num_dense_layer"]))
        out_planes = nodes[i]
        stride = 2 if mask[i] else 1
        g = in_planes // out_planes
        if g == 0:
            g = 1
        blocks.append(dict(in_planes=in_planes, out_planes=out_planes, stride=stride, g=g))
    return blocks


def block_sources(i, ndl, dtime):
    """Mirror cnn_block.forward: list of (layerout index, avg_pool_2x2 count) feeding block i."""
    if i == 0:
        return [(0, 0)]
    layer_num = i + 1  # len(layerout) when block i runs: [x, out0, ..., out_{i-1}]
    former, fdt = [], []
    if layer_num <= ndl:
        former.append(0)
        fdt.append(0)
        for j in range(1, layer_num):
            former.append(j)
            fdt.append(dtime[j - 1])
    else:
        for j in range(ndl):
            former.append(layer_num - ndl + j)
            fdt.append(dtime[layer_num - ndl + j - 1])
    return [(f, fdt[-1] - t) for f, t in zip(former, fdt)]


# ----------------------------- deterministic parameter init (inference-mode BN) --------------

def init_bn(key, c):
    k1, k2, k3, k4 = jax.random.split(key, 4)
    gamma = jax.random.uniform(k1, (c,), minval=0.5, maxval=1.5)
    beta = 0.1 * jax.random.normal(k2, (c,))
    mean = 0.1 * jax.random.normal(k3, (c,))
    var = jax.random.uniform(k4, (c,), minval=0.5, maxval=1.5)
    scale = gamma / jnp.sqrt(var + 1e-5)
    shift = beta - mean * scale
    return scale.astype(jnp.float32), shift.astype(jnp.float32)


def init_conv(key, cout, cin_g, k):
    kw, kb = jax.random.split(key)
    w = 0.1 * jax.random.normal(kw, (cout, cin_g, k, k), dtype=jnp.float32)
    b = 0.05 * jax.random.normal(kb, (cout,), dtype=jnp.float32)
    return w, b


def init_fc(key, cin, cout):
    k1, k2, k3 = jax.random.split(key, 3)
    w = 0.1 * jax.random.normal(k1, (cout, cin), dtype=jnp.float32)
    b = 0.05 * jax.random.normal(k2, (cout,), dtype=jnp.float32)
    scale, shift = init_bn(k3, cout)
    return dict(w=w.T, b=b, bn_scale=scale, bn_shift=shift)


def init_params_raw(key, cfg, struct, blocks):
    keys = iter(jax.random.split(key, 256))
    cnn = []
    for b in blocks:
        g, cin, cout = b["g"], b["in_planes"], b["out_planes"]
        c1 = g * cout
        bn1s, bn1h = init_bn(next(keys), cin)
        w1, b1 = init_conv(next(keys), c1, cin, 1)
        bn2s, bn2h = init_bn(next(keys), c1)
        w2, b2 = init_conv(next(keys), c1, c1 // g, 3)
        bn3s, bn3h = init_bn(next(keys), c1)
        w3, b3 = init_conv(next(keys), cout, c1 // cout, 1)
        cnn.append(dict(bn1_scale=bn1s, bn1_shift=bn1h, w1=w1, b1=b1,
                        bn2_scale=bn2s, bn2_shift=bn2h, w2=w2, b2=b2,
                        bn3_scale=bn3s, bn3_shift=bn3h, w3=w3, b3=b3))
    nodes = struct["nodes"]
    ncl, nl, ndl = cfg["num_cnn_layer"], cfg["num_layer"], cfg["num_dense_layer"]
    fc = []
    in_f = sum(nodes[ncl - 1 - i] for i in range(ndl))
    fc.append(init_fc(next(keys), in_f, nodes[ncl]))
    for i in range(ncl + 1, nl):
        fc.append(init_fc(next(keys), nodes[i - 1], nodes[i]))
    return dict(cnn=cnn, fc=fc)


# ----------------------------- parameter preparation (all folds done once, outside jit) ------

def grouped_to_dense(w, groups):
    """Torch grouped conv weight (Cout, Cin/g, kh, kw) -> dense (kh, kw, Cin, Cout),
    zeros outside the group blocks (mathematically exact)."""
    cout, cin_g, kh, kw = w.shape
    out_g = cout // groups
    cin = cin_g * groups
    dense = np.zeros((kh, kw, cin, cout), np.float32)
    for gi in range(groups):
        blk = np.transpose(w[gi * out_g:(gi + 1) * out_g], (2, 3, 1, 0))
        dense[:, :, gi * cin_g:(gi + 1) * cin_g, gi * out_g:(gi + 1) * out_g] = blk
    return dense


def prepare(raw, cfg, struct, blocks, N, H0, W0):
    """Build the flat operand list + a plan of ref indices for the single fused kernel.
    Activation layout everywhere: rows = (n, h), lanes = (w, c) with lane index w*C + c."""
    ndl, ncl = cfg["num_dense_layer"], cfg["num_cnn_layer"]
    dtime = struct["dtime"]
    wargs = []

    def add(arr, dt=WDT):
        wargs.append(jnp.asarray(np.asarray(arr), dtype=dt))
        return len(wargs)  # ref index in the kernel (refs[0] is x, refs[-1] is the output)

    act_shapes = [(H0, W0, cfg["num_inputs"])]  # acts[0]=x, acts[i+1]=block i output
    plan_blocks = []

    for bi, binfo in enumerate(blocks):
        p = raw["cnn"][bi]
        srcs = block_sources(bi, ndl, dtime)
        H_in, W_in, _ = act_shapes[srcs[-1][0]]  # last source sets the common spatial size
        stride = binfo["stride"]
        assert H_in % stride == 0 and W_in % stride == 0
        H_out, W_out = H_in // stride, W_in // stride
        cin, cout, g = binfo["in_planes"], binfo["out_planes"], binfo["g"]
        c1 = g * cout
        first = (bi == 0)

        s1, h1 = _np(p["bn1_scale"]), _np(p["bn1_shift"])
        w1, b1 = _np(p["w1"]), _np(p["b1"])
        s2, h2 = _np(p["bn2_scale"]), _np(p["bn2_shift"])
        w2, b2 = _np(p["w2"]), _np(p["b2"])
        s3, h3 = _np(p["bn3_scale"]), _np(p["bn3_shift"])
        w3, b3 = _np(p["w3"]), _np(p["b3"])

        # conv1 (1x1, dense) with bn2 folded into its columns / bias.
        W1d = w1[:, :, 0, 0].T * s2[None, :]          # (cin, c1)
        b1f = b1 * s2 + h2

        # conv2 (grouped 3x3 -> dense block-diagonal) with the channel shuffle (skipped by
        # torch on the first block; identity when g==1) and bn3 folded into its output
        # columns / bias.
        W2d = grouped_to_dense(w2, g)                  # (3, 3, c1, c1)
        perm = np.arange(c1)
        if (not first) and g > 1:
            perm = np.arange(c1).reshape(g, c1 // g).T.reshape(-1)
        W2e = W2d[:, :, :, perm] * s3[None, None, None, :]
        b2f = b2[perm] * s3 + h3

        # conv3 (grouped 1x1 -> dense block-diagonal)
        W3d = grouped_to_dense(w3, cout)[0, 0]         # (c1, cout)

        src_entries = []
        off = 0
        for (ai, pt) in srcs:
            Hs, Ws, Cs = act_shapes[ai]
            e = {"act": ai, "ph": None, "pw": None}
            if pt > 0:  # fused avg_pool_2x2 (x pt) as left/right averaging matmuls
                f = 2 ** pt
                assert Hs // f == H_in and Ws // f == W_in
                Ph = np.zeros((N * H_in, N * Hs), np.float32)
                for n in range(N):
                    for ho in range(H_in):
                        Ph[n * H_in + ho, n * Hs + ho * f: n * Hs + (ho + 1) * f] = 1.0 / f
                Pw = np.zeros((Ws * Cs, W_in * Cs), np.float32)
                for wo in range(W_in):
                    for d in range(f):
                        for c in range(Cs):
                            Pw[(wo * f + d) * Cs + c, wo * Cs + c] = 1.0 / f
                e["ph"] = add(Ph)
                e["pw"] = add(Pw)
            e["s1"] = add(np.tile(s1[off:off + Cs], W_in)[None, :], jnp.float32)
            e["h1"] = add(np.tile(h1[off:off + Cs], W_in)[None, :], jnp.float32)
            e["w1"] = add(np.kron(np.eye(W_in, dtype=np.float32), W1d[off:off + Cs, :]))
            off += Cs
            src_entries.append(e)
        assert off == cin

        b1_idx = add(np.tile(b1f, W_in)[None, :], jnp.float32)

        # 3-tap shifted-matmul conv2: y = sum_ky (A[ky] @ z) @ R[ky]  (+ bias)
        A = np.zeros((3, N * H_out, N * H_in), np.float32)
        R = np.zeros((3, W_in * c1, W_out * c1), np.float32)
        for ky in range(3):
            for n in range(N):
                for ho in range(H_out):
                    h = ho * stride + ky - 1
                    if 0 <= h < H_in:
                        A[ky, n * H_out + ho, n * H_in + h] = 1.0
            for wo in range(W_out):
                for kx in range(3):
                    w = wo * stride + kx - 1
                    if 0 <= w < W_in:
                        R[ky, w * c1:(w + 1) * c1, wo * c1:(wo + 1) * c1] = W2e[ky, kx]
        A_idx = add(A)
        R_idx = add(R)
        b2_idx = add(np.tile(b2f, W_out)[None, :], jnp.float32)
        w3_idx = add(np.kron(np.eye(W_out, dtype=np.float32), W3d))
        b3_idx = add(np.tile(b3, W_out)[None, :], jnp.float32)

        plan_blocks.append(dict(sources=src_entries, b1=b1_idx, A=A_idx, R=R_idx,
                                b2=b2_idx, w3=w3_idx, b3=b3_idx))
        act_shapes.append((H_out, W_out, cout))

    # ---- head: global mean of the dense concat + fc_block chain, fused into the same kernel.
    # The torch tail 2x2-pools the earlier members before the concat and then applies a
    # full-spatial avg_pool2d; since both are exact uniform means the composition equals the
    # full-spatial mean of each member, so the 2x2 pools drop out.
    fcs_raw = raw["fc"]
    Wfc1 = _np(fcs_raw[0]["w"])
    bfc1, sfc1, hfc1 = _np(fcs_raw[0]["b"]), _np(fcs_raw[0]["bn_scale"]), _np(fcs_raw[0]["bn_shift"])
    F1 = Wfc1.shape[1]
    head_sources = []
    off = 0
    for i in range(ndl):
        ai = ncl - ndl + 1 + i
        Hs, Ws, Cs = act_shapes[ai]
        Mh = np.zeros((N, N * Hs), np.float32)
        for n in range(N):
            Mh[n, n * Hs:(n + 1) * Hs] = 1.0 / Hs
        G = np.zeros((Ws * Cs, F1), np.float32)
        Wsl = Wfc1[off:off + Cs, :] * sfc1[None, :]
        for w in range(Ws):
            G[w * Cs:(w + 1) * Cs, :] = Wsl / Ws
        head_sources.append(dict(act=ai, mh=add(Mh), g=add(G)))
        off += Cs
    assert off == Wfc1.shape[0]
    b0_idx = add((bfc1 * sfc1 + hfc1)[None, :], jnp.float32)
    tail_fcs = []
    for fp in fcs_raw[1:]:
        Wf = _np(fp["w"]) * _np(fp["bn_scale"])[None, :]
        bf = _np(fp["b"]) * _np(fp["bn_scale"]) + _np(fp["bn_shift"])
        tail_fcs.append(dict(w=add(Wf), b=add(bf[None, :], jnp.float32)))

    plan = dict(blocks=plan_blocks,
                head=dict(sources=head_sources, b0=b0_idx, fcs=tail_fcs),
                n_out=int(fcs_raw[-1]["w"].shape[1]), N=N)
    return plan, wargs


# ----------------------------- the single fused Pallas kernel --------------------------------

def make_kernel(plan):
    def kernel(*refs):
        out_ref = refs[-1]

        def rd(i):
            return refs[i][...]

        def dotf(a, b):  # bf16 MXU operands, f32 accumulation
            return jnp.dot(a.astype(WDT), b.astype(WDT),
                           preferred_element_type=jnp.float32)

        acts = [rd(0).astype(jnp.float32)]          # acts[0] = x, layout (N*H, W*C)
        for bp in plan["blocks"]:
            # fused: [pool] -> bn1 + relu -> conv1 (per dense-connected source, summed)
            pre = None
            for s in bp["sources"]:
                a = acts[s["act"]]
                if s["ph"] is not None:
                    a = dotf(rd(s["ph"]), a)        # avg-pool rows (h)
                    a = dotf(a, rd(s["pw"]))        # avg-pool lanes (w)
                a = jnp.maximum(a * rd(s["s1"]) + rd(s["h1"]), 0.0)
                c = dotf(a, rd(s["w1"]))
                pre = c if pre is None else pre + c
            z = jnp.maximum(pre + rd(bp["b1"]), 0.0)   # relu(bn2(conv1(...)))  (bn2 folded)

            # fused: grouped 3x3 conv (3-tap shifted matmul) + shuffle + bn3 + relu + conv3
            zb = z.astype(WDT)
            y = None
            for k in range(3):
                t = dotf(dotf(refs[bp["A"]][k], zb), refs[bp["R"]][k])
                y = t if y is None else y + t
            a3 = jnp.maximum(y + rd(bp["b2"]), 0.0)
            acts.append(dotf(a3, rd(bp["w3"])) + rd(bp["b3"]))
            # TODO(synk): DropBlock2D treated as identity (eval mode).

        # fused head: per-source spatial mean -> (bn-folded) fc chain
        hp = plan["head"]
        pre = None
        for s in hp["sources"]:
            m = dotf(dotf(rd(s["mh"]), acts[s["act"]]), rd(s["g"]))
            pre = m if pre is None else pre + m
        h = jnp.maximum(pre + rd(hp["b0"]), 0.0)
        for fc in hp["fcs"]:
            h = jnp.maximum(dotf(h, rd(fc["w"])) + rd(fc["b"]), 0.0)
        out_ref[...] = h.astype(out_ref.dtype)

    return kernel


def build_forward(plan, wargs):
    N, n_out = plan["N"], plan["n_out"]
    n_inputs = 1 + len(wargs)
    call = pl.pallas_call(
        make_kernel(plan),
        out_shape=jax.ShapeDtypeStruct((N, n_out), jnp.float32),
        in_specs=[pl.BlockSpec(memory_space=pltpu.MemorySpace.VMEM)] * n_inputs,
        out_specs=pl.BlockSpec(memory_space=pltpu.MemorySpace.VMEM),
    )

    def forward(x_nchw):
        n, c, hh, ww = x_nchw.shape
        # NCHW -> rows=(n,h), lanes=(w,c): the only XLA op outside the single fused kernel.
        x2 = jnp.transpose(x_nchw, (0, 2, 3, 1)).reshape(n * hh, ww * c).astype(jnp.float32)
        return call(x2, *wargs)

    return forward


# ----------------------------- main -----------------------------

if __name__ == "__main__":
    cfg = dict(num_cnn_layer=4, num_layer=6, num_inputs=4, num_outputs=10,
               input_size=16, num_downsampling=1, num_dense_layer=3, init_channel_num=8)
    struct = build_structure(cfg)
    blocks = cnn_block_shapes(cfg, struct)

    root = jax.random.PRNGKey(0)
    kparams, kx = jax.random.split(root)
    raw = init_params_raw(kparams, cfg, struct, blocks)

    N = 2
    plan, wargs = prepare(raw, cfg, struct, blocks, N, cfg["input_size"], cfg["input_size"])
    fwd = jax.jit(build_forward(plan, wargs))

    # PyTorch-convention NCHW input: (batch=2, channels=num_inputs, H=W=input_size)
    x = jax.random.normal(kx, (N, cfg["num_inputs"], cfg["input_size"], cfg["input_size"]),
                          dtype=jnp.float32)
    out = jax.block_until_ready(fwd(x))
    assert out.shape == (N, cfg["num_outputs"]), out.shape
    assert bool(jnp.all(jnp.isfinite(out)))
    print("KERNEL_OK")
</pallas_src>

<mosaic_0001>
module attributes {stable_mosaic.version = 11 : i64} {
  func.func @kernel(%arg0: memref<32x64xf32, #tpu.memory_space<vmem>>, %arg1: memref<1x64xf32, #tpu.memory_space<vmem>>, %arg2: memref<1x64xf32, #tpu.memory_space<vmem>>, %arg3: memref<64x128xbf16, #tpu.memory_space<vmem>>, %arg4: memref<1x128xf32, #tpu.memory_space<vmem>>, %arg5: memref<3x32x32xbf16, #tpu.memory_space<vmem>>, %arg6: memref<3x128x128xbf16, #tpu.memory_space<vmem>>, %arg7: memref<1x128xf32, #tpu.memory_space<vmem>>, %arg8: memref<128x128xbf16, #tpu.memory_space<vmem>>, %arg9: memref<1x128xf32, #tpu.memory_space<vmem>>, %arg10: memref<1x64xf32, #tpu.memory_space<vmem>>, %arg11: memref<1x64xf32, #tpu.memory_space<vmem>>, %arg12: memref<64x128xbf16, #tpu.memory_space<vmem>>, %arg13: memref<1x128xf32, #tpu.memory_space<vmem>>, %arg14: memref<1x128xf32, #tpu.memory_space<vmem>>, %arg15: memref<128x128xbf16, #tpu.memory_space<vmem>>, %arg16: memref<1x128xf32, #tpu.memory_space<vmem>>, %arg17: memref<3x32x32xbf16, #tpu.memory_space<vmem>>, %arg18: memref<3x128x128xbf16, #tpu.memory_space<vmem>>, %arg19: memref<1x128xf32, #tpu.memory_space<vmem>>, %arg20: memref<128x128xbf16, #tpu.memory_space<vmem>>, %arg21: memref<1x128xf32, #tpu.memory_space<vmem>>, %arg22: memref<1x64xf32, #tpu.memory_space<vmem>>, %arg23: memref<1x64xf32, #tpu.memory_space<vmem>>, %arg24: memref<64x256xbf16, #tpu.memory_space<vmem>>, %arg25: memref<1x128xf32, #tpu.memory_space<vmem>>, %arg26: memref<1x128xf32, #tpu.memory_space<vmem>>, %arg27: memref<128x256xbf16, #tpu.memory_space<vmem>>, %arg28: memref<1x128xf32, #tpu.memory_space<vmem>>, %arg29: memref<1x128xf32, #tpu.memory_space<vmem>>, %arg30: memref<128x256xbf16, #tpu.memory_space<vmem>>, %arg31: memref<1x256xf32, #tpu.memory_space<vmem>>, %arg32: memref<3x16x32xbf16, #tpu.memory_space<vmem>>, %arg33: memref<3x256x128xbf16, #tpu.memory_space<vmem>>, %arg34: memref<1x128xf32, #tpu.memory_space<vmem>>, %arg35: memref<128x128xbf16, #tpu.memory_space<vmem>>, %arg36: memref<1x128xf32, #tpu.memory_space<vmem>>, %arg37: memref<16x32xbf16, #tpu.memory_space<vmem>>, %arg38: memref<128x64xbf16, #tpu.memory_space<vmem>>, %arg39: memref<1x64xf32, #tpu.memory_space<vmem>>, %arg40: memref<1x64xf32, #tpu.memory_space<vmem>>, %arg41: memref<64x256xbf16, #tpu.memory_space<vmem>>, %arg42: memref<16x32xbf16, #tpu.memory_space<vmem>>, %arg43: memref<128x64xbf16, #tpu.memory_space<vmem>>, %arg44: memref<1x64xf32, #tpu.memory_space<vmem>>, %arg45: memref<1x64xf32, #tpu.memory_space<vmem>>, %arg46: memref<64x256xbf16, #tpu.memory_space<vmem>>, %arg47: memref<1x128xf32, #tpu.memory_space<vmem>>, %arg48: memref<1x128xf32, #tpu.memory_space<vmem>>, %arg49: memref<128x256xbf16, #tpu.memory_space<vmem>>, %arg50: memref<1x256xf32, #tpu.memory_space<vmem>>, %arg51: memref<3x16x16xbf16, #tpu.memory_space<vmem>>, %arg52: memref<3x256x256xbf16, #tpu.memory_space<vmem>>, %arg53: memref<1x256xf32, #tpu.memory_space<vmem>>, %arg54: memref<256x128xbf16, #tpu.memory_space<vmem>>, %arg55: memref<1x128xf32, #tpu.memory_space<vmem>>, %arg56: memref<2x32xbf16, #tpu.memory_space<vmem>>, %arg57: memref<128x16xbf16, #tpu.memory_space<vmem>>, %arg58: memref<2x16xbf16, #tpu.memory_space<vmem>>, %arg59: memref<128x16xbf16, #tpu.memory_space<vmem>>, %arg60: memref<2x16xbf16, #tpu.memory_space<vmem>>, %arg61: memref<128x16xbf16, #tpu.memory_space<vmem>>, %arg62: memref<1x16xf32, #tpu.memory_space<vmem>>, %arg63: memref<16x10xbf16, #tpu.memory_space<vmem>>, %arg64: memref<1x10xf32, #tpu.memory_space<vmem>>, %arg65: memref<2x10xf32, #tpu.memory_space<vmem>>) attributes {dimension_semantics = [], scalar_prefetch = 0 : i64, scratch_operands = 0 : i64, tpu.core_type = #tpu.core_type<tc>} {
    %c0 = arith.constant 0 : index
    %c0_0 = arith.constant 0 : index
    %0 = vector.load %arg0[%c0, %c0_0] : memref<32x64xf32, #tpu.memory_space<vmem>>, vector<32x64xf32>
    %c0_1 = arith.constant 0 : index
    %c0_2 = arith.constant 0 : index
    %1 = vector.load %arg1[%c0_1, %c0_2] : memref<1x64xf32, #tpu.memory_space<vmem>>, vector<1x64xf32>
    %2 = vector.broadcast %1 : vector<1x64xf32> to vector<32x64xf32>
    %3 = arith.mulf %0, %2 : vector<32x64xf32>
    %c0_3 = arith.constant 0 : index
    %c0_4 = arith.constant 0 : index
    %4 = vector.load %arg2[%c0_3, %c0_4] : memref<1x64xf32, #tpu.memory_space<vmem>>, vector<1x64xf32>
    %5 = vector.broadcast %4 : vector<1x64xf32> to vector<32x64xf32>
    %6 = arith.addf %3, %5 : vector<32x64xf32>
    %cst = arith.constant 0.000000e+00 : f32
    %7 = vector.broadcast %cst : f32 to vector<32x64xf32>
    %8 = arith.maximumf %6, %7 : vector<32x64xf32>
    %c0_5 = arith.constant 0 : index
    %c0_6 = arith.constant 0 : index
    %9 = vector.load %arg3[%c0_5, %c0_6] : memref<64x128xbf16, #tpu.memory_space<vmem>>, vector<64x128xbf16>
    %10 = arith.truncf %8 : vector<32x64xf32> to vector<32x64xbf16>
    %cst_7 = arith.constant dense<0.000000e+00> : vector<32x128xf32>
    %11 = tpu.matmul %10, %9, %cst_7 {dimension_numbers = #tpu.dot_dimension_numbers<[1], [0], [0], [1], [0, 0, 1, 1], [], []>} : vector<32x64xbf16>, vector<64x128xbf16>, vector<32x128xf32> -> vector<32x128xf32>
    %c0_8 = arith.constant 0 : index
    %c0_9 = arith.constant 0 : index
    %12 = vector.load %arg4[%c0_8, %c0_9] : memref<1x128xf32, #tpu.memory_space<vmem>>, vector<1x128xf32>
    %13 = vector.broadcast %12 : vector<1x128xf32> to vector<32x128xf32>
    %14 = arith.addf %11, %13 : vector<32x128xf32>
    %cst_10 = arith.constant 0.000000e+00 : f32
    %15 = vector.broadcast %cst_10 : f32 to vector<32x128xf32>
    %16 = arith.maximumf %14, %15 : vector<32x128xf32>
    %17 = arith.truncf %16 : vector<32x128xf32> to vector<32x128xbf16>
    %c0_11 = arith.constant 0 : index
    %c0_12 = arith.constant 0 : index
    %c0_13 = arith.constant 0 : index
    %18 = vector.load %arg5[%c0_11, %c0_12, %c0_13] : memref<3x32x32xbf16, #tpu.memory_space<vmem>>, vector<1x32x32xbf16>
    %19 = vector.shape_cast %18 : vector<1x32x32xbf16> to vector<32x32xbf16>
    %cst_14 = arith.constant dense<0.000000e+00> : vector<32x128xf32>
    %20 = tpu.matmul %19, %17, %cst_14 {dimension_numbers = #tpu.dot_dimension_numbers<[1], [0], [0], [1], [0, 0, 1, 1], [], []>} : vector<32x32xbf16>, vector<32x128xbf16>, vector<32x128xf32> -> vector<32x128xf32>
    %c0_15 = arith.constant 0 : index
    %c0_16 = arith.constant 0 : index
    %c0_17 = arith.constant 0 : index
    %21 = vector.load %arg6[%c0_15, %c0_16, %c0_17] : memref<3x128x128xbf16, #tpu.memory_space<vmem>>, vector<1x128x128xbf16>
    %22 = vector.shape_cast %21 : vector<1x128x128xbf16> to vector<128x128xbf16>
    %23 = arith.truncf %20 : vector<32x128xf32> to vector<32x128xbf16>
    %cst_18 = arith.constant dense<0.000000e+00> : vector<32x128xf32>
    %24 = tpu.matmul %23, %22, %cst_18 {dimension_numbers = #tpu.dot_dimension_numbers<[1], [0], [0], [1], [0, 0, 1, 1], [], []>} : vector<32x128xbf16>, vector<128x128xbf16>, vector<32x128xf32> -> vector<32x128xf32>
    %c1 = arith.constant 1 : index
    %c0_19 = arith.constant 0 : index
    %c0_20 = arith.constant 0 : index
    %25 = vector.load %arg5[%c1, %c0_19, %c0_20] : memref<3x32x32xbf16, #tpu.memory_space<vmem>>, vector<1x32x32xbf16>
    %26 = vector.shape_cast %25 : vector<1x32x32xbf16> to vector<32x32xbf16>
    %cst_21 = arith.constant dense<0.000000e+00> : vector<32x128xf32>
    %27 = tpu.matmul %26, %17, %cst_21 {dimension_numbers = #tpu.dot_dimension_numbers<[1], [0], [0], [1], [0, 0, 1, 1], [], []>} : vector<32x32xbf16>, vector<32x128xbf16>, vector<32x128xf32> -> vector<32x128xf32>
    %c1_22 = arith.constant 1 : index
    %c0_23 = arith.constant 0 : index
    %c0_24 = arith.constant 0 : index
    %28 = vector.load %arg6[%c1_22, %c0_23, %c0_24] : memref<3x128x128xbf16, #tpu.memory_space<vmem>>, vector<1x128x128xbf16>
    %29 = vector.shape_cast %28 : vector<1x128x128xbf16> to vector<128x128xbf16>
    %30 = arith.truncf %27 : vector<32x128xf32> to vector<32x128xbf16>
    %cst_25 = arith.constant dense<0.000000e+00> : vector<32x128xf32>
    %31 = tpu.matmul %30, %29, %cst_25 {dimension_numbers = #tpu.dot_dimension_numbers<[1], [0], [0], [1], [0, 0, 1, 1], [], []>} : vector<32x128xbf16>, vector<128x128xbf16>, vector<32x128xf32> -> vector<32x128xf32>
    %32 = arith.addf %24, %31 : vector<32x128xf32>
    %c2 = arith.constant 2 : index
    %c0_26 = arith.constant 0 : index
    %c0_27 = arith.constant 0 : index
    %33 = vector.load %arg5[%c2, %c0_26, %c0_27] : memref<3x32x32xbf16, #tpu.memory_space<vmem>>, vector<1x32x32xbf16>
    %34 = vector.shape_cast %33 : vector<1x32x32xbf16> to vector<32x32xbf16>
    %cst_28 = arith.constant dense<0.000000e+00> : vector<32x128xf32>
    %35 = tpu.matmul %34, %17, %cst_28 {dimension_numbers = #tpu.dot_dimension_numbers<[1], [0], [0], [1], [0, 0, 1, 1], [], []>} : vector<32x32xbf16>, vector<32x128xbf16>, vector<32x128xf32> -> vector<32x128xf32>
    %c2_29 = arith.constant 2 : index
    %c0_30 = arith.constant 0 : index
    %c0_31 = arith.constant 0 : index
    %36 = vector.load %arg6[%c2_29, %c0_30, %c0_31] : memref<3x128x128xbf16, #tpu.memory_space<vmem>>, vector<1x128x128xbf16>
    %37 = vector.shape_cast %36 : vector<1x128x128xbf16> to vector<128x128xbf16>
    %38 = arith.truncf %35 : vector<32x128xf32> to vector<32x128xbf16>
    %cst_32 = arith.constant dense<0.000000e+00> : vector<32x128xf32>
    %39 = tpu.matmul %38, %37, %cst_32 {dimension_numbers = #tpu.dot_dimension_numbers<[1], [0], [0], [1], [0, 0, 1, 1], [], []>} : vector<32x128xbf16>, vector<128x128xbf16>, vector<32x128xf32> -> vector<32x128xf32>
    %40 = arith.addf %32, %39 : vector<32x128xf32>
    %c0_33 = arith.constant 0 : index
    %c0_34 = arith.constant 0 : index
    %41 = vector.load %arg7[%c0_33, %c0_34] : memref<1x128xf32, #tpu.memory_space<vmem>>, vector<1x128xf32>
    %42 = vector.broadcast %41 : vector<1x128xf32> to vector<32x128xf32>
    %43 = arith.addf %40, %42 : vector<32x128xf32>
    %cst_35 = arith.constant 0.000000e+00 : f32
    %44 = vector.broadcast %cst_35 : f32 to vector<32x128xf32>
    %45 = arith.maximumf %43, %44 : vector<32x128xf32>
    %c0_36 = arith.constant 0 : index
    %c0_37 = arith.constant 0 : index
    %46 = vector.load %arg8[%c0_36, %c0_37] : memref<128x128xbf16, #tpu.memory_space<vmem>>, vector<128x128xbf16>
    %47 = arith.truncf %45 : vector<32x128xf32> to vector<32x128xbf16>
    %cst_38 = arith.constant dense<0.000000e+00> : vector<32x128xf32>
    %48 = tpu.matmul %47, %46, %cst_38 {dimension_numbers = #tpu.dot_dimension_numbers<[1], [0], [0], [1], [0, 0, 1, 1], [], []>} : vector<32x128xbf16>, vector<128x128xbf16>, vector<32x128xf32> -> vector<32x128xf32>
    %c0_39 = arith.constant 0 : index
    %c0_40 = arith.constant 0 : index
    %49 = vector.load %arg9[%c0_39, %c0_40] : memref<1x128xf32, #tpu.memory_space<vmem>>, vector<1x128xf32>
    %50 = vector.broadcast %49 : vector<1x128xf32> to vector<32x128xf32>
    %51 = arith.addf %48, %50 : vector<32x128xf32>
    %c0_41 = arith.constant 0 : index
    %c0_42 = arith.constant 0 : index
    %52 = vector.load %arg10[%c0_41, %c0_42] : memref<1x64xf32, #tpu.memory_space<vmem>>, vector<1x64xf32>
    %53 = vector.broadcast %52 : vector<1x64xf32> to vector<32x64xf32>
    %54 = arith.mulf %0, %53 : vector<32x64xf32>
    %c0_43 = arith.constant 0 : index
    %c0_44 = arith.constant 0 : index
    %55 = vector.load %arg11[%c0_43, %c0_44] : memref<1x64xf32, #tpu.memory_space<vmem>>, vector<1x64xf32>
    %56 = vector.broadcast %55 : vector<1x64xf32> to vector<32x64xf32>
    %57 = arith.addf %54, %56 : vector<32x64xf32>
    %cst_45 = arith.constant 0.000000e+00 : f32
    %58 = vector.broadcast %cst_45 : f32 to vector<32x64xf32>
    %59 = arith.maximumf %57, %58 : vector<32x64xf32>
    %c0_46 = arith.constant 0 : index
    %c0_47 = arith.constant 0 : index
    %60 = vector.load %arg12[%c0_46, %c0_47] : memref<64x128xbf16, #tpu.memory_space<vmem>>, vector<64x128xbf16>
    %61 = arith.truncf %59 : vector<32x64xf32> to vector<32x64xbf16>
    %cst_48 = arith.constant dense<0.000000e+00> : vector<32x128xf32>
    %62 = tpu.matmul %61, %60, %cst_48 {dimension_numbers = #tpu.dot_dimension_numbers<[1], [0], [0], [1], [0, 0, 1, 1], [], []>} : vector<32x64xbf16>, vector<64x128xbf16>, vector<32x128xf32> -> vector<32x128xf32>
    %c0_49 = arith.constant 0 : index
    %c0_50 = arith.constant 0 : index
    %63 = vector.load %arg13[%c0_49, %c0_50] : memref<1x128xf32, #tpu.memory_space<vmem>>, vector<1x128xf32>
    %64 = vector.broadcast %63 : vector<1x128xf32> to vector<32x128xf32>
    %65 = arith.mulf %51, %64 : vector<32x128xf32>
    %c0_51 = arith.constant 0 : index
    %c0_52 = arith.constant 0 : index
    %66 = vector.load %arg14[%c0_51, %c0_52] : memref<1x128xf32, #tpu.memory_space<vmem>>, vector<1x128xf32>
    %67 = vector.broadcast %66 : vector<1x128xf32> to vector<32x128xf32>
    %68 = arith.addf %65, %67 : vector<32x128xf32>
    %cst_53 = arith.constant 0.000000e+00 : f32
    %69 = vector.broadcast %cst_53 : f32 to vector<32x128xf32>
    %70 = arith.maximumf %68, %69 : vector<32x128xf32>
    %c0_54 = arith.constant 0 : index
    %c0_55 = arith.constant 0 : index
    %71 = vector.load %arg15[%c0_54, %c0_55] : memref<128x128xbf16, #tpu.memory_space<vmem>>, vector<128x128xbf16>
    %72 = arith.truncf %70 : vector<32x128xf32> to vector<32x128xbf16>
    %cst_56 = arith.constant dense<0.000000e+00> : vector<32x128xf32>
    %73 = tpu.matmul %72, %71, %cst_56 {dimension_numbers = #tpu.dot_dimension_numbers<[1], [0], [0], [1], [0, 0, 1, 1], [], []>} : vector<32x128xbf16>, vector<128x128xbf16>, vector<32x128xf32> -> vector<32x128xf32>
    %74 = arith.addf %62, %73 : vector<32x128xf32>
    %c0_57 = arith.constant 0 : index
    %c0_58 = arith.constant 0 : index
    %75 = vector.load %arg16[%c0_57, %c0_58] : memref<1x128xf32, #tpu.memory_space<vmem>>, vector<1x128xf32>
    %76 = vector.broadcast %75 : vector<1x128xf32> to vector<32x128xf32>
    %77 = arith.addf %74, %76 : vector<32x128xf32>
    %cst_59 = arith.constant 0.000000e+00 : f32
    %78 = vector.broadcast %cst_59 : f32 to vector<32x128xf32>
    %79 = arith.maximumf %77, %78 : vector<32x128xf32>
    %80 = arith.truncf %79 : vector<32x128xf32> to vector<32x128xbf16>
    %c0_60 = arith.constant 0 : index
    %c0_61 = arith.constant 0 : index
    %c0_62 = arith.constant 0 : index
    %81 = vector.load %arg17[%c0_60, %c0_61, %c0_62] : memref<3x32x32xbf16, #tpu.memory_space<vmem>>, vector<1x32x32xbf16>
    %82 = vector.shape_cast %81 : vector<1x32x32xbf16> to vector<32x32xbf16>
    %cst_63 = arith.constant dense<0.000000e+00> : vector<32x128xf32>
    %83 = tpu.matmul %82, %80, %cst_63 {dimension_numbers = #tpu.dot_dimension_numbers<[1], [0], [0], [1], [0, 0, 1, 1], [], []>} : vector<32x32xbf16>, vector<32x128xbf16>, vector<32x128xf32> -> vector<32x128xf32>
    %c0_64 = arith.constant 0 : index
    %c0_65 = arith.constant 0 : index
    %c0_66 = arith.constant 0 : index
    %84 = vector.load %arg18[%c0_64, %c0_65, %c0_66] : memref<3x128x128xbf16, #tpu.memory_space<vmem>>, vector<1x128x128xbf16>
    %85 = vector.shape_cast %84 : vector<1x128x128xbf16> to vector<128x128xbf16>
    %86 = arith.truncf %83 : vector<32x128xf32> to vector<32x128xbf16>
    %cst_67 = arith.constant dense<0.000000e+00> : vector<32x128xf32>
    %87 = tpu.matmul %86, %85, %cst_67 {dimension_numbers = #tpu.dot_dimension_numbers<[1], [0], [0], [1], [0, 0, 1, 1], [], []>} : vector<32x128xbf16>, vector<128x128xbf16>, vector<32x128xf32> -> vector<32x128xf32>
    %c1_68 = arith.constant 1 : index
    %c0_69 = arith.constant 0 : index
    %c0_70 = arith.constant 0 : index
    %88 = vector.load %arg17[%c1_68, %c0_69, %c0_70] : memref<3x32x32xbf16, #tpu.memory_space<vmem>>, vector<1x32x32xbf16>
    %89 = vector.shape_cast %88 : vector<1x32x32xbf16> to vector<32x32xbf16>
    %cst_71 = arith.constant dense<0.000000e+00> : vector<32x128xf32>
    %90 = tpu.matmul %89, %80, %cst_71 {dimension_numbers = #tpu.dot_dimension_numbers<[1], [0], [0], [1], [0, 0, 1, 1], [], []>} : vector<32x32xbf16>, vector<32x128xbf16>, vector<32x128xf32> -> vector<32x128xf32>
    %c1_72 = arith.constant 1 : index
    %c0_73 = arith.constant 0 : index
    %c0_74 = arith.constant 0 : index
    %91 = vector.load %arg18[%c1_72, %c0_73, %c0_74] : memref<3x128x128xbf16, #tpu.memory_space<vmem>>, vector<1x128x128xbf16>
    %92 = vector.shape_cast %91 : vector<1x128x128xbf16> to vector<128x128xbf16>
    %93 = arith.truncf %90 : vector<32x128xf32> to vector<32x128xbf16>
    %cst_75 = arith.constant dense<0.000000e+00> : vector<32x128xf32>
    %94 = tpu.matmul %93, %92, %cst_75 {dimension_numbers = #tpu.dot_dimension_numbers<[1], [0], [0], [1], [0, 0, 1, 1], [], []>} : vector<32x128xbf16>, vector<128x128xbf16>, vector<32x128xf32> -> vector<32x128xf32>
    %95 = arith.addf %87, %94 : vector<32x128xf32>
    %c2_76 = arith.constant 2 : index
    %c0_77 = arith.constant 0 : index
    %c0_78 = arith.constant 0 : index
    %96 = vector.load %arg17[%c2_76, %c0_77, %c0_78] : memref<3x32x32xbf16, #tpu.memory_space<vmem>>, vector<1x32x32xbf16>
    %97 = vector.shape_cast %96 : vector<1x32x32xbf16> to vector<32x32xbf16>
    %cst_79 = arith.constant dense<0.000000e+00> : vector<32x128xf32>
    %98 = tpu.matmul %97, %80, %cst_79 {dimension_numbers = #tpu.dot_dimension_numbers<[1], [0], [0], [1], [0, 0, 1, 1], [], []>} : vector<32x32xbf16>, vector<32x128xbf16>, vector<32x128xf32> -> vector<32x128xf32>
    %c2_80 = arith.constant 2 : index
    %c0_81 = arith.constant 0 : index
    %c0_82 = arith.constant 0 : index
    %99 = vector.load %arg18[%c2_80, %c0_81, %c0_82] : memref<3x128x128xbf16, #tpu.memory_space<vmem>>, vector<1x128x128xbf16>
    %100 = vector.shape_cast %99 : vector<1x128x128xbf16> to vector<128x128xbf16>
    %101 = arith.truncf %98 : vector<32x128xf32> to vector<32x128xbf16>
    %cst_83 = arith.constant dense<0.000000e+00> : vector<32x128xf32>
    %102 = tpu.matmul %101, %100, %cst_83 {dimension_numbers = #tpu.dot_dimension_numbers<[1], [0], [0], [1], [0, 0, 1, 1], [], []>} : vector<32x128xbf16>, vector<128x128xbf16>, vector<32x128xf32> -> vector<32x128xf32>
    %103 = arith.addf %95, %102 : vector<32x128xf32>
    %c0_84 = arith.constant 0 : index
    %c0_85 = arith.constant 0 : index
    %104 = vector.load %arg19[%c0_84, %c0_85] : memref<1x128xf32, #tpu.memory_space<vmem>>, vector<1x128xf32>
    %105 = vector.broadcast %104 : vector<1x128xf32> to vector<32x128xf32>
    %106 = arith.addf %103, %105 : vector<32x128xf32>
    %cst_86 = arith.constant 0.000000e+00 : f32
    %107 = vector.broadcast %cst_86 : f32 to vector<32x128xf32>
    %108 = arith.maximumf %106, %107 : vector<32x128xf32>
    %c0_87 = arith.constant 0 : index
    %c0_88 = arith.constant 0 : index
    %109 = vector.load %arg20[%c0_87, %c0_88] : memref<128x128xbf16, #tpu.memory_space<vmem>>, vector<128x128xbf16>
    %110 = arith.truncf %108 : vector<32x128xf32> to vector<32x128xbf16>
    %cst_89 = arith.constant dense<0.000000e+00> : vector<32x128xf32>
    %111 = tpu.matmul %110, %109, %cst_89 {dimension_numbers = #tpu.dot_dimension_numbers<[1], [0], [0], [1], [0, 0, 1, 1], [], []>} : vector<32x128xbf16>, vector<128x128xbf16>, vector<32x128xf32> -> vector<32x128xf32>
    %c0_90 = arith.constant 0 : index
    %c0_91 = arith.constant 0 : index
    %112 = vector.load %arg21[%c0_90, %c0_91] : memref<1x128xf32, #tpu.memory_space<vmem>>, vector<1x128xf32>
    %113 = vector.broadcast %112 : vector<1x128xf32> to vector<32x128xf32>
    %114 = arith.addf %111, %113 : vector<32x128xf32>
    %c0_92 = arith.constant 0 : index
    %c0_93 = arith.constant 0 : index
    %115 = vector.load %arg22[%c0_92, %c0_93] : memref<1x64xf32, #tpu.memory_space<vmem>>, vector<1x64xf32>
    %116 = vector.broadcast %115 : vector<1x64xf32> to vector<32x64xf32>
    %117 = arith.mulf %0, %116 : vector<32x64xf32>
    %c0_94 = arith.constant 0 : index
    %c0_95 = arith.constant 0 : index
    %118 = vector.load %arg23[%c0_94, %c0_95] : memref<1x64xf32, #tpu.memory_space<vmem>>, vector<1x64xf32>
    %119 = vector.broadcast %118 : vector<1x64xf32> to vector<32x64xf32>
    %120 = arith.addf %117, %119 : vector<32x64xf32>
    %cst_96 = arith.constant 0.000000e+00 : f32
    %121 = vector.broadcast %cst_96 : f32 to vector<32x64xf32>
    %122 = arith.maximumf %120, %121 : vector<32x64xf32>
    %c0_97 = arith.constant 0 : index
    %c0_98 = arith.constant 0 : index
    %123 = vector.load %arg24[%c0_97, %c0_98] : memref<64x256xbf16, #tpu.memory_space<vmem>>, vector<64x256xbf16>
    %124 = arith.truncf %122 : vector<32x64xf32> to vector<32x64xbf16>
    %cst_99 = arith.constant dense<0.000000e+00> : vector<32x256xf32>
    %125 = tpu.matmul %124, %123, %cst_99 {dimension_numbers = #tpu.dot_dimension_numbers<[1], [0], [0], [1], [0, 0, 1, 1], [], []>} : vector<32x64xbf16>, vector<64x256xbf16>, vector<32x256xf32> -> vector<32x256xf32>
    %c0_100 = arith.constant 0 : index
    %c0_101 = arith.constant 0 : index
    %126 = vector.load %arg25[%c0_100, %c0_101] : memref<1x128xf32, #tpu.memory_space<vmem>>, vector<1x128xf32>
    %127 = vector.broadcast %126 : vector<1x128xf32> to vector<32x128xf32>
    %128 = arith.mulf %51, %127 : vector<32x128xf32>
    %c0_102 = arith.constant 0 : index
    %c0_103 = arith.constant 0 : index
    %129 = vector.load %arg26[%c0_102, %c0_103] : memref<1x128xf32, #tpu.memory_space<vmem>>, vector<1x128xf32>
    %130 = vector.broadcast %129 : vector<1x128xf32> to vector<32x128xf32>
    %131 = arith.addf %128, %130 : vector<32x128xf32>
    %cst_104 = arith.constant 0.000000e+00 : f32
    %132 = vector.broadcast %cst_104 : f32 to vector<32x128xf32>
    %133 = arith.maximumf %131, %132 : vector<32x128xf32>
    %c0_105 = arith.constant 0 : index
    %c0_106 = arith.constant 0 : index
    %134 = vector.load %arg27[%c0_105, %c0_106] : memref<128x256xbf16, #tpu.memory_space<vmem>>, vector<128x256xbf16>
    %135 = arith.truncf %133 : vector<32x128xf32> to vector<32x128xbf16>
    %cst_107 = arith.constant dense<0.000000e+00> : vector<32x256xf32>
    %136 = tpu.matmul %135, %134, %cst_107 {dimension_numbers = #tpu.dot_dimension_numbers<[1], [0], [0], [1], [0, 0, 1, 1], [], []>} : vector<32x128xbf16>, vector<128x256xbf16>, vector<32x256xf32> -> vector<32x256xf32>
    %137 = arith.addf %125, %136 : vector<32x256xf32>
    %c0_108 = arith.constant 0 : index
    %c0_109 = arith.constant 0 : index
    %138 = vector.load %arg28[%c0_108, %c0_109] : memref<1x128xf32, #tpu.memory_space<vmem>>, vector<1x128xf32>
    %139 = vector.broadcast %138 : vector<1x128xf32> to vector<32x128xf32>
    %140 = arith.mulf %114, %139 : vector<32x128xf32>
    %c0_110 = arith.constant 0 : index
    %c0_111 = arith.constant 0 : index
    %141 = vector.load %arg29[%c0_110, %c0_111] : memref<1x128xf32, #tpu.memory_space<vmem>>, vector<1x128xf32>
    %142 = vector.broadcast %141 : vector<1x128xf32> to vector<32x128xf32>
    %143 = arith.addf %140, %142 : vector<32x128xf32>
    %cst_112 = arith.constant 0.000000e+00 : f32
    %144 = vector.broadcast %cst_112 : f32 to vector<32x128xf32>
    %145 = arith.maximumf %143, %144 : vector<32x128xf32>
    %c0_113 = arith.constant 0 : index
    %c0_114 = arith.constant 0 : index
    %146 = vector.load %arg30[%c0_113, %c0_114] : memref<128x256xbf16, #tpu.memory_space<vmem>>, vector<128x256xbf16>
    %147 = arith.truncf %145 : vector<32x128xf32> to vector<32x128xbf16>
    %cst_115 = arith.constant dense<0.000000e+00> : vector<32x256xf32>
    %148 = tpu.matmul %147, %146, %cst_115 {dimension_numbers = #tpu.dot_dimension_numbers<[1], [0], [0], [1], [0, 0, 1, 1], [], []>} : vector<32x128xbf16>, vector<128x256xbf16>, vector<32x256xf32> -> vector<32x256xf32>
    %149 = arith.addf %137, %148 : vector<32x256xf32>
    %c0_116 = arith.constant 0 : index
    %c0_117 = arith.constant 0 : index
    %150 = vector.load %arg31[%c0_116, %c0_117] : memref<1x256xf32, #tpu.memory_space<vmem>>, vector<1x256xf32>
    %151 = vector.broadcast %150 : vector<1x256xf32> to vector<32x256xf32>
    %152 = arith.addf %149, %151 : vector<32x256xf32>
    %cst_118 = arith.constant 0.000000e+00 : f32
    %153 = vector.broadcast %cst_118 : f32 to vector<32x256xf32>
    %154 = arith.maximumf %152, %153 : vector<32x256xf32>
    %155 = arith.truncf %154 : vector<32x256xf32> to vector<32x256xbf16>
    %c0_119 = arith.constant 0 : index
    %c0_120 = arith.constant 0 : index
    %c0_121 = arith.constant 0 : index
    %156 = vector.load %arg32[%c0_119, %c0_120, %c0_121] : memref<3x16x32xbf16, #tpu.memory_space<vmem>>, vector<1x16x32xbf16>
    %157 = vector.shape_cast %156 : vector<1x16x32xbf16> to vector<16x32xbf16>
    %cst_122 = arith.constant dense<0.000000e+00> : vector<16x256xf32>
    %158 = tpu.matmul %157, %155, %cst_122 {dimension_numbers = #tpu.dot_dimension_numbers<[1], [0], [0], [1], [0, 0, 1, 1], [], []>} : vector<16x32xbf16>, vector<32x256xbf16>, vector<16x256xf32> -> vector<16x256xf32>
    %c0_123 = arith.constant 0 : index
    %c0_124 = arith.constant 0 : index
    %c0_125 = arith.constant 0 : index
    %159 = vector.load %arg33[%c0_123, %c0_124, %c0_125] : memref<3x256x128xbf16, #tpu.memory_space<vmem>>, vector<1x256x128xbf16>
    %160 = vector.shape_cast %159 : vector<1x256x128xbf16> to vector<256x128xbf16>
    %161 = arith.truncf %158 : vector<16x256xf32> to vector<16x256xbf16>
    %cst_126 = arith.constant dense<0.000000e+00> : vector<16x128xf32>
    %162 = tpu.matmul %161, %160, %cst_126 {dimension_numbers = #tpu.dot_dimension_numbers<[1], [0], [0], [1], [0, 0, 1, 1], [], []>} : vector<16x256xbf16>, vector<256x128xbf16>, vector<16x128xf32> -> vector<16x128xf32>
    %c1_127 = arith.constant 1 : index
    %c0_128 = arith.constant 0 : index
    %c0_129 = arith.constant 0 : index
    %163 = vector.load %arg32[%c1_127, %c0_128, %c0_129] : memref<3x16x32xbf16, #tpu.memory_space<vmem>>, vector<1x16x32xbf16>
    %164 = vector.shape_cast %163 : vector<1x16x32xbf16> to vector<16x32xbf16>
    %cst_130 = arith.constant dense<0.000000e+00> : vector<16x256xf32>
    %165 = tpu.matmul %164, %155, %cst_130 {dimension_numbers = #tpu.dot_dimension_numbers<[1], [0], [0], [1], [0, 0, 1, 1], [], []>} : vector<16x32xbf16>, vector<32x256xbf16>, vector<16x256xf32> -> vector<16x256xf32>
    %c1_131 = arith.constant 1 : index
    %c0_132 = arith.constant 0 : index
    %c0_133 = arith.constant 0 : index
    %166 = vector.load %arg33[%c1_131, %c0_132, %c0_133] : memref<3x256x128xbf16, #tpu.memory_space<vmem>>, vector<1x256x128xbf16>
    %167 = vector.shape_cast %166 : vector<1x256x128xbf16> to vector<256x128xbf16>
    %168 = arith.truncf %165 : vector<16x256xf32> to vector<16x256xbf16>
    %cst_134 = arith.constant dense<0.000000e+00> : vector<16x128xf32>
    %169 = tpu.matmul %168, %167, %cst_134 {dimension_numbers = #tpu.dot_dimension_numbers<[1], [0], [0], [1], [0, 0, 1, 1], [], []>} : vector<16x256xbf16>, vector<256x128xbf16>, vector<16x128xf32> -> vector<16x128xf32>
    %170 = arith.addf %162, %169 : vector<16x128xf32>
    %c2_135 = arith.constant 2 : index
    %c0_136 = arith.constant 0 : index
    %c0_137 = arith.constant 0 : index
    %171 = vector.load %arg32[%c2_135, %c0_136, %c0_137] : memref<3x16x32xbf16, #tpu.memory_space<vmem>>, vector<1x16x32xbf16>
    %172 = vector.shape_cast %171 : vector<1x16x32xbf16> to vector<16x32xbf16>
    %cst_138 = arith.constant dense<0.000000e+00> : vector<16x256xf32>
    %173 = tpu.matmul %172, %155, %cst_138 {dimension_numbers = #tpu.dot_dimension_numbers<[1], [0], [0], [1], [0, 0, 1, 1], [], []>} : vector<16x32xbf16>, vector<32x256xbf16>, vector<16x256xf32> -> vector<16x256xf32>
    %c2_139 = arith.constant 2 : index
    %c0_140 = arith.constant 0 : index
    %c0_141 = arith.constant 0 : index
    %174 = vector.load %arg33[%c2_139, %c0_140, %c0_141] : memref<3x256x128xbf16, #tpu.memory_space<vmem>>, vector<1x256x128xbf16>
    %175 = vector.shape_cast %174 : vector<1x256x128xbf16> to vector<256x128xbf16>
    %176 = arith.truncf %173 : vector<16x256xf32> to vector<16x256xbf16>
    %cst_142 = arith.constant dense<0.000000e+00> : vector<16x128xf32>
    %177 = tpu.matmul %176, %175, %cst_142 {dimension_numbers = #tpu.dot_dimension_numbers<[1], [0], [0], [1], [0, 0, 1, 1], [], []>} : vector<16x256xbf16>, vector<256x128xbf16>, vector<16x128xf32> -> vector<16x128xf32>
    %178 = arith.addf %170, %177 : vector<16x128xf32>
    %c0_143 = arith.constant 0 : index
    %c0_144 = arith.constant 0 : index
    %179 = vector.load %arg34[%c0_143, %c0_144] : memref<1x128xf32, #tpu.memory_space<vmem>>, vector<1x128xf32>
    %180 = vector.broadcast %179 : vector<1x128xf32> to vector<16x128xf32>
    %181 = arith.addf %178, %180 : vector<16x128xf32>
    %cst_145 = arith.constant 0.000000e+00 : f32
    %182 = vector.broadcast %cst_145 : f32 to vector<16x128xf32>
    %183 = arith.maximumf %181, %182 : vector<16x128xf32>
    %c0_146 = arith.constant 0 : index
    %c0_147 = arith.constant 0 : index
    %184 = vector.load %arg35[%c0_146, %c0_147] : memref<128x128xbf16, #tpu.memory_space<vmem>>, vector<128x128xbf16>
    %185 = arith.truncf %183 : vector<16x128xf32> to vector<16x128xbf16>
    %cst_148 = arith.constant dense<0.000000e+00> : vector<16x128xf32>
    %186 = tpu.matmul %185, %184, %cst_148 {dimension_numbers = #tpu.dot_dimension_numbers<[1], [0], [0], [1], [0, 0, 1, 1], [], []>} : vector<16x128xbf16>, vector<128x128xbf16>, vector<16x128xf32> -> vector<16x128xf32>
    %c0_149 = arith.constant 0 : index
    %c0_150 = arith.constant 0 : index
    %187 = vector.load %arg36[%c0_149, %c0_150] : memref<1x128xf32, #tpu.memory_space<vmem>>, vector<1x128xf32>
    %188 = vector.broadcast %187 : vector<1x128xf32> to vector<16x128xf32>
    %189 = arith.addf %186, %188 : vector<16x128xf32>
    %c0_151 = arith.constant 0 : index
    %c0_152 = arith.constant 0 : index
    %190 = vector.load %arg37[%c0_151, %c0_152] : memref<16x32xbf16, #tpu.memory_space<vmem>>, vector<16x32xbf16>
    %191 = arith.truncf %51 : vector<32x128xf32> to vector<32x128xbf16>
    %cst_153 = arith.constant dense<0.000000e+00> : vector<16x128xf32>
    %192 = tpu.matmul %190, %191, %cst_153 {dimension_numbers = #tpu.dot_dimension_numbers<[1], [0], [0], [1], [0, 0, 1, 1], [], []>} : vector<16x32xbf16>, vector<32x128xbf16>, vector<16x128xf32> -> vector<16x128xf32>
    %c0_154 = arith.constant 0 : index
    %c0_155 = arith.constant 0 : index
    %193 = vector.load %arg38[%c0_154, %c0_155] : memref<128x64xbf16, #tpu.memory_space<vmem>>, vector<128x64xbf16>
    %194 = arith.truncf %192 : vector<16x128xf32> to vector<16x128xbf16>
    %cst_156 = arith.constant dense<0.000000e+00> : vector<16x64xf32>
    %195 = tpu.matmul %194, %193, %cst_156 {dimension_numbers = #tpu.dot_dimension_numbers<[1], [0], [0], [1], [0, 0, 1, 1], [], []>} : vector<16x128xbf16>, vector<128x64xbf16>, vector<16x64xf32> -> vector<16x64xf32>
    %c0_157 = arith.constant 0 : index
    %c0_158 = arith.constant 0 : index
    %196 = vector.load %arg39[%c0_157, %c0_158] : memref<1x64xf32, #tpu.memory_space<vmem>>, vector<1x64xf32>
    %197 = vector.broadcast %196 : vector<1x64xf32> to vector<16x64xf32>
    %198 = arith.mulf %195, %197 : vector<16x64xf32>
    %c0_159 = arith.constant 0 : index
    %c0_160 = arith.constant 0 : index
    %199 = vector.load %arg40[%c0_159, %c0_160] : memref<1x64xf32, #tpu.memory_space<vmem>>, vector<1x64xf32>
    %200 = vector.broadcast %199 : vector<1x64xf32> to vector<16x64xf32>
    %201 = arith.addf %198, %200 : vector<16x64xf32>
    %cst_161 = arith.constant 0.000000e+00 : f32
    %202 = vector.broadcast %cst_161 : f32 to vector<16x64xf32>
    %203 = arith.maximumf %201, %202 : vector<16x64xf32>
    %c0_162 = arith.constant 0 : index
    %c0_163 = arith.constant 0 : index
    %204 = vector.load %arg41[%c0_162, %c0_163] : memref<64x256xbf16, #tpu.memory_space<vmem>>, vector<64x256xbf16>
    %205 = arith.truncf %203 : vector<16x64xf32> to vector<16x64xbf16>
    %cst_164 = arith.constant dense<0.000000e+00> : vector<16x256xf32>
    %206 = tpu.matmul %205, %204, %cst_164 {dimension_numbers = #tpu.dot_dimension_numbers<[1], [0], [0], [1], [0, 0, 1, 1], [], []>} : vector<16x64xbf16>, vector<64x256xbf16>, vector<16x256xf32> -> vector<16x256xf32>
    %c0_165 = arith.constant 0 : index
    %c0_166 = arith.constant 0 : index
    %207 = vector.load %arg42[%c0_165, %c0_166] : memref<16x32xbf16, #tpu.memory_space<vmem>>, vector<16x32xbf16>
    %208 = arith.truncf %114 : vector<32x128xf32> to vector<32x128xbf16>
    %cst_167 = arith.constant dense<0.000000e+00> : vector<16x128xf32>
    %209 = tpu.matmul %207, %208, %cst_167 {dimension_numbers = #tpu.dot_dimension_numbers<[1], [0], [0], [1], [0, 0, 1, 1], [], []>} : vector<16x32xbf16>, vector<32x128xbf16>, vector<16x128xf32> -> vector<16x128xf32>
    %c0_168 = arith.constant 0 : index
    %c0_169 = arith.constant 0 : index
    %210 = vector.load %arg43[%c0_168, %c0_169] : memref<128x64xbf16, #tpu.memory_space<vmem>>, vector<128x64xbf16>
    %211 = arith.truncf %209 : vector<16x128xf32> to vector<16x128xbf16>
    %cst_170 = arith.constant dense<0.000000e+00> : vector<16x64xf32>
    %212 = tpu.matmul %211, %210, %cst_170 {dimension_numbers = #tpu.dot_dimension_numbers<[1], [0], [0], [1], [0, 0, 1, 1], [], []>} : vector<16x128xbf16>, vector<128x64xbf16>, vector<16x64xf32> -> vector<16x64xf32>
    %c0_171 = arith.constant 0 : index
    %c0_172 = arith.constant 0 : index
    %213 = vector.load %arg44[%c0_171, %c0_172] : memref<1x64xf32, #tpu.memory_space<vmem>>, vector<1x64xf32>
    %214 = vector.broadcast %213 : vector<1x64xf32> to vector<16x64xf32>
    %215 = arith.mulf %212, %214 : vector<16x64xf32>
    %c0_173 = arith.constant 0 : index
    %c0_174 = arith.constant 0 : index
    %216 = vector.load %arg45[%c0_173, %c0_174] : memref<1x64xf32, #tpu.memory_space<vmem>>, vector<1x64xf32>
    %217 = vector.broadcast %216 : vector<1x64xf32> to vector<16x64xf32>
    %218 = arith.addf %215, %217 : vector<16x64xf32>
    %cst_175 = arith.constant 0.000000e+00 : f32
    %219 = vector.broadcast %cst_175 : f32 to vector<16x64xf32>
    %220 = arith.maximumf %218, %219 : vector<16x64xf32>
    %c0_176 = arith.constant 0 : index
    %c0_177 = arith.constant 0 : index
    %221 = vector.load %arg46[%c0_176, %c0_177] : memref<64x256xbf16, #tpu.memory_space<vmem>>, vector<64x256xbf16>
    %222 = arith.truncf %220 : vector<16x64xf32> to vector<16x64xbf16>
    %cst_178 = arith.constant dense<0.000000e+00> : vector<16x256xf32>
    %223 = tpu.matmul %222, %221, %cst_178 {dimension_numbers = #tpu.dot_dimension_numbers<[1], [0], [0], [1], [0, 0, 1, 1], [], []>} : vector<16x64xbf16>, vector<64x256xbf16>, vector<16x256xf32> -> vector<16x256xf32>
    %224 = arith.addf %206, %223 : vector<16x256xf32>
    %c0_179 = arith.constant 0 : index
    %c0_180 = arith.constant 0 : index
    %225 = vector.load %arg47[%c0_179, %c0_180] : memref<1x128xf32, #tpu.memory_space<vmem>>, vector<1x128xf32>
    %226 = vector.broadcast %225 : vector<1x128xf32> to vector<16x128xf32>
    %227 = arith.mulf %189, %226 : vector<16x128xf32>
    %c0_181 = arith.constant 0 : index
    %c0_182 = arith.constant 0 : index
    %228 = vector.load %arg48[%c0_181, %c0_182] : memref<1x128xf32, #tpu.memory_space<vmem>>, vector<1x128xf32>
    %229 = vector.broadcast %228 : vector<1x128xf32> to vector<16x128xf32>
    %230 = arith.addf %227, %229 : vector<16x128xf32>
    %cst_183 = arith.constant 0.000000e+00 : f32
    %231 = vector.broadcast %cst_183 : f32 to vector<16x128xf32>
    %232 = arith.maximumf %230, %231 : vector<16x128xf32>
    %c0_184 = arith.constant 0 : index
    %c0_185 = arith.constant 0 : index
    %233 = vector.load %arg49[%c0_184, %c0_185] : memref<128x256xbf16, #tpu.memory_space<vmem>>, vector<128x256xbf16>
    %234 = arith.truncf %232 : vector<16x128xf32> to vector<16x128xbf16>
    %cst_186 = arith.constant dense<0.000000e+00> : vector<16x256xf32>
    %235 = tpu.matmul %234, %233, %cst_186 {dimension_numbers = #tpu.dot_dimension_numbers<[1], [0], [0], [1], [0, 0, 1, 1], [], []>} : vector<16x128xbf16>, vector<128x256xbf16>, vector<16x256xf32> -> vector<16x256xf32>
    %236 = arith.addf %224, %235 : vector<16x256xf32>
    %c0_187 = arith.constant 0 : index
    %c0_188 = arith.constant 0 : index
    %237 = vector.load %arg50[%c0_187, %c0_188] : memref<1x256xf32, #tpu.memory_space<vmem>>, vector<1x256xf32>
    %238 = vector.broadcast %237 : vector<1x256xf32> to vector<16x256xf32>
    %239 = arith.addf %236, %238 : vector<16x256xf32>
    %cst_189 = arith.constant 0.000000e+00 : f32
    %240 = vector.broadcast %cst_189 : f32 to vector<16x256xf32>
    %241 = arith.maximumf %239, %240 : vector<16x256xf32>
    %242 = arith.truncf %241 : vector<16x256xf32> to vector<16x256xbf16>
    %c0_190 = arith.constant 0 : index
    %c0_191 = arith.constant 0 : index
    %c0_192 = arith.constant 0 : index
    %243 = vector.load %arg51[%c0_190, %c0_191, %c0_192] : memref<3x16x16xbf16, #tpu.memory_space<vmem>>, vector<1x16x16xbf16>
    %244 = vector.shape_cast %243 : vector<1x16x16xbf16> to vector<16x16xbf16>
    %cst_193 = arith.constant dense<0.000000e+00> : vector<16x256xf32>
    %245 = tpu.matmul %244, %242, %cst_193 {dimension_numbers = #tpu.dot_dimension_numbers<[1], [0], [0], [1], [0, 0, 1, 1], [], []>} : vector<16x16xbf16>, vector<16x256xbf16>, vector<16x256xf32> -> vector<16x256xf32>
    %c0_194 = arith.constant 0 : index
    %c0_195 = arith.constant 0 : index
    %c0_196 = arith.constant 0 : index
    %246 = vector.load %arg52[%c0_194, %c0_195, %c0_196] : memref<3x256x256xbf16, #tpu.memory_space<vmem>>, vector<1x256x256xbf16>
    %247 = vector.shape_cast %246 : vector<1x256x256xbf16> to vector<256x256xbf16>
    %248 = arith.truncf %245 : vector<16x256xf32> to vector<16x256xbf16>
    %cst_197 = arith.constant dense<0.000000e+00> : vector<16x256xf32>
    %249 = tpu.matmul %248, %247, %cst_197 {dimension_numbers = #tpu.dot_dimension_numbers<[1], [0], [0], [1], [0, 0, 1, 1], [], []>} : vector<16x256xbf16>, vector<256x256xbf16>, vector<16x256xf32> -> vector<16x256xf32>
    %c1_198 = arith.constant 1 : index
    %c0_199 = arith.constant 0 : index
    %c0_200 = arith.constant 0 : index
    %250 = vector.load %arg51[%c1_198, %c0_199, %c0_200] : memref<3x16x16xbf16, #tpu.memory_space<vmem>>, vector<1x16x16xbf16>
    %251 = vector.shape_cast %250 : vector<1x16x16xbf16> to vector<16x16xbf16>
    %cst_201 = arith.constant dense<0.000000e+00> : vector<16x256xf32>
    %252 = tpu.matmul %251, %242, %cst_201 {dimension_numbers = #tpu.dot_dimension_numbers<[1], [0], [0], [1], [0, 0, 1, 1], [], []>} : vector<16x16xbf16>, vector<16x256xbf16>, vector<16x256xf32> -> vector<16x256xf32>
    %c1_202 = arith.constant 1 : index
    %c0_203 = arith.constant 0 : index
    %c0_204 = arith.constant 0 : index
    %253 = vector.load %arg52[%c1_202, %c0_203, %c0_204] : memref<3x256x256xbf16, #tpu.memory_space<vmem>>, vector<1x256x256xbf16>
    %254 = vector.shape_cast %253 : vector<1x256x256xbf16> to vector<256x256xbf16>
    %255 = arith.truncf %252 : vector<16x256xf32> to vector<16x256xbf16>
    %cst_205 = arith.constant dense<0.000000e+00> : vector<16x256xf32>
    %256 = tpu.matmul %255, %254, %cst_205 {dimension_numbers = #tpu.dot_dimension_numbers<[1], [0], [0], [1], [0, 0, 1, 1], [], []>} : vector<16x256xbf16>, vector<256x256xbf16>, vector<16x256xf32> -> vector<16x256xf32>
    %257 = arith.addf %249, %256 : vector<16x256xf32>
    %c2_206 = arith.constant 2 : index
    %c0_207 = arith.constant 0 : index
    %c0_208 = arith.constant 0 : index
    %258 = vector.load %arg51[%c2_206, %c0_207, %c0_208] : memref<3x16x16xbf16, #tpu.memory_space<vmem>>, vector<1x16x16xbf16>
    %259 = vector.shape_cast %258 : vector<1x16x16xbf16> to vector<16x16xbf16>
    %cst_209 = arith.constant dense<0.000000e+00> : vector<16x256xf32>
    %260 = tpu.matmul %259, %242, %cst_209 {dimension_numbers = #tpu.dot_dimension_numbers<[1], [0], [0], [1], [0, 0, 1, 1], [], []>} : vector<16x16xbf16>, vector<16x256xbf16>, vector<16x256xf32> -> vector<16x256xf32>
    %c2_210 = arith.constant 2 : index
    %c0_211 = arith.constant 0 : index
    %c0_212 = arith.constant 0 : index
    %261 = vector.load %arg52[%c2_210, %c0_211, %c0_212] : memref<3x256x256xbf16, #tpu.memory_space<vmem>>, vector<1x256x256xbf16>
    %262 = vector.shape_cast %261 : vector<1x256x256xbf16> to vector<256x256xbf16>
    %263 = arith.truncf %260 : vector<16x256xf32> to vector<16x256xbf16>
    %cst_213 = arith.constant dense<0.000000e+00> : vector<16x256xf32>
    %264 = tpu.matmul %263, %262, %cst_213 {dimension_numbers = #tpu.dot_dimension_numbers<[1], [0], [0], [1], [0, 0, 1, 1], [], []>} : vector<16x256xbf16>, vector<256x256xbf16>, vector<16x256xf32> -> vector<16x256xf32>
    %265 = arith.addf %257, %264 : vector<16x256xf32>
    %c0_214 = arith.constant 0 : index
    %c0_215 = arith.constant 0 : index
    %266 = vector.load %arg53[%c0_214, %c0_215] : memref<1x256xf32, #tpu.memory_space<vmem>>, vector<1x256xf32>
    %267 = vector.broadcast %266 : vector<1x256xf32> to vector<16x256xf32>
    %268 = arith.addf %265, %267 : vector<16x256xf32>
    %cst_216 = arith.constant 0.000000e+00 : f32
    %269 = vector.broadcast %cst_216 : f32 to vector<16x256xf32>
    %270 = arith.maximumf %268, %269 : vector<16x256xf32>
    %c0_217 = arith.constant 0 : index
    %c0_218 = arith.constant 0 : index
    %271 = vector.load %arg54[%c0_217, %c0_218] : memref<256x128xbf16, #tpu.memory_space<vmem>>, vector<256x128xbf16>
    %272 = arith.truncf %270 : vector<16x256xf32> to vector<16x256xbf16>
    %cst_219 = arith.constant dense<0.000000e+00> : vector<16x128xf32>
    %273 = tpu.matmul %272, %271, %cst_219 {dimension_numbers = #tpu.dot_dimension_numbers<[1], [0], [0], [1], [0, 0, 1, 1], [], []>} : vector<16x256xbf16>, vector<256x128xbf16>, vector<16x128xf32> -> vector<16x128xf32>
    %c0_220 = arith.constant 0 : index
    %c0_221 = arith.constant 0 : index
    %274 = vector.load %arg55[%c0_220, %c0_221] : memref<1x128xf32, #tpu.memory_space<vmem>>, vector<1x128xf32>
    %275 = vector.broadcast %274 : vector<1x128xf32> to vector<16x128xf32>
    %276 = arith.addf %273, %275 : vector<16x128xf32>
    %c0_222 = arith.constant 0 : index
    %c0_223 = arith.constant 0 : index
    %277 = vector.load %arg56[%c0_222, %c0_223] : memref<2x32xbf16, #tpu.memory_space<vmem>>, vector<2x32xbf16>
    %278 = arith.truncf %114 : vector<32x128xf32> to vector<32x128xbf16>
    %cst_224 = arith.constant dense<0.000000e+00> : vector<2x128xf32>
    %279 = tpu.matmul %277, %278, %cst_224 {dimension_numbers = #tpu.dot_dimension_numbers<[1], [0], [0], [1], [0, 0, 1, 1], [], []>} : vector<2x32xbf16>, vector<32x128xbf16>, vector<2x128xf32> -> vector<2x128xf32>
    %c0_225 = arith.constant 0 : index
    %c0_226 = arith.constant 0 : index
    %280 = vector.load %arg57[%c0_225, %c0_226] : memref<128x16xbf16, #tpu.memory_space<vmem>>, vector<128x16xbf16>
    %281 = arith.truncf %279 : vector<2x128xf32> to vector<2x128xbf16>
    %cst_227 = arith.constant dense<0.000000e+00> : vector<2x16xf32>
    %282 = tpu.matmul %281, %280, %cst_227 {dimension_numbers = #tpu.dot_dimension_numbers<[1], [0], [0], [1], [0, 0, 1, 1], [], []>} : vector<2x128xbf16>, vector<128x16xbf16>, vector<2x16xf32> -> vector<2x16xf32>
    %c0_228 = arith.constant 0 : index
    %c0_229 = arith.constant 0 : index
    %283 = vector.load %arg58[%c0_228, %c0_229] : memref<2x16xbf16, #tpu.memory_space<vmem>>, vector<2x16xbf16>
    %284 = arith.truncf %189 : vector<16x128xf32> to vector<16x128xbf16>
    %cst_230 = arith.constant dense<0.000000e+00> : vector<2x128xf32>
    %285 = tpu.matmul %283, %284, %cst_230 {dimension_numbers = #tpu.dot_dimension_numbers<[1], [0], [0], [1], [0, 0, 1, 1], [], []>} : vector<2x16xbf16>, vector<16x128xbf16>, vector<2x128xf32> -> vector<2x128xf32>
    %c0_231 = arith.constant 0 : index
    %c0_232 = arith.constant 0 : index
    %286 = vector.load %arg59[%c0_231, %c0_232] : memref<128x16xbf16, #tpu.memory_space<vmem>>, vector<128x16xbf16>
    %287 = arith.truncf %285 : vector<2x128xf32> to vector<2x128xbf16>
    %cst_233 = arith.constant dense<0.000000e+00> : vector<2x16xf32>
    %288 = tpu.matmul %287, %286, %cst_233 {dimension_numbers = #tpu.dot_dimension_numbers<[1], [0], [0], [1], [0, 0, 1, 1], [], []>} : vector<2x128xbf16>, vector<128x16xbf16>, vector<2x16xf32> -> vector<2x16xf32>
    %289 = arith.addf %282, %288 : vector<2x16xf32>
    %c0_234 = arith.constant 0 : index
    %c0_235 = arith.constant 0 : index
    %290 = vector.load %arg60[%c0_234, %c0_235] : memref<2x16xbf16, #tpu.memory_space<vmem>>, vector<2x16xbf16>
    %291 = arith.truncf %276 : vector<16x128xf32> to vector<16x128xbf16>
    %cst_236 = arith.constant dense<0.000000e+00> : vector<2x128xf32>
    %292 = tpu.matmul %290, %291, %cst_236 {dimension_numbers = #tpu.dot_dimension_numbers<[1], [0], [0], [1], [0, 0, 1, 1], [], []>} : vector<2x16xbf16>, vector<16x128xbf16>, vector<2x128xf32> -> vector<2x128xf32>
    %c0_237 = arith.constant 0 : index
    %c0_238 = arith.constant 0 : index
    %293 = vector.load %arg61[%c0_237, %c0_238] : memref<128x16xbf16, #tpu.memory_space<vmem>>, vector<128x16xbf16>
    %294 = arith.truncf %292 : vector<2x128xf32> to vector<2x128xbf16>
    %cst_239 = arith.constant dense<0.000000e+00> : vector<2x16xf32>
    %295 = tpu.matmul %294, %293, %cst_239 {dimension_numbers = #tpu.dot_dimension_numbers<[1], [0], [0], [1], [0, 0, 1, 1], [], []>} : vector<2x128xbf16>, vector<128x16xbf16>, vector<2x16xf32> -> vector<2x16xf32>
    %296 = arith.addf %289, %295 : vector<2x16xf32>
    %c0_240 = arith.constant 0 : index
    %c0_241 = arith.constant 0 : index
    %297 = vector.load %arg62[%c0_240, %c0_241] : memref<1x16xf32, #tpu.memory_space<vmem>>, vector<1x16xf32>
    %298 = vector.broadcast %297 : vector<1x16xf32> to vector<2x16xf32>
    %299 = arith.addf %296, %298 : vector<2x16xf32>
    %cst_242 = arith.constant 0.000000e+00 : f32
    %300 = vector.broadcast %cst_242 : f32 to vector<2x16xf32>
    %301 = arith.maximumf %299, %300 : vector<2x16xf32>
    %c0_243 = arith.constant 0 : index
    %c0_244 = arith.constant 0 : index
    %302 = vector.load %arg63[%c0_243, %c0_244] : memref<16x10xbf16, #tpu.memory_space<vmem>>, vector<16x10xbf16>
    %303 = arith.truncf %301 : vector<2x16xf32> to vector<2x16xbf16>
    %cst_245 = arith.constant dense<0.000000e+00> : vector<2x10xf32>
    %304 = tpu.matmul %303, %302, %cst_245 {dimension_numbers = #tpu.dot_dimension_numbers<[1], [0], [0], [1], [0, 0, 1, 1], [], []>} : vector<2x16xbf16>, vector<16x10xbf16>, vector<2x10xf32> -> vector<2x10xf32>
    %c0_246 = arith.constant 0 : index
    %c0_247 = arith.constant 0 : index
    %305 = vector.load %arg64[%c0_246, %c0_247] : memref<1x10xf32, #tpu.memory_space<vmem>>, vector<1x10xf32>
    %306 = vector.broadcast %305 : vector<1x10xf32> to vector<2x10xf32>
    %307 = arith.addf %304, %306 : vector<2x10xf32>
    %cst_248 = arith.constant 0.000000e+00 : f32
    %308 = vector.broadcast %cst_248 : f32 to vector<2x10xf32>
    %309 = arith.maximumf %307, %308 : vector<2x10xf32>
    %c0_249 = arith.constant 0 : index
    %c0_250 = arith.constant 0 : index
    %310 = vector.load %arg65[%c0_249, %c0_250] : memref<2x10xf32, #tpu.memory_space<vmem>>, vector<2x10xf32>
    tpu.vector_store %arg65[%c0_249, %c0_250], %309 {strides = array<i32>} : memref<2x10xf32, #tpu.memory_space<vmem>>, vector<2x10xf32>,
    return
  }
}

</mosaic_0001>

<bundles_post_ra>
// kernel: forward.1
= control target key start
LH: loop header
LB: loop body
LE: loop exit
PB: predicated region body
PF: predicated region fallthrough
CT: control target
= control target key end

     0   :  { %s8362_s6 = smov 1   ;;  %s8363_s10 = smov 2   ;;  %s9513_s0 = inlined_call_operand.smem [shape: u32[66], index: -1, kind: input, shape index: {}] }
   0x1   :  { %s8455_s5 = sld [smem:[%s9513_s0]]   ;;  %s8364_s14 = smov 3  }
   0x2   :  { %s8460_s9 = sld [smem:[%s9513_s0 + %s8362_s6]]   ;;  %s8365_s18 = smov 4  }
   0x3   :  { %s8465_s13 = sld [smem:[%s9513_s0 + %s8363_s10]]   ;;  %s8366_s22 = smov 5  }
   0x4   :  { %s8470_s17 = sld [smem:[%s9513_s0 + %s8364_s14]]   ;;  %s8367_s26 = smov 6  }
   0x5   :  { %s8475_s21 = sld [smem:[%s9513_s0 + %s8365_s18]]   ;;  %s8368_s30 = smov 7  }
   0x6   :  { %s8480_s25 = sld [smem:[%s9513_s0 + %s8366_s22]]   ;;  %s8369_s4 = smov 8  }
   0x7   :  { %9543 = sst [smem:[#allocation39_spill]] %s8455_s5  ;;  %s8370_s10 = smov 9  }
   0x8   :  { %s8485_s29 = sld [smem:[%s9513_s0 + %s8367_s26]]   ;;  %s8371_s15 = smov 10  }
   0x9   :  { %s8490_s3 = sld [smem:[%s9513_s0 + %s8368_s30]]   ;;  %s8372_s20 = smov 11  }
   0xa   :  { %9544 = sst [smem:[#allocation40_spill]] %s8470_s17  ;;  %s8373_s26 = smov 12  }
   0xb   :  { %s8495_s8 = sld [smem:[%s9513_s0 + %s8369_s4]]   ;;  %s8374_s1 = smov 13  }
   0xc   :  { %9545 = sst [smem:[#allocation41_spill]] %s8480_s25  ;;  %s8375_s7 = smov 14  }
   0xd   :  { %s8500_s14 = sld [smem:[%s9513_s0 + %s8370_s10]]   ;;  %s8377_s22 = smov 16  }
   0xe   :  { %9546 = sst [smem:[#allocation42_spill]] %s8485_s29  ;;  %s8378_s28 = smov 17  }
   0xf   :  { %s8505_s19 = sld [smem:[%s9513_s0 + %s8371_s15]]   ;;  %s8376_s15 = smov 15  }
  0x10   :  { %s8510_s24 = sld [smem:[%s9513_s0 + %s8372_s20]]  }
  0x11   :  { %9547 = sst [smem:[#allocation43_spill]] %s8495_s8 }
  0x12   :  { %s8515_s30 = sld [smem:[%s9513_s0 + %s8373_s26]]  }
  0x13   :  { %s8520_s6 = sld [smem:[%s9513_s0 + %s8374_s1]]  }
  0x14   :  { %s8525_s12 = sld [smem:[%s9513_s0 + %s8375_s7]]   ;;  %s8379_s7 = smov 18  }
  0x15   :  { %s8530_s20 = sld [smem:[%s9513_s0 + %s8376_s15]]   ;;  %s8380_s15 = smov 19  }
  0x16   :  { %s8535_s27 = sld [smem:[%s9513_s0 + %s8377_s22]]   ;;  %s8381_s22 = smov 20  }
  0x17   :  { %s8540_s4 = sld [smem:[%s9513_s0 + %s8378_s28]]   ;;  %s8382_s28 = smov 21  }
  0x18   :  { %9548 = sst [smem:[#allocation44_spill]] %s8515_s30 }
  0x19   :  { %s8545_s30 = sld [smem:[%s9513_s0 + %s8379_s7]]   ;;  %s8383_s7 = smov 22  }
  0x1a   :  { %s8555_s8 = sld [smem:[%s9513_s0 + %s8381_s22]]   ;;  %s8385_s22 = smov 24  }
  0x1b   :  { %9549 = sst [smem:[#allocation45_spill]] %s8530_s20 }
  0x1c   :  { %s8550_s20 = sld [smem:[%s9513_s0 + %s8380_s15]]   ;;  %s8384_s15 = smov 23  }
  0x1d   :  { %9550 = sst [smem:[#allocation46_spill]] %s8540_s4 }
  0x1e   :  { %s8560_s4 = sld [smem:[%s9513_s0 + %s8382_s28]]   ;;  %s8386_s28 = smov 25  }
  0x1f   :  { %9551 = sst [smem:[#allocation47_spill]] %s8545_s30 }
  0x20   :  { %9552 = sst [smem:[#allocation48_spill]] %s8555_s8 }
  0x21   :  { %s8565_s30 = sld [smem:[%s9513_s0 + %s8383_s7]]   ;;  %s8387_s7 = smov 26  }
  0x22   :  { %s8570_s29 = sld [smem:[%s9513_s0 + %s8384_s15]]   ;;  %s8388_s15 = smov 27  }
  0x23   :  { %s8575_s8 = sld [smem:[%s9513_s0 + %s8385_s22]]   ;;  %s8389_s22 = smov 28  }
  0x24   :  { %s8580_s25 = sld [smem:[%s9513_s0 + %s8386_s28]]   ;;  %s8390_s28 = smov 29  }
  0x25   :  { %s8585_s5 = sld [smem:[%s9513_s0 + %s8387_s7]]   ;;  %s8391_s7 = smov 30  }
  0x26   :  { %s8590_s17 = sld [smem:[%s9513_s0 + %s8388_s15]]   ;;  %s8392_s15 = smov 31  }
  0x29   :  { %9553 = sst [smem:[#allocation49_spill]] %s8575_s8 }
  0x2a   :  { %9554 = sst [smem:[#allocation50_spill]] %s8580_s25 }
  0x2b   :  { %9555 = sst [smem:[#allocation51_spill]] %s8585_s5 }
  0x2c   :  { %9556 = sst [smem:[#allocation52_spill]] %s8590_s17 }
  0x2d   :  { %s8595_s8 = sld [smem:[%s9513_s0 + %s8389_s22]]   ;;  %s8393_s22 = smov 32  }
  0x2e   :  { %s8600_s25 = sld [smem:[%s9513_s0 + %s8390_s28]]   ;;  %s8394_s28 = smov 33  }
  0x2f   :  { %s8605_s5 = sld [smem:[%s9513_s0 + %s8391_s7]]   ;;  %s8395_s7 = smov 34  }
  0x30   :  { %s8610_s17 = sld [smem:[%s9513_s0 + %s8392_s15]]   ;;  %s8396_s15 = smov 35  }
  0x33   :  { %9557 = sst [smem:[#allocation53_spill]] %s8595_s8 }
  0x34   :  { %9558 = sst [smem:[#allocation54_spill]] %s8600_s25 }
  0x35   :  { %9559 = sst [smem:[#allocation55_spill]] %s8605_s5 }
  0x36   :  { %9560 = sst [smem:[#allocation56_spill]] %s8610_s17 }
  0x37   :  { %s8615_s8 = sld [smem:[%s9513_s0 + %s8393_s22]]   ;;  %s8397_s22 = smov 36  }
  0x38   :  { %s8620_s25 = sld [smem:[%s9513_s0 + %s8394_s28]]   ;;  %s8398_s28 = smov 37  }
  0x39   :  { %s8625_s5 = sld [smem:[%s9513_s0 + %s8395_s7]]   ;;  %s8399_s7 = smov 38  }
  0x3a   :  { %s8630_s17 = sld [smem:[%s9513_s0 + %s8396_s15]]   ;;  %s8400_s15 = smov 39  }
  0x3d   :  { %9561 = sst [smem:[#allocation57_spill]] %s8615_s8 }
  0x3e   :  { %9562 = sst [smem:[#allocation58_spill]] %s8620_s25 }
  0x3f   :  { %9563 = sst [smem:[#allocation59_spill]] %s8625_s5 }
  0x40   :  { %9564 = sst [smem:[#allocation60_spill]] %s8630_s17 }
  0x41   :  { %s8635_s8 = sld [smem:[%s9513_s0 + %s8397_s22]]   ;;  %s8401_s22 = smov 40  }
  0x42   :  { %s8640_s25 = sld [smem:[%s9513_s0 + %s8398_s28]]   ;;  %s8402_s28 = smov 41  }
  0x43   :  { %s8645_s5 = sld [smem:[%s9513_s0 + %s8399_s7]]   ;;  %s8403_s7 = smov 42  }
  0x44   :  { %s8650_s17 = sld [smem:[%s9513_s0 + %s8400_s15]]   ;;  %s8404_s15 = smov 43  }
  0x47   :  { %9565 = sst [smem:[#allocation61_spill]] %s8635_s8 }
  0x48   :  { %9566 = sst [smem:[#allocation62_spill]] %s8640_s25 }
  0x49   :  { %9567 = sst [smem:[#allocation63_spill]] %s8645_s5 }
  0x4a   :  { %9568 = sst [smem:[#allocation64_spill]] %s8650_s17 }
  0x4b   :  { %s8655_s8 = sld [smem:[%s9513_s0 + %s8401_s22]]   ;;  %s8405_s22 = smov 44  }
  0x4c   :  { %s8660_s25 = sld [smem:[%s9513_s0 + %s8402_s28]]   ;;  %s8406_s28 = smov 45  }
  0x4d   :  { %s8665_s5 = sld [smem:[%s9513_s0 + %s8403_s7]]   ;;  %s8407_s7 = smov 46  }
  0x4e   :  { %s8670_s17 = sld [smem:[%s9513_s0 + %s8404_s15]]   ;;  %s8408_s15 = smov 47  }
  0x51   :  { %9569 = sst [smem:[#allocation65_spill]] %s8655_s8 }
  0x52   :  { %9570 = sst [smem:[#allocation66_spill]] %s8660_s25 }
  0x53   :  { %9571 = sst [smem:[#allocation67_spill]] %s8665_s5 }
  0x54   :  { %9572 = sst [smem:[#allocation68_spill]] %s8670_s17 }
  0x55   :  { %s8675_s8 = sld [smem:[%s9513_s0 + %s8405_s22]]   ;;  %s8409_s22 = smov 48  }
  0x56   :  { %s8680_s25 = sld [smem:[%s9513_s0 + %s8406_s28]]   ;;  %s8410_s28 = smov 49  }
  0x57   :  { %s8685_s5 = sld [smem:[%s9513_s0 + %s8407_s7]]   ;;  %s8411_s7 = smov 50  }
  0x58   :  { %s8690_s17 = sld [smem:[%s9513_s0 + %s8408_s15]]   ;;  %s8412_s15 = smov 51  }
  0x5b   :  { %9573 = sst [smem:[#allocation69_spill]] %s8675_s8 }
  0x5c   :  { %9574 = sst [smem:[#allocation70_spill]] %s8680_s25 }
  0x5d   :  { %9575 = sst [smem:[#allocation71_spill]] %s8685_s5 }
  0x5e   :  { %9576 = sst [smem:[#allocation72_spill]] %s8690_s17 }
  0x5f   :  { %s8695_s8 = sld [smem:[%s9513_s0 + %s8409_s22]]   ;;  %s8413_s22 = smov 52  }
  0x60   :  { %s8700_s25 = sld [smem:[%s9513_s0 + %s8410_s28]]   ;;  %s8414_s28 = smov 53  }
  0x61   :  { %s8705_s5 = sld [smem:[%s9513_s0 + %s8411_s7]]   ;;  %s8415_s7 = smov 54  }
  0x62   :  { %s8710_s17 = sld [smem:[%s9513_s0 + %s8412_s15]]   ;;  %s8416_s15 = smov 55  }
  0x65   :  { %9577 = sst [smem:[#allocation73_spill]] %s8695_s8 }
  0x66   :  { %9578 = sst [smem:[#allocation74_spill]] %s8700_s25 }
  0x67   :  { %9579 = sst [smem:[#allocation75_spill]] %s8705_s5 }
  0x68   :  { %9580 = sst [smem:[#allocation76_spill]] %s8710_s17 }
  0x69   :  { %s8715_s8 = sld [smem:[%s9513_s0 + %s8413_s22]]   ;;  %s8417_s22 = smov 56  }
  0x6a   :  { %s8720_s25 = sld [smem:[%s9513_s0 + %s8414_s28]]   ;;  %s8418_s28 = smov 57  }
  0x6b   :  { %s8725_s5 = sld [smem:[%s9513_s0 + %s8415_s7]]   ;;  %s8419_s7 = smov 58  }
  0x6c   :  { %s8730_s17 = sld [smem:[%s9513_s0 + %s8416_s15]]   ;;  %s8420_s15 = smov 59  }
  0x6f   :  { %9581 = sst [smem:[#allocation77_spill]] %s8715_s8 }
  0x70   :  { %9582 = sst [smem:[#allocation78_spill]] %s8720_s25 }
  0x71   :  { %9583 = sst [smem:[#allocation79_spill]] %s8725_s5 }
  0x72   :  { %9584 = sst [smem:[#allocation80_spill]] %s8730_s17 }
  0x73   :  { %s8735_s8 = sld [smem:[%s9513_s0 + %s8417_s22]]   ;;  %s8421_s22 = smov 60  }
  0x74   :  { %s8740_s25 = sld [smem:[%s9513_s0 + %s8418_s28]]   ;;  %s8422_s28 = smov 61  }
  0x75   :  { %s8745_s5 = sld [smem:[%s9513_s0 + %s8419_s7]]   ;;  %s8423_s7 = smov 62  }
  0x76   :  { %s8750_s17 = sld [smem:[%s9513_s0 + %s8420_s15]]   ;;  %s8424_s15 = smov 63  }
  0x79   :  { %9585 = sst [smem:[#allocation81_spill]] %s8735_s8 }
  0x7a   :  { %9586 = sst [smem:[#allocation82_spill]] %s8740_s25 }
  0x7b   :  { %9587 = sst [smem:[#allocation83_spill]] %s8745_s5 }
  0x7c   :  { %9588 = sst [smem:[#allocation84_spill]] %s8750_s17 }
  0x7d   :  { %s8755_s8 = sld [smem:[%s9513_s0 + %s8421_s22]]   ;;  %s8425_s22 = smov 64  }
  0x7e   :  { %s8760_s25 = sld [smem:[%s9513_s0 + %s8422_s28]]   ;;  %s8426_s28 = smov 65  }
  0x7f   :  { %s8765_s5 = sld [smem:[%s9513_s0 + %s8423_s7]]  }
  0x80   :  { %s8770_s17 = sld [smem:[%s9513_s0 + %s8424_s15]]  }
  0x83   :  { %9589 = sst [smem:[#allocation85_spill]] %s8755_s8 }
  0x84   :  { %9590 = sst [smem:[#allocation86_spill]] %s8760_s25 }
  0x85   :  { %s8775_s8 = sld [smem:[%s9513_s0 + %s8425_s22]]  }
  0x86   :  { %s8780_s25 = sld [smem:[%s9513_s0 + %s8426_s28]]  }
  0x87   :  { %136 = vsyncpa [#allocation3], 0 }
  0x88   :  { %137 = vsyncpa [#allocation6], 0 }
  0x89   :  { %138 = vsyncpa [#allocation9], 0 }
  0x8a   :  { %139 = vsyncpa [#allocation12], 0 }
  0x8b   :  { %140 = vsyncpa [#allocation15], 0 }
  0x8c   :  { %141 = vsyncpa [#allocation18], 0 }
  0x8d   :  { %142 = vsyncpa [#allocation21], 0 }
  0x8e   :  { %143 = vsyncpa [#allocation24], 0 }
  0x8f   :  { %144 = vsyncpa [#allocation27], 0 }
  0x90   :  { %145 = vsyncpa [#allocation4], 0  ;;  %s8427_s7 = smov [#allocation5]   ;;  %s8428_s11 = smov [#allocation8]  }
  0x91   :  { %s164_s10 = sshll.u32 %s8427_s7, 4  ;;  %s190_s15 = sshll.u32 %s8428_s11, 4  ;;  %s165_s10 = int_to_ptr.vmem [resolvable:$true] %s164_s10  ;;  %s191_s15 = int_to_ptr.vmem [resolvable:$true] %s190_s15 }
  0x92   :  { %s7968_s0 = scalar_lea.hbm %s8465_s13, 16 }
  0x93   :  { %p7969_p0 = scmp.ne.s32.totalorder %s8465_s13, %s7968_s0  ;;  %p7972_p1 = scmp.lt.u32.totalorder %s7968_s0, %s8465_s13 }
  0x95   :  { %p7974_p2 = pnand %p7972_p1, %p7969_p0 }
  0x97   :  { %7977 = shalt.err (!%p7974_p2)
}
  0x98   :  { %s7978_s16 = scalar_lea.vmem %s165_s10, 16  ;;  %s7982_s18 = scalar_lea.vmem %s165_s10, 32 }
  0x99   :  { %p7979_p3 = scmp.ne.s32.totalorder %s165_s10, %s7978_s16  ;;  %p7983_p4 = scmp.lt.s32.totalorder %s165_s10, %s165_s10 }
  0x9a   :  { %p7984_p5 = scmp.lt.s32.totalorder %s7982_s18, %s7978_s16 }
  0x9c   :  { %p7985_p6 = por %p7984_p5, %p7983_p4 }
  0x9e   :  { %p7986_p7 = pnand %p7985_p6, %p7979_p3 }
  0xa0   :  { %7989 = shalt.err (!%p7986_p7)
}
  0xa1   :  { %167 = dma.hbm_to_vmem [thread:$0]  %s8465_s13, 16, %s165_s10, [#allocation6]  }
  0xa2   :  { %s7990_s22 = scalar_lea.hbm %s8490_s3, 16 }
  0xa3   :  { %p7991_p8 = scmp.ne.s32.totalorder %s8490_s3, %s7990_s22  ;;  %p7994_p9 = scmp.lt.u32.totalorder %s7990_s22, %s8490_s3 }
  0xa5   :  { %p7996_p10 = pnand %p7994_p9, %p7991_p8 }
  0xa7   :  { %7999 = shalt.err (!%p7996_p10)
}
  0xa8   :  { %s8000_s23 = scalar_lea.vmem %s191_s15, 16  ;;  %s8004_s26 = scalar_lea.vmem %s191_s15, 32 }
  0xa9   :  { %p8001_p11 = scmp.ne.s32.totalorder %s191_s15, %s8000_s23  ;;  %p8005_p12 = scmp.lt.s32.totalorder %s191_s15, %s191_s15 }
  0xaa   :  { %p8006_p13 = scmp.lt.s32.totalorder %s8004_s26, %s8000_s23 }
  0xac   :  { %p8007_p0 = por %p8006_p13, %p8005_p12 }
  0xae   :  { %p8008_p1 = pnand %p8007_p0, %p8001_p11 }
  0xb0   :  { %8011 = shalt.err (!%p8008_p1)
}
  0xb1   :  { %193 = dma.hbm_to_vmem [thread:$0]  %s8490_s3, 16, %s191_s15, [#allocation9]  }
  0xb2   :  { %s8429_s28 = smov [#allocation11]   ;;  %s8430_s1 = smov [#allocation14]  }
  0xb3   :  { %s212_s13 = sshll.u32 %s8429_s28, 4  ;;  %s234_s2 = sshll.u32 %s8430_s1, 4  ;;  %s213_s13 = int_to_ptr.vmem [resolvable:$true] %s212_s13  ;;  %s235_s2 = int_to_ptr.vmem [resolvable:$true] %s234_s2 }
  0xb4   :  { %s8012_s7 = scalar_lea.hbm %s8505_s19, 16 }
  0xb5   :  { %p8013_p2 = scmp.ne.s32.totalorder %s8505_s19, %s8012_s7  ;;  %p8016_p3 = scmp.lt.u32.totalorder %s8012_s7, %s8505_s19 }
  0xb7   :  { %p8018_p4 = pnand %p8016_p3, %p8013_p2 }
  0xb9   :  { %8021 = shalt.err (!%p8018_p4)
}
  0xba   :  { %s8022_s10 = scalar_lea.vmem %s213_s13, 16  ;;  %s8026_s11 = scalar_lea.vmem %s213_s13, 32 }
  0xbb   :  { %p8023_p5 = scmp.ne.s32.totalorder %s213_s13, %s8022_s10  ;;  %p8027_p6 = scmp.lt.s32.totalorder %s213_s13, %s213_s13 }
  0xbc   :  { %p8028_p7 = scmp.lt.s32.totalorder %s8026_s11, %s8022_s10 }
  0xbe   :  { %p8029_p8 = por %p8028_p7, %p8027_p6 }
  0xc0   :  { %p8030_p9 = pnand %p8029_p8, %p8023_p5 }
  0xc2   :  { %8033 = shalt.err (!%p8030_p9)
}
  0xc3   :  { %215 = dma.hbm_to_vmem [thread:$0]  %s8505_s19, 16, %s213_s13, [#allocation12]  }
  0xc4   :  { %s8034_s3 = scalar_lea.hbm %s8520_s6, 16 }
  0xc5   :  { %p8035_p10 = scmp.ne.s32.totalorder %s8520_s6, %s8034_s3  ;;  %p8038_p11 = scmp.lt.u32.totalorder %s8034_s3, %s8520_s6 }
  0xc7   :  { %p8040_p12 = pnand %p8038_p11, %p8035_p10 }
  0xc9   :  { %8043 = shalt.err (!%p8040_p12)
}
  0xca   :  { %s8044_s15 = scalar_lea.vmem %s235_s2, 16  ;;  %s8048_s0 = scalar_lea.vmem %s235_s2, 32 }
  0xcb   :  { %p8045_p13 = scmp.ne.s32.totalorder %s235_s2, %s8044_s15  ;;  %p8049_p0 = scmp.lt.s32.totalorder %s235_s2, %s235_s2 }
  0xcc   :  { %p8050_p1 = scmp.lt.s32.totalorder %s8048_s0, %s8044_s15 }
  0xce   :  { %p8051_p2 = por %p8050_p1, %p8049_p0 }
  0xd0   :  { %p8052_p3 = pnand %p8051_p2, %p8045_p13 }
  0xd2   :  { %8055 = shalt.err (!%p8052_p3)
}
  0xd3   :  { %237 = dma.hbm_to_vmem [thread:$0]  %s8520_s6, 16, %s235_s2, [#allocation15]  }
  0xd4   :  { %s8431_s16 = smov [#allocation17]   ;;  %s8432_s18 = smov [#allocation20]  }
  0xd5   :  { %s256_s19 = sshll.u32 %s8431_s16, 4  ;;  %s282_s22 = sshll.u32 %s8432_s18, 4  ;;  %s257_s19 = int_to_ptr.vmem [resolvable:$true] %s256_s19  ;;  %s283_s22 = int_to_ptr.vmem [resolvable:$true] %s282_s22 }
  0xd6   :  { %s8056_s23 = scalar_lea.hbm %s8535_s27, 16 }
  0xd7   :  { %p8057_p4 = scmp.ne.s32.totalorder %s8535_s27, %s8056_s23  ;;  %p8060_p5 = scmp.lt.u32.totalorder %s8056_s23, %s8535_s27 }
  0xd9   :  { %p8062_p6 = pnand %p8060_p5, %p8057_p4 }
  0xdb   :  { %8065 = shalt.err (!%p8062_p6)
}
  0xdc   :  { %s8066_s26 = scalar_lea.vmem %s257_s19, 16  ;;  %s8070_s28 = scalar_lea.vmem %s257_s19, 32 }
  0xdd   :  { %p8067_p7 = scmp.ne.s32.totalorder %s257_s19, %s8066_s26  ;;  %p8071_p8 = scmp.lt.s32.totalorder %s257_s19, %s257_s19 }
  0xde   :  { %p8072_p9 = scmp.lt.s32.totalorder %s8070_s28, %s8066_s26 }
  0xe0   :  { %p8073_p10 = por %p8072_p9, %p8071_p8 }
  0xe2   :  { %p8074_p11 = pnand %p8073_p10, %p8067_p7 }
  0xe4   :  { %8077 = shalt.err (!%p8074_p11)
}
  0xe5   :  { %259 = dma.hbm_to_vmem [thread:$0]  %s8535_s27, 16, %s257_s19, [#allocation18]  }
  0xe6   :  { %s8078_s6 = scalar_lea.hbm %s8560_s4, 16 }
  0xe7   :  { %p8079_p12 = scmp.ne.s32.totalorder %s8560_s4, %s8078_s6  ;;  %p8082_p13 = scmp.lt.u32.totalorder %s8078_s6, %s8560_s4 }
  0xe9   :  { %p8084_p0 = pnand %p8082_p13, %p8079_p12 }
  0xeb   :  { %8087 = shalt.err (!%p8084_p0)
}
  0xec   :  { %s8088_s13 = scalar_lea.vmem %s283_s22, 16  ;;  %s8092_s1 = scalar_lea.vmem %s283_s22, 32 }
  0xed   :  { %p8089_p1 = scmp.ne.s32.totalorder %s283_s22, %s8088_s13  ;;  %p8093_p2 = scmp.lt.s32.totalorder %s283_s22, %s283_s22 }
  0xee   :  { %p8094_p3 = scmp.lt.s32.totalorder %s8092_s1, %s8088_s13 }
  0xf0   :  { %p8095_p4 = por %p8094_p3, %p8093_p2 }
  0xf2   :  { %p8096_p5 = pnand %p8095_p4, %p8089_p1 }
  0xf4   :  { %8099 = shalt.err (!%p8096_p5)
}
  0xf5   :  { %285 = dma.hbm_to_vmem [thread:$0]  %s8560_s4, 16, %s283_s22, [#allocation21]  }
  0xf6   :  { %s8433_s2 = smov [#allocation23]   ;;  %s8434_s7 = smov [#allocation2]  }
  0xf7   :  { %s302_s27 = sshll.u32 %s8433_s2, 4  ;;  %s154_s10 = sshll.u32 %s8434_s7, 4  ;;  %s303_s27 = int_to_ptr.vmem [resolvable:$true] %s302_s27  ;;  %s155_s10 = int_to_ptr.vmem [resolvable:$true] %s154_s10 }
  0xf8   :  { %s8100_s11 = scalar_lea.hbm %s8570_s29, 16 }
  0xf9   :  { %p8101_p6 = scmp.ne.s32.totalorder %s8570_s29, %s8100_s11  ;;  %p8104_p7 = scmp.lt.u32.totalorder %s8100_s11, %s8570_s29 }
  0xfb   :  { %p8106_p8 = pnand %p8104_p7, %p8101_p6 }
  0xfd   :  { %8109 = shalt.err (!%p8106_p8)
}
  0xfe   :  { %s8110_s3 = scalar_lea.vmem %s303_s27, 16  ;;  %s8114_s15 = scalar_lea.vmem %s303_s27, 32 }
  0xff   :  { %p8111_p9 = scmp.ne.s32.totalorder %s303_s27, %s8110_s3  ;;  %p8115_p10 = scmp.lt.s32.totalorder %s303_s27, %s303_s27 }
 0x100   :  { %p8116_p11 = scmp.lt.s32.totalorder %s8114_s15, %s8110_s3 }
 0x102   :  { %p8117_p12 = por %p8116_p11, %p8115_p10 }
 0x104   :  { %p8118_p13 = pnand %p8117_p12, %p8111_p9 }
 0x106   :  { %8121 = shalt.err (!%p8118_p13)
}
 0x107   :  { %305 = dma.hbm_to_vmem [thread:$0]  %s8570_s29, 16, %s303_s27, [#allocation24]  }
 0x108   :  { %s8122_s4 = scalar_lea.hbm %s8460_s9, 16 }
 0x109   :  { %p8123_p0 = scmp.ne.s32.totalorder %s8460_s9, %s8122_s4  ;;  %p8126_p1 = scmp.lt.u32.totalorder %s8122_s4, %s8460_s9 }
 0x10b   :  { %p8128_p2 = pnand %p8126_p1, %p8123_p0 }
 0x10d   :  { %8131 = shalt.err (!%p8128_p2)
}
 0x10e   :  { %s8132_s0 = scalar_lea.vmem %s155_s10, 16  ;;  %s8136_s16 = scalar_lea.vmem %s155_s10, 32 }
 0x10f   :  { %p8133_p3 = scmp.ne.s32.totalorder %s155_s10, %s8132_s0  ;;  %p8137_p4 = scmp.lt.s32.totalorder %s155_s10, %s155_s10 }
 0x110   :  { %p8138_p5 = scmp.lt.s32.totalorder %s8136_s16, %s8132_s0 }
 0x112   :  { %p8139_p6 = por %p8138_p5, %p8137_p4 }
 0x114   :  { %p8140_p7 = pnand %p8139_p6, %p8133_p3 }
 0x116   :  { %8143 = shalt.err (!%p8140_p7)
}
 0x117   :  { %157 = dma.hbm_to_vmem [thread:$0]  %s8460_s9, 16, %s155_s10, [#allocation3]  }
 0x118   :  { %s8435_s19 = smov [#allocation7]   ;;  %s8436_s18 = smov [#allocation10]  }
 0x119   :  { %s176_s29 = sshll.u32 %s8435_s19, 4  ;;  %s202_s22 = sshll.u32 %s8436_s18, 4  ;;  %s177_s29 = int_to_ptr.vmem [resolvable:$true] %s176_s29  ;;  %s203_s22 = int_to_ptr.vmem [resolvable:$true] %s202_s22 }
 0x11a   :  { %s8144_s23 = scalar_lea.hbm %s8475_s21, 16 }
 0x11b   :  { %p8145_p8 = scmp.ne.s32.totalorder %s8475_s21, %s8144_s23  ;;  %p8148_p9 = scmp.lt.u32.totalorder %s8144_s23, %s8475_s21 }
 0x11d   :  { %p8150_p10 = pnand %p8148_p9, %p8145_p8 }
 0x11f   :  { %8153 = shalt.err (!%p8150_p10)
}
 0x120   :  { %s8154_s26 = scalar_lea.vmem %s177_s29, 16  ;;  %s8158_s28 = scalar_lea.vmem %s177_s29, 32 }
 0x121   :  { %p8155_p11 = scmp.ne.s32.totalorder %s177_s29, %s8154_s26  ;;  %p8159_p12 = scmp.lt.s32.totalorder %s177_s29, %s177_s29 }
 0x122   :  { %p8160_p13 = scmp.lt.s32.totalorder %s8158_s28, %s8154_s26 }
 0x124   :  { %p8161_p0 = por %p8160_p13, %p8159_p12 }
 0x126   :  { %p8162_p1 = pnand %p8161_p0, %p8155_p11 }
 0x128   :  { %8165 = shalt.err (!%p8162_p1)
}
 0x129   :  { %179 = dma.hbm_to_vmem [thread:$0]  %s8475_s21, 16, %s177_s29, [#allocation6]  }
 0x12a   :  { %s8166_s9 = scalar_lea.hbm %s8500_s14, 16 }
 0x12b   :  { %p8167_p2 = scmp.ne.s32.totalorder %s8500_s14, %s8166_s9  ;;  %p8170_p3 = scmp.lt.u32.totalorder %s8166_s9, %s8500_s14 }
 0x12d   :  { %p8172_p4 = pnand %p8170_p3, %p8167_p2 }
 0x12f   :  { %8175 = shalt.err (!%p8172_p4)
}
 0x130   :  { %s8176_s6 = scalar_lea.vmem %s203_s22, 16  ;;  %s8180_s13 = scalar_lea.vmem %s203_s22, 32 }
 0x131   :  { %p8177_p5 = scmp.ne.s32.totalorder %s203_s22, %s8176_s6  ;;  %p8181_p6 = scmp.lt.s32.totalorder %s203_s22, %s203_s22 }
 0x132   :  { %p8182_p7 = scmp.lt.s32.totalorder %s8180_s13, %s8176_s6 }
 0x134   :  { %p8183_p8 = por %p8182_p7, %p8181_p6 }
 0x136   :  { %p8184_p9 = pnand %p8183_p8, %p8177_p5 }
 0x138   :  { %8187 = shalt.err (!%p8184_p9)
}
 0x139   :  { %205 = dma.hbm_to_vmem [thread:$0]  %s8500_s14, 16, %s203_s22, [#allocation9]  }
 0x13a   :  { %s8437_s1 = smov [#allocation13]   ;;  %s8438_s2 = smov [#allocation16]  }
 0x13b   :  { %s222_s21 = sshll.u32 %s8437_s1, 4  ;;  %s244_s27 = sshll.u32 %s8438_s2, 4  ;;  %s223_s21 = int_to_ptr.vmem [resolvable:$true] %s222_s21  ;;  %s245_s27 = int_to_ptr.vmem [resolvable:$true] %s244_s27 }
 0x13c   :  { %s8188_s7 = scalar_lea.hbm %s8510_s24, 16 }
 0x13d   :  { %p8189_p10 = scmp.ne.s32.totalorder %s8510_s24, %s8188_s7  ;;  %p8192_p11 = scmp.lt.u32.totalorder %s8188_s7, %s8510_s24 }
 0x13f   :  { %p8194_p12 = pnand %p8192_p11, %p8189_p10 }
 0x141   :  { %8197 = shalt.err (!%p8194_p12)
}
 0x142   :  { %s8198_s10 = scalar_lea.vmem %s223_s21, 16  ;;  %s8202_s11 = scalar_lea.vmem %s223_s21, 32 }
 0x143   :  { %p8199_p13 = scmp.ne.s32.totalorder %s223_s21, %s8198_s10  ;;  %p8203_p0 = scmp.lt.s32.totalorder %s223_s21, %s223_s21 }
 0x144   :  { %p8204_p1 = scmp.lt.s32.totalorder %s8202_s11, %s8198_s10 }
 0x146   :  { %p8205_p2 = por %p8204_p1, %p8203_p0 }
 0x148   :  { %p8206_p3 = pnand %p8205_p2, %p8199_p13 }
 0x14a   :  { %8209 = shalt.err (!%p8206_p3)
}
 0x14b   :  { %225 = dma.hbm_to_vmem [thread:$0]  %s8510_s24, 16, %s223_s21, [#allocation12]  }
 0x14c   :  { %s8210_s14 = scalar_lea.hbm %s8525_s12, 16 }
 0x14d   :  { %p8211_p4 = scmp.ne.s32.totalorder %s8525_s12, %s8210_s14  ;;  %p8214_p5 = scmp.lt.u32.totalorder %s8210_s14, %s8525_s12 }
 0x14f   :  { %p8216_p6 = pnand %p8214_p5, %p8211_p4 }
 0x151   :  { %8219 = shalt.err (!%p8216_p6)
}
 0x152   :  { %s8220_s3 = scalar_lea.vmem %s245_s27, 16  ;;  %s8224_s15 = scalar_lea.vmem %s245_s27, 32 }
 0x153   :  { %p8221_p7 = scmp.ne.s32.totalorder %s245_s27, %s8220_s3  ;;  %p8225_p8 = scmp.lt.s32.totalorder %s245_s27, %s245_s27 }
 0x154   :  { %p8226_p9 = scmp.lt.s32.totalorder %s8224_s15, %s8220_s3 }
 0x156   :  { %p8227_p10 = por %p8226_p9, %p8225_p8 }
 0x158   :  { %p8228_p11 = pnand %p8227_p10, %p8221_p7 }
 0x15a   :  { %8231 = shalt.err (!%p8228_p11)
}
 0x15b   :  { %247 = dma.hbm_to_vmem [thread:$0]  %s8525_s12, 16, %s245_s27, [#allocation15]  }
 0x15c   :  { %s8439_s4 = smov [#allocation19]   ;;  %s8440_s0 = smov [#allocation22]  }
 0x15d   :  { %s270_s24 = sshll.u32 %s8439_s4, 4  ;;  %s292_s16 = sshll.u32 %s8440_s0, 4  ;;  %s271_s24 = int_to_ptr.vmem [resolvable:$true] %s270_s24  ;;  %s293_s16 = int_to_ptr.vmem [resolvable:$true] %s292_s16 }
 0x15e   :  { %s8232_s19 = scalar_lea.hbm %s8550_s20, 16 }
 0x15f   :  { %p8233_p12 = scmp.ne.s32.totalorder %s8550_s20, %s8232_s19  ;;  %p8236_p13 = scmp.lt.u32.totalorder %s8232_s19, %s8550_s20 }
 0x161   :  { %p8238_p0 = pnand %p8236_p13, %p8233_p12 }
 0x163   :  { %8241 = shalt.err (!%p8238_p0)
}
 0x164   :  { %s8242_s29 = scalar_lea.vmem %s271_s24, 16  ;;  %s8246_s18 = scalar_lea.vmem %s271_s24, 32 }
 0x165   :  { %p8243_p1 = scmp.ne.s32.totalorder %s271_s24, %s8242_s29  ;;  %p8247_p2 = scmp.lt.s32.totalorder %s271_s24, %s271_s24 }
 0x166   :  { %p8248_p3 = scmp.lt.s32.totalorder %s8246_s18, %s8242_s29 }
 0x168   :  { %p8249_p4 = por %p8248_p3, %p8247_p2 }
 0x16a   :  { %p8250_p5 = pnand %p8249_p4, %p8243_p1 }
 0x16c   :  { %8253 = shalt.err (!%p8250_p5)
}
 0x16d   :  { %273 = dma.hbm_to_vmem [thread:$0]  %s8550_s20, 16, %s271_s24, [#allocation18]  }
 0x16e   :  { %s8254_s12 = scalar_lea.hbm %s8565_s30, 16 }
 0x16f   :  { %p8255_p6 = scmp.ne.s32.totalorder %s8565_s30, %s8254_s12  ;;  %p8258_p7 = scmp.lt.u32.totalorder %s8254_s12, %s8565_s30 }
 0x171   :  { %p8260_p8 = pnand %p8258_p7, %p8255_p6 }
 0x173   :  { %8263 = shalt.err (!%p8260_p8)
}
 0x174   :  { %s8264_s22 = scalar_lea.vmem %s293_s16, 16  ;;  %s8268_s23 = scalar_lea.vmem %s293_s16, 32 }
 0x175   :  { %p8265_p9 = scmp.ne.s32.totalorder %s293_s16, %s8264_s22  ;;  %p8269_p10 = scmp.lt.s32.totalorder %s293_s16, %s293_s16 }
 0x176   :  { %p8270_p11 = scmp.lt.s32.totalorder %s8268_s23, %s8264_s22 }
 0x178   :  { %p8271_p12 = por %p8270_p11, %p8269_p10 }
 0x17a   :  { %p8272_p13 = pnand %p8271_p12, %p8265_p9 }
 0x17c   :  { %8275 = shalt.err (!%p8272_p13)
}
 0x17d   :  { %s9591_s26 = sld [smem:[#allocation50_spill]]  ;;  %s8441_s28 = smov [#allocation25]  }
 0x17e   :  { %295 = dma.hbm_to_vmem [thread:$0]  %s8565_s30, 16, %s293_s16, [#allocation21]  }
 0x17f   :  { %s314_s20 = sshll.u32 %s8441_s28, 4  ;;  %s8442_s9 = smov [#allocation26]   ;;  %s315_s20 = int_to_ptr.vmem [resolvable:$true] %s314_s20 }
 0x180   :  { %s324_s6 = sshll.u32 %s8442_s9, 4  ;;  %s325_s6 = int_to_ptr.vmem [resolvable:$true] %s324_s6 }
 0x183   :  { %s8276_s13 = scalar_lea.hbm %s9591_s26, 16 }
 0x184   :  { %p8277_p0 = scmp.ne.s32.totalorder %s9591_s26, %s8276_s13  ;;  %p8280_p1 = scmp.lt.u32.totalorder %s8276_s13, %s9591_s26 }
 0x186   :  { %p8282_p2 = pnand %p8280_p1, %p8277_p0 }
 0x188   :  { %8285 = shalt.err (!%p8282_p2)
}
 0x189   :  { %s8286_s1 = scalar_lea.vmem %s315_s20, 16  ;;  %s8290_s21 = scalar_lea.vmem %s315_s20, 32 }
 0x18a   :  { %p8287_p3 = scmp.ne.s32.totalorder %s315_s20, %s8286_s1  ;;  %p8291_p4 = scmp.lt.s32.totalorder %s315_s20, %s315_s20 }
 0x18b   :  { %p8292_p5 = scmp.lt.s32.totalorder %s8290_s21, %s8286_s1 }
 0x18d   :  { %p8293_p6 = por %p8292_p5, %p8291_p4 }
 0x18f   :  { %p8294_p7 = pnand %p8293_p6, %p8287_p3 }
 0x191   :  { %8297 = shalt.err (!%p8294_p7)
}
 0x192   :  { %s9592_s30 = sld [smem:[#allocation51_spill]] }
 0x193   :  { %317 = dma.hbm_to_vmem [thread:$0]  %s9591_s26, 16, %s315_s20, [#allocation24]  }
 0x198   :  { %s8298_s2 = scalar_lea.hbm %s9592_s30, 16 }
 0x199   :  { %p8299_p8 = scmp.ne.s32.totalorder %s9592_s30, %s8298_s2  ;;  %p8302_p9 = scmp.lt.u32.totalorder %s8298_s2, %s9592_s30 }
 0x19b   :  { %p8304_p10 = pnand %p8302_p9, %p8299_p8 }
 0x19d   :  { %8307 = shalt.err (!%p8304_p10)
}
 0x19e   :  { %s8308_s27 = scalar_lea.vmem %s325_s6, 16  ;;  %s8312_s7 = scalar_lea.vmem %s325_s6, 32 }
 0x19f   :  { %p8309_p11 = scmp.ne.s32.totalorder %s325_s6, %s8308_s27  ;;  %p8313_p12 = scmp.lt.s32.totalorder %s325_s6, %s325_s6 }
 0x1a0   :  { %p8314_p13 = scmp.lt.s32.totalorder %s8312_s7, %s8308_s27 }
 0x1a2   :  { %p8315_p0 = por %p8314_p13, %p8313_p12 }
 0x1a4   :  { %p8316_p1 = pnand %p8315_p0, %p8309_p11 }
 0x1a6   :  { %8319 = shalt.err (!%p8316_p1)
}
 0x1a7   :  { %327 = dma.hbm_to_vmem [thread:$0]  %s9592_s30, 16, %s325_s6, [#allocation27]  }
 0x1a8   :  { %8342 = dma.done.wait [#allocation3], 16  }
 0x1a9   :  { %8343 = vsyncadd [#allocation3], 4294967280 }
 0x1aa   :  { %8344 = dma.done.wait [#allocation6], 32  }
 0x1ab   :  { %8345 = vsyncadd [#allocation6], 4294967264 }
 0x1ac   :  { %8346 = dma.done.wait [#allocation9], 32  }
 0x1ad   :  { %8347 = vsyncadd [#allocation9], 4294967264 }
 0x1ae   :  { %8348 = dma.done.wait [#allocation12], 32  }
 0x1af   :  { %8349 = vsyncadd [#allocation12], 4294967264 }
 0x1b0   :  { %8350 = dma.done.wait [#allocation15], 32  }
 0x1b1   :  { %8351 = vsyncadd [#allocation15], 4294967264 }
 0x1b2   :  { %8352 = dma.done.wait [#allocation18], 32  }
 0x1b3   :  { %8353 = vsyncadd [#allocation18], 4294967264 }
 0x1b4   :  { %8354 = dma.done.wait [#allocation21], 32  }
 0x1b5   :  { %8355 = vsyncadd [#allocation21], 4294967264 }
 0x1b6   :  { %8356 = dma.done.wait [#allocation24], 32  }
 0x1b7   :  { %8357 = vsyncadd [#allocation24], 4294967264 }
 0x1b8   :  { %8358 = dma.done.wait [#allocation27], 16  }
 0x1b9   :  { %8359 = vsyncadd [#allocation27], 4294967280  ;;  %s9593_s10 = sld [smem:[#allocation40_spill]]  ;;  %s9594_s11 = sld [smem:[#allocation39_spill]]  ;;  %v6005_v5 = vld [vmem:[#allocation2] ss:$0 sm:$0xff] }
 0x1ba   :  { %v6006_v8 = vld [vmem:[#allocation5] ss:$0 sm:$0xff]  ;;  %v6205_v9 = vld [vmem:[#allocation22] ss:$0 sm:$0xff]  ;;  %vm524_vm0 = vcmask 523264   ;;  %s9595_s14 = sld [smem:[#allocation41_spill]] }
 0x1bb   :  { %v6206_v13 = vld [vmem:[#allocation23] ss:$0 sm:$0xff]  ;;  %s9596_s3 = sld [smem:[#allocation42_spill]]  ;;  %vm600_vm1 = vcmask 261120   ;;  %v6007_v39 = vld [vmem:[#allocation7] ss:$0 sm:$0xff] }
 0x1bc   :  { %s9597_s15 = sld [smem:[#allocation43_spill]]  ;;  %s9598_s4 = sld [smem:[#allocation45_spill]]  ;;  %vm8445_vm2 = vmmov 0   ;;  %vm4326_vm3 = vcmask 130048   ;;  %vm5915_vm4 = vcmask 74752  }
 0x1bd   :  { %s9599_s24 = sld [smem:[#allocation44_spill]]  ;;  %s9600_s0 = sld [smem:[#allocation46_spill]] }
 0x1be   :  { %s9601_s16 = sld [smem:[#allocation47_spill]]  ;;  %s9602_s19 = sld [smem:[#allocation48_spill]] }
 0x1bf   :  { %v7497_v0 = vld [vmem:[%s9593_s10] sm:$0xff]   ;;  %v7498_v1 = vld [vmem:[%s9593_s10 + $0x8] sm:$0xff]   ;;  %v7499_v2 = vld [vmem:[%s9593_s10 + $0x10] sm:$0xff]   ;;  %s9603_s29 = sld [smem:[#allocation52_spill]]  ;;  %s9604_s18 = sld [smem:[#allocation49_spill]] }
 0x1c0   :  { %6946 = vmatprep.subr.bf16.mxu0 %v7497_v0  ;;  %v453_v3 = vld [vmem:[%s9594_s11] sm:$0xff]  ;;  %v454_v4 = vld [vmem:[%s9594_s11 + $0x8] sm:$0xff]  ;;  %v7500_v10 = vld [vmem:[%s9593_s10 + $0x18] sm:$0xff]   ;;  %s9605_s12 = sld [smem:[#allocation55_spill]]  ;;  %s9606_s22 = sld [smem:[#allocation53_spill]] }
 0x1c1   :  { %6947 = vmatpush3.bf16.msra.mxu0 %v7497_v0  ;;  %v464_v6 = vmul.f32 %v6005_v5, %v453_v3  ;;  %v465_v7 = vmul.f32 %v6005_v5, %v454_v4  ;;  %v2261_v11 = vmul.f32 %v6205_v9, %v453_v3  ;;  %v2262_v12 = vmul.f32 %v6205_v9, %v454_v4  ;;  %v455_v14 = vld [vmem:[%s9594_s11 + $0x10] sm:$0xff]  ;;  %v456_v15 = vld [vmem:[%s9594_s11 + $0x18] sm:$0xff]  ;;  %v7501_v33 = vld [vmem:[%s9595_s14] sm:$0xff]   ;;  %s9607_s23 = sld [smem:[#allocation54_spill]]  ;;  %s9608_s26 = sld [smem:[#allocation58_spill]] }
 0x1c2   :  { %6948 = vmatprep.subr.bf16.mxu0 %v7498_v1  ;;  %v466_v18 = vmul.f32 %v6005_v5, %v455_v14  ;;  %v467_v19 = vmul.f32 %v6005_v5, %v456_v15  ;;  %6962 = vmatprep.mubr.msk.bf16.mxu1 %vm600_vm1, %v7501_v33  ;;  %v7507_v34 = vld [vmem:[%s9596_s3 + $0x40] sm:$0xff]   ;;  %v7508_v35 = vld [vmem:[%s9596_s3 + $0x48] sm:$0xff]   ;;  %v7509_v36 = vld [vmem:[%s9596_s3 + $0x50] sm:$0xff]   ;;  %s9609_s28 = sld [smem:[#allocation56_spill]]  ;;  %s9610_s20 = sld [smem:[#allocation57_spill]] }
 0x1c3   :  { %v475_v16 = vadd.f32 %v6006_v8, %v464_v6  ;;  %v476_v17 = vadd.f32 %v6006_v8, %v465_v7  ;;  %v2272_v20 = vadd.f32 %v6206_v13, %v2261_v11  ;;  %v2273_v21 = vadd.f32 %v6206_v13, %v2262_v12  ;;  %v7510_v37 = vld [vmem:[%s9596_s3 + $0x58] sm:$0xff]   ;;  %v7511_v38 = vld [vmem:[%s9596_s3 + $0x60] sm:$0xff]   ;;  %v7502_v54 = vld [vmem:[%s9595_s14 + $0x8] sm:$0xff]   ;;  %s9611_s9 = sld [smem:[#allocation60_spill]]  ;;  %s9612_s6 = sld [smem:[#allocation62_spill]] }
 0x1c4   :  { %v477_v24 = vadd.f32 %v6006_v8, %v466_v18  ;;  %v478_v25 = vadd.f32 %v6006_v8, %v467_v19  ;;  %v7503_v55 = vld [vmem:[%s9595_s14 + $0x10] sm:$0xff]   ;;  %v7504_v56 = vld [vmem:[%s9595_s14 + $0x18] sm:$0xff]   ;;  %v7505_v57 = vld [vmem:[%s9595_s14 + $0x20] sm:$0xff]   ;;  %s9613_s13 = sld [smem:[#allocation67_spill]]  ;;  %s9614_s1 = sld [smem:[#allocation68_spill]] }
 0x1c5   :  { %6949 = vmatpush3.bf16.msra.mxu0 %v7498_v1  ;;  %v479_v22 = vmax.f32 %v475_v16, 0.0  ;;  %v480_v23 = vmax.f32 %v476_v17, 0.0  ;;  %v2276_v26 = vmax.f32 %v2272_v20, 0.0  ;;  %v2277_v27 = vmax.f32 %v2273_v21, 0.0  ;;  %v7506_v58 = vld [vmem:[%s9595_s14 + $0x28] sm:$0xff]   ;;  %v7513_v60 = vld [vmem:[%s9596_s3 + $0x70] sm:$0xff]  }
 0x1c6   :  { %6950 = vmatprep.subr.bf16.mxu0 %v7499_v2  ;;  %v481_v29 = vmax.f32 %v477_v24, 0.0  ;;  %v482_v30 = vmax.f32 %v478_v25, 0.0  ;;  %v7512_v59 = vld [vmem:[%s9596_s3 + $0x68] sm:$0xff]   ;;  %v7514_v61 = vld [vmem:[%s9596_s3 + $0x78] sm:$0xff]   ;;  %v7515_v62 = vld [vmem:[%s9596_s3] sm:$0xff]   ;;  %s9615_s21 = sld [smem:[#allocation59_spill]] }
 0x1c7   :  { %v491_v28 = vpack.c.bf16 %v480_v23, %v479_v22  ;;  %v8854_v31 = vpack.c.bf16 %v2277_v27, %v2276_v26  ;;  %v7531_v63 = vld [vmem:[%s9597_s15] sm:$0xff]   ;;  %v7532_v0 = vld [vmem:[%s9597_s15 + $0x8] sm:$0xff]   ;;  %v7533_v1 = vld [vmem:[%s9597_s15 + $0x10] sm:$0xff]   ;;  %s9616_s30 = sld [smem:[#allocation63_spill]]  ;;  %s9618_s27 = sld [smem:[#allocation66_spill]] }
 0x1c8   :  { %v492_v32 = vpack.c.bf16 %v482_v30, %v481_v29  ;;  %v7535_v3 = vld [vmem:[%s9597_s15 + $0x20] sm:$0xff]   ;;  %v7536_v4 = vld [vmem:[%s9597_s15 + $0x28] sm:$0xff]   ;;  %v7517_v19 = vld [vmem:[%s9596_s3 + $0x10] sm:$0xff]   ;;  %s9617_s2 = sld [smem:[#allocation71_spill]]  ;;  %s9619_s7 = sld [smem:[#allocation61_spill]] }
 0x1c9   :  { %6951 = vmatpush3.bf16.msra.mxu0 %v7499_v2  ;;  %6954 = vmatprep.mubr.msk.bf16.mxu0 %vm524_vm0, %v491_v28  ;;  %v7534_v2 = vld [vmem:[%s9597_s15 + $0x18] sm:$0xff]   ;;  %v7516_v17 = vld [vmem:[%s9596_s3 + $0x8] sm:$0xff]   ;;  %v7519_v26 = vld [vmem:[%s9596_s3 + $0x20] sm:$0xff]   ;;  %s9620_s10 = sld [smem:[#allocation72_spill]]  ;;  %s9622_s14 = sld [smem:[#allocation69_spill]] }
 0x1ca   :  { %6952 = vmatprep.subr.bf16.mxu0 %v7500_v10  ;;  %v7518_v25 = vld [vmem:[%s9596_s3 + $0x18] sm:$0xff]   ;;  %v7520_v27 = vld [vmem:[%s9596_s3 + $0x28] sm:$0xff]   ;;  %v7521_v28 = vld [vmem:[%s9596_s3 + $0x30] sm:$0xff]  }
 0x1cb   :  { %v7522_v29 = vld [vmem:[%s9596_s3 + $0x38] sm:$0xff]   ;;  %v7523_v30 = vld [vmem:[%s9596_s3 + $0x80] sm:$0xff]   ;;  %v7525_v33 = vld [vmem:[%s9596_s3 + $0x90] sm:$0xff]  }
 0x1cd   :  { %6953 = vmatpush3.bf16.msra.mxu0 %v7500_v10 }
 0x1ce   :  { %6974 = vmatprep.subr.bf16.mxu0 %v7507_v34 }
 0x1d0   :  { %6955 = vmatmul.mubr.msk.bf16.vlgmr.msra.gmra.mrb[0].mxu0 %vm524_vm0, %v492_v32  ;;  %v7524_v32 = vld [vmem:[%s9596_s3 + $0x88] sm:$0xff]  }
 0x1d1   :  { %6975 = vmatpush3.bf16.msra.mxu0 %v7507_v34  ;;  %v7526_v34 = vld [vmem:[%s9596_s3 + $0x98] sm:$0xff]  }
 0x1d2   :  { %6976 = vmatprep.subr.bf16.mxu0 %v7508_v35 }
 0x1d5   :  { %6977 = vmatpush3.bf16.msra.mxu0 %v7508_v35  ;;  %v7527_v35 = vld [vmem:[%s9596_s3 + $0xa0] sm:$0xff]  }
 0x1d6   :  { %6978 = vmatprep.subr.bf16.mxu0 %v7509_v36 }
 0x1d9   :  { %6979 = vmatpush3.bf16.msra.mxu0 %v7509_v36  ;;  %v7528_v36 = vld [vmem:[%s9596_s3 + $0xa8] sm:$0xff]  }
 0x1da   :  { %6980 = vmatprep.subr.bf16.mxu0 %v7510_v37 }
 0x1dd   :  { %6981 = vmatpush3.bf16.msra.mxu0 %v7510_v37  ;;  %v7529_v37 = vld [vmem:[%s9596_s3 + $0xb0] sm:$0xff]  }
 0x1de   :  { %6982 = vmatprep.subr.bf16.mxu0 %v7511_v38 }
 0x1e1   :  { %6983 = vmatpush3.bf16.msra.mxu0 %v7511_v38  ;;  %v7530_v38 = vld [vmem:[%s9596_s3 + $0xb8] sm:$0xff]   ;;  %s9623_s3 = sld [smem:[#allocation70_spill]] }
 0x1e2   :  { %6984 = vmatprep.subr.bf16.mxu0 %v7512_v59 }
 0x1e5   :  { %6985 = vmatpush3.bf16.msra.mxu0 %v7512_v59  ;;  %v7542_v59 = vld [vmem:[%s9598_s4 + $0x18] sm:$0xff]  }
 0x1e6   :  { %6986 = vmatprep.subr.bf16.mxu0 %v7513_v60 }
 0x1e9   :  { %6987 = vmatpush3.bf16.msra.mxu0 %v7513_v60  ;;  %v7543_v60 = vld [vmem:[%s9598_s4 + $0x20] sm:$0xff]  }
 0x1ea   :  { %6988 = vmatprep.subr.bf16.mxu0 %v7514_v61 }
 0x1ed   :  { %6989 = vmatpush3.bf16.msra.mxu0 %v7514_v61  ;;  %v7544_v61 = vld [vmem:[%s9598_s4 + $0x28] sm:$0xff]  }
 0x1ee   :  { %6994 = vmatprep.subr.bf16.mxu0 %v7515_v62 }
 0x2a3   :  { %v6956_v40 = vpop.f32.mrb[0].mxu0 }
 0x2a4   :  { %v574_v41 = vadd.f32 %v6956_v40, %v6007_v39  ;;  %v565_v42 = vpop.f32.mrb[1].mxu0  ;;  %v7538_v40 = vld [vmem:[%s9597_s15 + $0x38] sm:$0xff]  }
 0x2a5   :  { %v566_v43 = vadd.f32 %v6007_v39, %v565_v42  ;;  %v6957_v44 = vpop.f32.mrb[2].mxu0  ;;  %v6090_v42 = vld [vmem:[#allocation8] ss:$0 sm:$0xff] }
 0x2a6   :  { %v577_v45 = vadd.f32 %v6957_v44, %v6007_v39  ;;  %v568_v46 = vpop.f32.mrb[3].mxu0  ;;  %v582_v48 = vmax.f32 %v574_v41, 0.0  ;;  %v7539_v41 = vld [vmem:[%s9598_s4] sm:$0xff]  }
 0x2a7   :  { %v569_v47 = vadd.f32 %v6007_v39, %v568_v46  ;;  %v580_v50 = vmax.f32 %v566_v43, 0.0  ;;  %v7537_v39 = vld [vmem:[%s9597_s15 + $0x30] sm:$0xff]   ;;  %s9624_s15 = sld [smem:[#allocation74_spill]] }
 0x2a8   :  { %v583_v49 = vmax.f32 %v577_v45, 0.0 }
 0x2a9   :  { %v581_v51 = vmax.f32 %v569_v47, 0.0 }
 0x2aa   :  { %v585_v52 = vpack.c.bf16 %v583_v49, %v582_v48 }
 0x2ab   :  { %v584_v53 = vpack.c.bf16 %v581_v51, %v580_v50 }
 0x2ad   :  { %6958 = vmatprep.subr.bf16.mxu1 %v584_v53 }
 0x2ae   :  { %6959 = vmatpush3.bf16.msra.mxu1 %v584_v53 }
 0x2af   :  { %6960 = vmatprep.subr.bf16.mxu1 %v585_v52 }
 0x2b2   :  { %6961 = vmatpush3.bf16.msra.mxu1 %v585_v52 }
 0x2b3   :  { %6966 = vmatprep.subr.bf16.mxu1 %v584_v53 }
 0x2b5   :  { %6963 = vmatmul.mubr.msk.bf16.vlgmr.msra.gmra.mrb[0].mxu1 %vm600_vm1, %v7502_v54 }
 0x2b6   :  { %6967 = vmatpush3.bf16.msra.mxu1 %v584_v53  ;;  %6970 = vmatprep.mubr.msk.bf16.mxu1 %vm600_vm1, %v7503_v55 }
 0x2b7   :  { %6968 = vmatprep.subr.bf16.mxu1 %v585_v52 }
 0x2ba   :  { %6969 = vmatpush3.bf16.msra.mxu1 %v585_v52 }
 0x2bb   :  { %7014 = vmatprep.subr.bf16.mxu1 %v584_v53 }
 0x2bd   :  { %6971 = vmatmul.mubr.msk.bf16.vlgmr.msra.gmra.mrb[4].mxu1 %vm600_vm1, %v7504_v56 }
 0x2be   :  { %7015 = vmatpush3.bf16.msra.mxu1 %v584_v53  ;;  %7018 = vmatprep.mubr.msk.bf16.mxu1 %vm600_vm1, %v7505_v57  ;;  %v7540_v57 = vld [vmem:[%s9598_s4 + $0x8] sm:$0xff]  }
 0x2bf   :  { %7016 = vmatprep.subr.bf16.mxu1 %v585_v52 }
 0x2c2   :  { %7017 = vmatpush3.bf16.msra.mxu1 %v585_v52 }
 0x2c3   :  { %7042 = vmatprep.subr.bf16.mxu1 %v7531_v63 }
 0x2c5   :  { %7019 = vmatmul.mubr.msk.bf16.vlgmr.msra.gmra.mrb[8].mxu1 %vm600_vm1, %v7506_v58  ;;  %v7541_v58 = vld [vmem:[%s9598_s4 + $0x10] sm:$0xff]  }
 0x2c6   :  { %7043 = vmatpush3.bf16.msra.mxu1 %v7531_v63  ;;  %v7546_v63 = vld [vmem:[%s9598_s4 + $0x38] sm:$0xff]  }
 0x2c7   :  { %7044 = vmatprep.subr.bf16.mxu1 %v7532_v0 }
 0x2ca   :  { %7045 = vmatpush3.bf16.msra.mxu1 %v7532_v0  ;;  %v8911_v0 = vld [vmem:[%s9599_s24] sm:$0xff]  }
 0x2cb   :  { %7046 = vmatprep.subr.bf16.mxu1 %v7533_v1 }
 0x2ce   :  { %7047 = vmatpush3.bf16.msra.mxu1 %v7533_v1  ;;  %v6100_v1 = vld [vmem:[#allocation11] ss:$0 sm:$0xff] }
 0x2cf   :  { %7048 = vmatprep.subr.bf16.mxu1 %v7534_v2 }
 0x2d2   :  { %7049 = vmatpush3.bf16.msra.mxu1 %v7534_v2  ;;  %v7962_v2 = vld [vmem:[%s9594_s11] sm:$0xff] }
 0x2d3   :  { %7050 = vmatprep.subr.bf16.mxu1 %v7535_v3 }
 0x2d6   :  { %7051 = vmatpush3.bf16.msra.mxu1 %v7535_v3  ;;  %v1291_v3 = vmul.f32 %v7962_v2, %v6100_v1  ;;  %v7550_v2 = vld [vmem:[%s9599_s24 + $0x18] sm:$0xff]  }
 0x2d7   :  { %7052 = vmatprep.subr.bf16.mxu1 %v7536_v4 }
 0x2da   :  { %7053 = vmatpush3.bf16.msra.mxu1 %v7536_v4  ;;  %v7963_v4 = vld [vmem:[%s9594_s11 + $0x8] sm:$0xff] }
 0x2db   :  { %7054 = vmatprep.subr.bf16.mxu1 %v7537_v39 }
 0x2de   :  { %7055 = vmatpush3.bf16.msra.mxu1 %v7537_v39 }
 0x2df   :  { %7056 = vmatprep.subr.bf16.mxu1 %v7538_v40 }
 0x2e2   :  { %7057 = vmatpush3.bf16.msra.mxu1 %v7538_v40 }
 0x2e3   :  { %7062 = vmatprep.subr.bf16.mxu1 %v7539_v41 }
 0x388   :  { %v6964_v5 = vpop.f32.mrb[0].mxu1 }
 0x389   :  { %v641_v6 = vpop.f32.mrb[1].mxu1 }
 0x38a   :  { %v6965_v7 = vpop.f32.mrb[2].mxu1 }
 0x38b   :  { %v673_v8 = vpack.c.bf16 %v6965_v7, %v6964_v5  ;;  %v644_v9 = vpop.f32.mrb[3].mxu1  ;;  %v1292_v5 = vmul.f32 %v7963_v4, %v6100_v1 }
 0x38c   :  { %v672_v10 = vpack.c.bf16 %v644_v9, %v641_v6  ;;  %v6101_v6 = vld [vmem:[#allocation13] ss:$0 sm:$0xff] }
 0x38d   :  { %v1302_v7 = vadd.f32 %v6101_v6, %v1291_v3 }
 0x38f   :  { %v1306_v9 = vmax.f32 %v1302_v7, 0.0  ;;  %v6118_v7 = vld [vmem:[#allocation17] ss:$0 sm:$0xff] }
 0x390   :  { %v6972_v11 = vpop.f32.mrb[4].mxu1 }
 0x391   :  { %v729_v12 = vpop.f32.mrb[5].mxu1 }
 0x392   :  { %v6973_v13 = vpop.f32.mrb[6].mxu1 }
 0x393   :  { %v762_v14 = vpack.c.bf16 %v6973_v13, %v6972_v11  ;;  %v732_v15 = vpop.f32.mrb[7].mxu1 }
 0x394   :  { %v761_v16 = vpack.c.bf16 %v732_v15, %v729_v12  ;;  %v6091_v12 = vld [vmem:[#allocation10] ss:$0 sm:$0xff]  ;;  %v6207_v15 = vld [vmem:[#allocation25] ss:$0 sm:$0xff] }
 0x396   :  { %6990 = vmatprep.mubr.bf16.mxu0 %v761_v16 }
 0x397   :  { %6991 = vmatmul.mubr.bf16.vlgmr.msra.gmra.mrb[4].mxu0 %v762_v14  ;;  %v6102_v14 = vld [vmem:[#allocation14] ss:$0 sm:$0xff] }
 0x398   :  { %6995 = vmatpush3.bf16.msra.mxu0 %v7515_v62  ;;  %7010 = vmatprep.mubr.bf16.mxu0 %v672_v10  ;;  %v7020_v18 = vpop.f32.mrb[8].mxu1  ;;  %v7545_v62 = vld [vmem:[%s9598_s4 + $0x30] sm:$0xff]   ;;  %s9625_s4 = sld [smem:[#allocation64_spill]] }
 0x399   :  { %6996 = vmatprep.subr.bf16.mxu0 %v7516_v17  ;;  %v1012_v20 = vpop.f32.mrb[9].mxu1 }
 0x39a   :  { %v7021_v21 = vpop.f32.mrb[10].mxu1 }
 0x39b   :  { %v1045_v22 = vpack.c.bf16 %v7021_v21, %v7020_v18  ;;  %v1015_v23 = vpop.f32.mrb[11].mxu1  ;;  %v6103_v18 = vld [vmem:[#allocation16] ss:$0 sm:$0xff] }
 0x39c   :  { %6997 = vmatpush3.bf16.msra.mxu0 %v7516_v17  ;;  %v1044_v24 = vpack.c.bf16 %v1015_v23, %v1012_v20  ;;  %v6208_v23 = vld [vmem:[#allocation26] ss:$0 sm:$0xff] }
 0x39d   :  { %6998 = vmatprep.subr.bf16.mxu0 %v7517_v19 }
 0x3a0   :  { %6999 = vmatpush3.bf16.msra.mxu0 %v7517_v19 }
 0x3a1   :  { %7000 = vmatprep.subr.bf16.mxu0 %v7518_v25 }
 0x3a4   :  { %7001 = vmatpush3.bf16.msra.mxu0 %v7518_v25 }
 0x3a5   :  { %7002 = vmatprep.subr.bf16.mxu0 %v7519_v26 }
 0x3a8   :  { %7003 = vmatpush3.bf16.msra.mxu0 %v7519_v26 }
 0x3a9   :  { %7004 = vmatprep.subr.bf16.mxu0 %v7520_v27 }
 0x3ac   :  { %7005 = vmatpush3.bf16.msra.mxu0 %v7520_v27 }
 0x3ad   :  { %7006 = vmatprep.subr.bf16.mxu0 %v7521_v28 }
 0x3b0   :  { %7007 = vmatpush3.bf16.msra.mxu0 %v7521_v28 }
 0x3b1   :  { %7008 = vmatprep.subr.bf16.mxu0 %v7522_v29 }
 0x3b4   :  { %7009 = vmatpush3.bf16.msra.mxu0 %v7522_v29 }
 0x3b5   :  { %7022 = vmatprep.subr.bf16.mxu0 %v7523_v30 }
 0x3b7   :  { %7011 = vmatmul.mubr.bf16.vlgmr.msra.gmra.mrb[4].mxu0 %v673_v8  ;;  %v1303_v8 = vadd.f32 %v6101_v6, %v1292_v5 }
 0x3b8   :  { %7023 = vmatpush3.bf16.msra.mxu0 %v7523_v30  ;;  %7038 = vmatprep.mubr.bf16.mxu0 %v1044_v24 }
 0x3b9   :  { %7024 = vmatprep.subr.bf16.mxu0 %v7524_v32  ;;  %v1307_v10 = vmax.f32 %v1303_v8, 0.0 }
 0x3bb   :  { %v1318_v11 = vpack.c.bf16 %v1307_v10, %v1306_v9 }
 0x3bc   :  { %7025 = vmatpush3.bf16.msra.mxu0 %v7524_v32 }
 0x3bd   :  { %7026 = vmatprep.subr.bf16.mxu0 %v7525_v33 }
 0x3c0   :  { %7027 = vmatpush3.bf16.msra.mxu0 %v7525_v33 }
 0x3c1   :  { %7028 = vmatprep.subr.bf16.mxu0 %v7526_v34 }
 0x3c4   :  { %7029 = vmatpush3.bf16.msra.mxu0 %v7526_v34 }
 0x3c5   :  { %7030 = vmatprep.subr.bf16.mxu0 %v7527_v35 }
 0x3c8   :  { %7031 = vmatpush3.bf16.msra.mxu0 %v7527_v35 }
 0x3c9   :  { %7032 = vmatprep.subr.bf16.mxu0 %v7528_v36 }
 0x3cc   :  { %7033 = vmatpush3.bf16.msra.mxu0 %v7528_v36 }
 0x3cd   :  { %7034 = vmatprep.subr.bf16.mxu0 %v7529_v37 }
 0x3d0   :  { %7035 = vmatpush3.bf16.msra.mxu0 %v7529_v37 }
 0x3d1   :  { %7036 = vmatprep.subr.bf16.mxu0 %v7530_v38 }
 0x3d4   :  { %7037 = vmatpush3.bf16.msra.mxu0 %v7530_v38 }
 0x3d7   :  { %7039 = vmatmul.mubr.bf16.vlgmr.msra.gmra.mrb[4].mxu0 %v1045_v22 }
 0x4aa   :  { %v7040_v43 = vpop.f32.mrb[4].mxu0 }
 0x4ab   :  { %v1156_v44 = vadd.f32 %v7040_v43, %v6090_v42  ;;  %v1128_v45 = vpop.f32.mrb[5].mxu0 }
 0x4ac   :  { %v1154_v46 = vadd.f32 %v6090_v42, %v1128_v45  ;;  %v7041_v47 = vpop.f32.mrb[6].mxu0 }
 0x4ad   :  { %v1157_v48 = vadd.f32 %v7041_v47, %v6090_v42  ;;  %v1131_v49 = vpop.f32.mrb[7].mxu0  ;;  %v1160_v51 = vmax.f32 %v1156_v44, 0.0 }
 0x4ae   :  { %v1155_v50 = vadd.f32 %v6090_v42, %v1131_v49  ;;  %v1158_v53 = vmax.f32 %v1154_v46, 0.0 }
 0x4af   :  { %v1161_v52 = vmax.f32 %v1157_v48, 0.0 }
 0x4b0   :  { %v1159_v54 = vmax.f32 %v1155_v50, 0.0 }
 0x4b1   :  { %v1179_v55 = vpack.c.bf16 %v1161_v52, %v1160_v51 }
 0x4b2   :  { %v1178_v56 = vpack.c.bf16 %v1159_v54, %v1158_v53 }
 0x4b4   :  { %7058 = vmatprep.mubr.bf16.mxu1 %v1178_v56  ;;  %v7548_v56 = vld [vmem:[%s9599_s24 + $0x8] sm:$0xff]  }
 0x4b5   :  { %7059 = vmatmul.mubr.bf16.vlgmr.msra.gmra.mrb[12].mxu1 %v1179_v55 }
 0x4b6   :  { %7063 = vmatpush3.bf16.msra.mxu1 %v7539_v41 }
 0x4b7   :  { %7064 = vmatprep.subr.bf16.mxu1 %v7540_v57 }
 0x4ba   :  { %7065 = vmatpush3.bf16.msra.mxu1 %v7540_v57  ;;  %v8942_v57 = vld [vmem:[%s9594_s11 + $0x10] sm:$0xff] }
 0x4bb   :  { %7066 = vmatprep.subr.bf16.mxu1 %v7541_v58 }
 0x4be   :  { %7067 = vmatpush3.bf16.msra.mxu1 %v7541_v58  ;;  %v1293_v58 = vmul.f32 %v8942_v57, %v6100_v1 }
 0x4bf   :  { %7068 = vmatprep.subr.bf16.mxu1 %v7542_v59 }
 0x4c2   :  { %7069 = vmatpush3.bf16.msra.mxu1 %v7542_v59  ;;  %v8946_v59 = vld [vmem:[%s9594_s11 + $0x18] sm:$0xff]  ;;  %s9621_s11 = sld [smem:[#allocation73_spill]] }
 0x4c3   :  { %7070 = vmatprep.subr.bf16.mxu1 %v7543_v60 }
 0x4c6   :  { %7071 = vmatpush3.bf16.msra.mxu1 %v7543_v60  ;;  %v1294_v60 = vmul.f32 %v8946_v59, %v6100_v1  ;;  %v7553_v1 = vld [vmem:[%s9600_s0] sm:$0xff]  }
 0x4c7   :  { %7072 = vmatprep.subr.bf16.mxu1 %v7544_v61 }
 0x4ca   :  { %7073 = vmatpush3.bf16.msra.mxu1 %v7544_v61  ;;  %v7549_v61 = vld [vmem:[%s9599_s24 + $0x10] sm:$0xff]   ;;  %s9626_s24 = sld [smem:[#allocation65_spill]] }
 0x4cb   :  { %7074 = vmatprep.subr.bf16.mxu1 %v7545_v62 }
 0x4ce   :  { %7075 = vmatpush3.bf16.msra.mxu1 %v7545_v62  ;;  %v1304_v62 = vadd.f32 %v6101_v6, %v1293_v58 }
 0x4cf   :  { %7076 = vmatprep.subr.bf16.mxu1 %v7546_v63 }
 0x4d0   :  { %v1308_v3 = vmax.f32 %v1304_v62, 0.0 }
 0x4d2   :  { %7077 = vmatpush3.bf16.msra.mxu1 %v7546_v63  ;;  %v1305_v63 = vadd.f32 %v6101_v6, %v1294_v60 }
 0x4d3   :  { %7082 = vmatprep.subr.bf16.mxu1 %v8911_v0 }
 0x4d4   :  { %v1309_v4 = vmax.f32 %v1305_v63, 0.0  ;;  %v7566_v63 = vld [vmem:[%s9601_s16 + $0x8] sm:$0xff]  }
 0x4d6   :  { %v1319_v5 = vpack.c.bf16 %v1309_v4, %v1308_v3  ;;  %v7567_v3 = vld [vmem:[%s9601_s16 + $0x10] sm:$0xff]  }
 0x588   :  { %v7060_v13 = vpop.f32.mrb[12].mxu1 }
 0x589   :  { %v8916_v16 = vadd.f32 %v7060_v13, %v6091_v12  ;;  %v1269_v17 = vpop.f32.mrb[13].mxu1 }
 0x58a   :  { %v8918_v19 = vadd.f32 %v6091_v12, %v1269_v17  ;;  %v7061_v20 = vpop.f32.mrb[14].mxu1 }
 0x58b   :  { %v1329_v21 = vmul.f32 %v6102_v14, %v8916_v16  ;;  %v2299_v22 = vmul.f32 %v6207_v15, %v8916_v16  ;;  %v8922_v24 = vadd.f32 %v7061_v20, %v6091_v12  ;;  %v1272_v25 = vpop.f32.mrb[15].mxu1 }
 0x58c   :  { %v1327_v26 = vmul.f32 %v6102_v14, %v8918_v19  ;;  %v2297_v27 = vmul.f32 %v6207_v15, %v8918_v19  ;;  %v8926_v28 = vadd.f32 %v6091_v12, %v1272_v25  ;;  %v7552_v25 = vld [vmem:[%s9600_s0 + $0x18] sm:$0xff]  }
 0x58d   :  { %v1340_v29 = vadd.f32 %v6103_v18, %v1329_v21  ;;  %v1330_v30 = vmul.f32 %v6102_v14, %v8922_v24  ;;  %v2300_v32 = vmul.f32 %v6207_v15, %v8922_v24  ;;  %v3588_v33 = vpack.c.bf16 %v8922_v24, %v8916_v16  ;;  %v7707_v16 = vld [vmem:[%s9614_s1 + $0x8] sm:$0xff]   ;;  %v7709_v24 = vld [vmem:[%s9614_s1 + $0x10] sm:$0xff]  }
 0x58e   :  { %v2308_v34 = vadd.f32 %v6208_v23, %v2297_v27  ;;  %v1328_v35 = vmul.f32 %v6102_v14, %v8926_v28  ;;  %v2298_v36 = vmul.f32 %v6207_v15, %v8926_v28  ;;  %v3587_v37 = vpack.c.bf16 %v8926_v28, %v8918_v19  ;;  %v7555_v27 = vld [vmem:[%s9600_s0 + $0x20] sm:$0xff]  }
 0x58f   :  { %v1341_v38 = vadd.f32 %v6103_v18, %v1330_v30  ;;  %v1338_v39 = vadd.f32 %v6103_v18, %v1327_v26  ;;  %v2310_v40 = vadd.f32 %v6208_v23, %v2299_v22  ;;  %v2311_v43 = vadd.f32 %v6208_v23, %v2300_v32  ;;  %v7554_v26 = vld [vmem:[%s9600_s0 + $0x8] sm:$0xff]   ;;  %v7559_v30 = vld [vmem:[%s9601_s16 + $0x50] sm:$0xff]   ;;  %v7701_v19 = vld [vmem:[%s9613_s13] sm:$0xff]  }
 0x590   :  { %v2309_v41 = vadd.f32 %v6208_v23, %v2298_v36  ;;  %v1339_v42 = vadd.f32 %v6103_v18, %v1328_v35  ;;  %v1344_v44 = vmax.f32 %v1340_v29, 0.0  ;;  %v2312_v45 = vmax.f32 %v2308_v34, 0.0  ;;  %v7557_v23 = vld [vmem:[%s9601_s16 + $0x40] sm:$0xff]   ;;  %v7558_v29 = vld [vmem:[%s9601_s16 + $0x48] sm:$0xff]   ;;  %v7560_v34 = vld [vmem:[%s9601_s16 + $0x58] sm:$0xff]  }
 0x591   :  { %v1345_v46 = vmax.f32 %v1341_v38, 0.0  ;;  %v1342_v47 = vmax.f32 %v1338_v39, 0.0  ;;  %v2314_v50 = vmax.f32 %v2310_v40, 0.0  ;;  %v2315_v51 = vmax.f32 %v2311_v43, 0.0  ;;  %v7556_v32 = vld [vmem:[%s9600_s0 + $0x28] sm:$0xff]   ;;  %v7561_v35 = vld [vmem:[%s9601_s16 + $0x60] sm:$0xff]  }
 0x592   :  { %v2313_v48 = vmax.f32 %v2309_v41, 0.0  ;;  %v1343_v49 = vmax.f32 %v1339_v42, 0.0  ;;  %v7562_v36 = vld [vmem:[%s9601_s16 + $0x68] sm:$0xff]   ;;  %v7563_v38 = vld [vmem:[%s9601_s16 + $0x70] sm:$0xff]   ;;  %v7564_v39 = vld [vmem:[%s9601_s16 + $0x78] sm:$0xff]  }
 0x593   :  { %v1363_v52 = vpack.c.bf16 %v1345_v46, %v1344_v44  ;;  %v8938_v55 = vpack.c.bf16 %v2315_v51, %v2314_v50  ;;  %v7565_v40 = vld [vmem:[%s9601_s16] sm:$0xff]   ;;  %v7582_v42 = vld [vmem:[%s9602_s19 + $0x8] sm:$0xff]   ;;  %v7583_v43 = vld [vmem:[%s9602_s19 + $0x10] sm:$0xff]  }
 0x594   :  { %v1362_v53 = vpack.c.bf16 %v1343_v49, %v1342_v47  ;;  %v8936_v54 = vpack.c.bf16 %v2313_v48, %v2312_v45  ;;  %v7581_v41 = vld [vmem:[%s9602_s19] sm:$0xff]   ;;  %v7584_v44 = vld [vmem:[%s9602_s19 + $0x18] sm:$0xff]   ;;  %v7586_v46 = vld [vmem:[%s9602_s19 + $0x28] sm:$0xff]  }
 0x595   :  { %v7585_v45 = vld [vmem:[%s9602_s19 + $0x20] sm:$0xff]  }
 0x596   :  { %7078 = vmatprep.mubr.bf16.mxu1 %v1362_v53  ;;  %v7705_v28 = vld [vmem:[%s9614_s1] sm:$0xff]  }
 0x597   :  { %7079 = vmatmul.mubr.bf16.vlgmr.msra.gmra.mrb[16].mxu1 %v1363_v52 }
 0x598   :  { %7083 = vmatpush3.bf16.msra.mxu1 %v8911_v0  ;;  %7090 = vmatprep.mubr.msk.bf16.mxu1 %vm524_vm0, %v1318_v11  ;;  %v7551_v0 = vld [vmem:[%s9600_s0 + $0x10] sm:$0xff]   ;;  %s9627_s0 = sld [smem:[#allocation75_spill]] }
 0x599   :  { %7084 = vmatprep.subr.bf16.mxu1 %v7548_v56  ;;  %7106 = vmatprep.mubr.msk.bf16.mxu0 %vm600_vm1, %v7551_v0 }
 0x59c   :  { %7085 = vmatpush3.bf16.msra.mxu1 %v7548_v56 }
 0x59d   :  { %7086 = vmatprep.subr.bf16.mxu1 %v7549_v61 }
 0x5a0   :  { %7087 = vmatpush3.bf16.msra.mxu1 %v7549_v61 }
 0x5a1   :  { %7088 = vmatprep.subr.bf16.mxu1 %v7550_v2 }
 0x5a4   :  { %7089 = vmatpush3.bf16.msra.mxu1 %v7550_v2 }
 0x5a7   :  { %7091 = vmatmul.mubr.msk.bf16.vlgmr.msra.gmra.mrb[16].mxu1 %vm524_vm0, %v1319_v5 }
 0x5a8   :  { %7098 = vmatprep.mubr.msk.bf16.mxu1 %vm600_vm1, %v7553_v1 }
 0x67a   :  { %v7092_v8 = vpop.f32.mrb[16].mxu1 }
 0x67b   :  { %v1549_v6 = vadd.f32 %v7092_v8, %v6118_v7  ;;  %v1525_v9 = vpop.f32.mrb[17].mxu1  ;;  %v7568_v8 = vld [vmem:[%s9601_s16 + $0x18] sm:$0xff]  }
 0x67c   :  { %v1547_v10 = vadd.f32 %v6118_v7, %v1525_v9  ;;  %v7093_v11 = vpop.f32.mrb[18].mxu1  ;;  %v7570_v9 = vld [vmem:[%s9601_s16 + $0x28] sm:$0xff]  }
 0x67d   :  { %v1550_v12 = vadd.f32 %v7093_v11, %v6118_v7  ;;  %v1528_v13 = vpop.f32.mrb[19].mxu1  ;;  %v1553_v15 = vmax.f32 %v1549_v6, 0.0  ;;  %v7569_v6 = vld [vmem:[%s9601_s16 + $0x20] sm:$0xff]   ;;  %v7572_v11 = vld [vmem:[%s9601_s16 + $0x38] sm:$0xff]  }
 0x67e   :  { %v1548_v14 = vadd.f32 %v6118_v7, %v1528_v13  ;;  %v1551_v18 = vmax.f32 %v1547_v10, 0.0  ;;  %v7571_v10 = vld [vmem:[%s9601_s16 + $0x30] sm:$0xff]   ;;  %v7574_v13 = vld [vmem:[%s9601_s16 + $0x88] sm:$0xff]  }
 0x67f   :  { %v1554_v17 = vmax.f32 %v1550_v12, 0.0  ;;  %v7573_v12 = vld [vmem:[%s9601_s16 + $0x80] sm:$0xff]  }
 0x680   :  { %v1552_v20 = vmax.f32 %v1548_v14, 0.0  ;;  %v7575_v14 = vld [vmem:[%s9601_s16 + $0x90] sm:$0xff]  }
 0x681   :  { %v1556_v21 = vpack.c.bf16 %v1554_v17, %v1553_v15  ;;  %v7576_v15 = vld [vmem:[%s9601_s16 + $0x98] sm:$0xff]   ;;  %v7577_v17 = vld [vmem:[%s9601_s16 + $0xa0] sm:$0xff]  }
 0x682   :  { %v1555_v22 = vpack.c.bf16 %v1552_v20, %v1551_v18  ;;  %v7578_v18 = vld [vmem:[%s9601_s16 + $0xa8] sm:$0xff]   ;;  %v7579_v20 = vld [vmem:[%s9601_s16 + $0xb0] sm:$0xff]  }
 0x684   :  { %7094 = vmatprep.subr.bf16.mxu1 %v1555_v22  ;;  %7102 = vmatprep.subr.bf16.mxu0 %v1555_v22 }
 0x685   :  { %7095 = vmatpush3.bf16.msra.mxu1 %v1555_v22  ;;  %7103 = vmatpush3.bf16.msra.mxu0 %v1555_v22 }
 0x686   :  { %7096 = vmatprep.subr.bf16.mxu1 %v1556_v21  ;;  %7104 = vmatprep.subr.bf16.mxu0 %v1556_v21 }
 0x689   :  { %7097 = vmatpush3.bf16.msra.mxu1 %v1556_v21  ;;  %7105 = vmatpush3.bf16.msra.mxu0 %v1556_v21 }
 0x68a   :  { %7150 = vmatprep.subr.bf16.mxu0 %v1555_v22  ;;  %7110 = vmatprep.subr.bf16.mxu1 %v7557_v23 }
 0x68c   :  { %7107 = vmatmul.mubr.msk.bf16.vlgmr.msra.gmra.mrb[8].mxu0 %vm600_vm1, %v7552_v25  ;;  %7099 = vmatmul.mubr.msk.bf16.vlgmr.msra.gmra.mrb[20].mxu1 %vm600_vm1, %v7554_v26  ;;  %v7591_v25 = vld [vmem:[%s9603_s29 + $0x4] ss:$8 sps:$4 sm:$0xff]   ;;  %v8443_v26 = vmov 0  }
 0x68d   :  { %7151 = vmatpush3.bf16.msra.mxu0 %v1555_v22  ;;  %7154 = vmatprep.mubr.msk.bf16.mxu0 %vm600_vm1, %v7555_v27  ;;  %v7587_v22 = vld [vmem:[%s9602_s19 + $0x30] sm:$0xff]  }
 0x68e   :  { %7152 = vmatprep.subr.bf16.mxu0 %v1556_v21  ;;  %7111 = vmatpush3.bf16.msra.mxu1 %v7557_v23  ;;  %v7588_v23 = vld [vmem:[%s9602_s19 + $0x38] sm:$0xff]   ;;  %v6195_v27 = vld [vmem:[#allocation19] ss:$0 sm:$0xff]  ;;  %s9629_s19 = sld [smem:[#allocation77_spill]] }
 0x68f   :  { %7112 = vmatprep.subr.bf16.mxu1 %v7558_v29 }
 0x691   :  { %7153 = vmatpush3.bf16.msra.mxu0 %v1556_v21  ;;  %v7580_v21 = vld [vmem:[%s9601_s16 + $0xb8] sm:$0xff]   ;;  %s9628_s16 = sld [smem:[#allocation76_spill]] }
 0x692   :  { %7113 = vmatpush3.bf16.msra.mxu1 %v7558_v29  ;;  %7178 = vmatprep.subr.bf16.mxu0 %v7581_v41 }
 0x693   :  { %7114 = vmatprep.subr.bf16.mxu1 %v7559_v30 }
 0x694   :  { %7155 = vmatmul.mubr.msk.bf16.vlgmr.msra.gmra.mrb[12].mxu0 %vm600_vm1, %v7556_v32 }
 0x695   :  { %7179 = vmatpush3.bf16.msra.mxu0 %v7581_v41 }
 0x696   :  { %7115 = vmatpush3.bf16.msra.mxu1 %v7559_v30  ;;  %7180 = vmatprep.subr.bf16.mxu0 %v7582_v42 }
 0x697   :  { %7116 = vmatprep.subr.bf16.mxu1 %v7560_v34 }
 0x699   :  { %7181 = vmatpush3.bf16.msra.mxu0 %v7582_v42 }
 0x69a   :  { %7117 = vmatpush3.bf16.msra.mxu1 %v7560_v34  ;;  %7182 = vmatprep.subr.bf16.mxu0 %v7583_v43 }
 0x69b   :  { %7118 = vmatprep.subr.bf16.mxu1 %v7561_v35 }
 0x69d   :  { %7183 = vmatpush3.bf16.msra.mxu0 %v7583_v43 }
 0x69e   :  { %7119 = vmatpush3.bf16.msra.mxu1 %v7561_v35  ;;  %7184 = vmatprep.subr.bf16.mxu0 %v7584_v44 }
 0x69f   :  { %7120 = vmatprep.subr.bf16.mxu1 %v7562_v36 }
 0x6a1   :  { %7185 = vmatpush3.bf16.msra.mxu0 %v7584_v44 }
 0x6a2   :  { %7121 = vmatpush3.bf16.msra.mxu1 %v7562_v36  ;;  %7186 = vmatprep.subr.bf16.mxu0 %v7585_v45 }
 0x6a3   :  { %7122 = vmatprep.subr.bf16.mxu1 %v7563_v38 }
 0x6a5   :  { %7187 = vmatpush3.bf16.msra.mxu0 %v7585_v45 }
 0x6a6   :  { %7123 = vmatpush3.bf16.msra.mxu1 %v7563_v38  ;;  %7188 = vmatprep.subr.bf16.mxu0 %v7586_v46 }
 0x6a7   :  { %7124 = vmatprep.subr.bf16.mxu1 %v7564_v39 }
 0x6a9   :  { %7189 = vmatpush3.bf16.msra.mxu0 %v7586_v46  ;;  %v7589_v46 = vld [vmem:[%s9603_s29] ss:$8 sps:$4 sm:$0xff]  }
 0x6aa   :  { %7125 = vmatpush3.bf16.msra.mxu1 %v7564_v39  ;;  %7190 = vmatprep.subr.bf16.mxu0 %v7587_v22 }
 0x6ab   :  { %7130 = vmatprep.subr.bf16.mxu1 %v7565_v40 }
 0x6ad   :  { %7191 = vmatpush3.bf16.msra.mxu0 %v7587_v22  ;;  %v7967_v22 = vld [vmem:[#allocation23] ss:$0 sm:$0xff] }
 0x6ae   :  { %7192 = vmatprep.subr.bf16.mxu0 %v7588_v23 }
 0x6b1   :  { %7193 = vmatpush3.bf16.msra.mxu0 %v7588_v23 }
 0x6b2   :  { %2414 = vmatprep.subr.bf16.mxu0 %v7591_v25 }
 0x75f   :  { %v7108_v47 = vpop.f32.mrb[8].mxu0  ;;  %v7100_v48 = vpop.f32.mrb[20].mxu1 }
 0x760   :  { %v1699_v49 = vpop.f32.mrb[9].mxu0  ;;  %v1611_v50 = vpop.f32.mrb[21].mxu1 }
 0x761   :  { %v7109_v51 = vpop.f32.mrb[10].mxu0  ;;  %v7101_v52 = vpop.f32.mrb[22].mxu1 }
 0x762   :  { %v1732_v53 = vpack.c.bf16 %v7109_v51, %v7108_v47  ;;  %v1702_v56 = vpop.f32.mrb[11].mxu0  ;;  %v1643_v58 = vpack.c.bf16 %v7101_v52, %v7100_v48  ;;  %v1614_v60 = vpop.f32.mrb[23].mxu1  ;;  %v7594_v47 = vld [vmem:[%s9603_s29 + $0x14] ss:$8 sps:$4 sm:$0xff]   ;;  %v7592_v48 = vld [vmem:[%s9603_s29 + $0x10] ss:$8 sps:$4 sm:$0xff]  }
 0x763   :  { %v1731_v61 = vpack.c.bf16 %v1702_v56, %v1699_v49  ;;  %v1642_v62 = vpack.c.bf16 %v1614_v60, %v1611_v50  ;;  %v7597_v49 = vld [vmem:[%s9603_s29 + $0x24] ss:$8 sps:$4 sm:$0xff]   ;;  %v7595_v50 = vld [vmem:[%s9603_s29 + $0x20] ss:$8 sps:$4 sm:$0xff]   ;;  %v7600_v51 = vld [vmem:[%s9603_s29 + $0x34] ss:$8 sps:$4 sm:$0xff]  }
 0x764   :  { %v7598_v52 = vld [vmem:[%s9603_s29 + $0x30] ss:$8 sps:$4 sm:$0xff]   ;;  %v7601_v56 = vld [vmem:[%s9603_s29 + $0x40] ss:$8 sps:$4 sm:$0xff]  }
 0x765   :  { %7126 = vmatprep.mubr.bf16.mxu1 %v1731_v61  ;;  %v7604_v60 = vld [vmem:[%s9603_s29 + $0x50] ss:$8 sps:$4 sm:$0xff]   ;;  %v7609_v61 = vld [vmem:[%s9603_s29 + $0x64] ss:$8 sps:$4 sm:$0xff]  }
 0x766   :  { %7127 = vmatmul.mubr.bf16.vlgmr.msra.gmra.mrb[24].mxu1 %v1732_v53  ;;  %v7603_v53 = vld [vmem:[%s9603_s29 + $0x44] ss:$8 sps:$4 sm:$0xff]  }
 0x767   :  { %7131 = vmatpush3.bf16.msra.mxu1 %v7565_v40  ;;  %7146 = vmatprep.mubr.bf16.mxu1 %v1642_v62  ;;  %v7156_v2 = vpop.f32.mrb[12].mxu0  ;;  %v7607_v62 = vld [vmem:[%s9603_s29 + $0x60] ss:$8 sps:$4 sm:$0xff]  }
 0x768   :  { %7132 = vmatprep.subr.bf16.mxu1 %v7566_v63  ;;  %v1982_v4 = vpop.f32.mrb[13].mxu0 }
 0x769   :  { %v7157_v5 = vpop.f32.mrb[14].mxu0 }
 0x76a   :  { %v2015_v0 = vpack.c.bf16 %v7157_v5, %v7156_v2  ;;  %v1985_v1 = vpop.f32.mrb[15].mxu0  ;;  %v7610_v2 = vld [vmem:[%s9603_s29 + $0x70] ss:$8 sps:$4 sm:$0xff]   ;;  %v7618_v5 = vld [vmem:[%s9604_s18 + $0x14] ss:$8 sps:$4 sm:$0xff]  }
 0x76b   :  { %7133 = vmatpush3.bf16.msra.mxu1 %v7566_v63  ;;  %v2014_v7 = vpack.c.bf16 %v1985_v1, %v1982_v4  ;;  %v7612_v63 = vld [vmem:[%s9603_s29 + $0x74] ss:$8 sps:$4 sm:$0xff]   ;;  %v7613_v4 = vld [vmem:[%s9604_s18] ss:$8 sps:$4 sm:$0xff]   ;;  %v7621_v1 = vld [vmem:[%s9604_s18 + $0x24] ss:$8 sps:$4 sm:$0xff]  }
 0x76c   :  { %7134 = vmatprep.subr.bf16.mxu1 %v7567_v3 }
 0x76f   :  { %7135 = vmatpush3.bf16.msra.mxu1 %v7567_v3  ;;  %v7615_v3 = vld [vmem:[%s9604_s18 + $0x4] ss:$8 sps:$4 sm:$0xff]  }
 0x770   :  { %7136 = vmatprep.subr.bf16.mxu1 %v7568_v8 }
 0x773   :  { %7137 = vmatpush3.bf16.msra.mxu1 %v7568_v8  ;;  %v7624_v8 = vld [vmem:[%s9604_s18 + $0x34] ss:$8 sps:$4 sm:$0xff]  }
 0x774   :  { %7138 = vmatprep.subr.bf16.mxu1 %v7569_v6 }
 0x777   :  { %7139 = vmatpush3.bf16.msra.mxu1 %v7569_v6  ;;  %v7622_v6 = vld [vmem:[%s9604_s18 + $0x30] ss:$8 sps:$4 sm:$0xff]  }
 0x778   :  { %7140 = vmatprep.subr.bf16.mxu1 %v7570_v9 }
 0x77b   :  { %7141 = vmatpush3.bf16.msra.mxu1 %v7570_v9  ;;  %v7625_v9 = vld [vmem:[%s9605_s12] ss:$8 sps:$4 sm:$0xff]  }
 0x77c   :  { %7142 = vmatprep.subr.bf16.mxu1 %v7571_v10 }
 0x77f   :  { %7143 = vmatpush3.bf16.msra.mxu1 %v7571_v10  ;;  %v7630_v10 = vld [vmem:[%s9605_s12 + $0x14] ss:$8 sps:$4 sm:$0xff]  }
 0x780   :  { %7144 = vmatprep.subr.bf16.mxu1 %v7572_v11 }
 0x783   :  { %7145 = vmatpush3.bf16.msra.mxu1 %v7572_v11  ;;  %v7633_v11 = vld [vmem:[%s9605_s12 + $0x24] ss:$8 sps:$4 sm:$0xff]  }
 0x784   :  { %7158 = vmatprep.subr.bf16.mxu1 %v7573_v12 }
 0x786   :  { %7147 = vmatmul.mubr.bf16.vlgmr.msra.gmra.mrb[24].mxu1 %v1643_v58  ;;  %v7606_v58 = vld [vmem:[%s9603_s29 + $0x54] ss:$8 sps:$4 sm:$0xff]   ;;  %s9630_s29 = sld [smem:[#allocation79_spill]] }
 0x787   :  { %7159 = vmatpush3.bf16.msra.mxu1 %v7573_v12  ;;  %7174 = vmatprep.mubr.bf16.mxu1 %v2014_v7  ;;  %v7619_v7 = vld [vmem:[%s9604_s18 + $0x20] ss:$8 sps:$4 sm:$0xff]  }
 0x788   :  { %7160 = vmatprep.subr.bf16.mxu1 %v7574_v13  ;;  %v7631_v12 = vld [vmem:[%s9605_s12 + $0x20] ss:$8 sps:$4 sm:$0xff]  }
 0x78b   :  { %7161 = vmatpush3.bf16.msra.mxu1 %v7574_v13  ;;  %v7636_v13 = vld [vmem:[%s9605_s12 + $0x34] ss:$8 sps:$4 sm:$0xff]  }
 0x78c   :  { %7162 = vmatprep.subr.bf16.mxu1 %v7575_v14 }
 0x78f   :  { %7163 = vmatpush3.bf16.msra.mxu1 %v7575_v14  ;;  %v7634_v14 = vld [vmem:[%s9605_s12 + $0x30] ss:$8 sps:$4 sm:$0xff]  }
 0x790   :  { %7164 = vmatprep.subr.bf16.mxu1 %v7576_v15 }
 0x793   :  { %7165 = vmatpush3.bf16.msra.mxu1 %v7576_v15  ;;  %v7639_v15 = vld [vmem:[%s9605_s12 + $0x44] ss:$8 sps:$4 sm:$0xff]  }
 0x794   :  { %7166 = vmatprep.subr.bf16.mxu1 %v7577_v17 }
 0x797   :  { %7167 = vmatpush3.bf16.msra.mxu1 %v7577_v17  ;;  %v7637_v17 = vld [vmem:[%s9605_s12 + $0x40] ss:$8 sps:$4 sm:$0xff]  }
 0x798   :  { %7168 = vmatprep.subr.bf16.mxu1 %v7578_v18 }
 0x79b   :  { %7169 = vmatpush3.bf16.msra.mxu1 %v7578_v18 }
 0x79c   :  { %7170 = vmatprep.subr.bf16.mxu1 %v7579_v20 }
 0x79f   :  { %7171 = vmatpush3.bf16.msra.mxu1 %v7579_v20 }
 0x7a0   :  { %7172 = vmatprep.subr.bf16.mxu1 %v7580_v21 }
 0x7a3   :  { %7173 = vmatpush3.bf16.msra.mxu1 %v7580_v21  ;;  %v7642_v21 = vld [vmem:[%s9605_s12 + $0x54] ss:$8 sps:$4 sm:$0xff]  }
 0x7a6   :  { %7175 = vmatmul.mubr.bf16.vlgmr.msra.gmra.mrb[24].mxu1 %v2015_v0  ;;  %v7616_v0 = vld [vmem:[%s9604_s18 + $0x10] ss:$8 sps:$4 sm:$0xff]   ;;  %s9631_s18 = sld [smem:[#allocation78_spill]] }
 0x7a7   :  { %2825 = vmatprep.mubr.bf16.mxu1 %v8443_v26 }
 0x879   :  { %v7176_v29 = vpop.f32.mrb[24].mxu1 }
 0x87a   :  { %v2126_v30 = vadd.f32 %v7176_v29, %v6195_v27  ;;  %v2098_v32 = vpop.f32.mrb[25].mxu1 }
 0x87b   :  { %v2124_v34 = vadd.f32 %v6195_v27, %v2098_v32  ;;  %v7177_v35 = vpop.f32.mrb[26].mxu1 }
 0x87c   :  { %v2127_v36 = vadd.f32 %v7177_v35, %v6195_v27  ;;  %v2101_v38 = vpop.f32.mrb[27].mxu1  ;;  %v2130_v40 = vmax.f32 %v2126_v30, 0.0  ;;  %v7643_v35 = vld [vmem:[%s9605_s12 + $0x60] ss:$8 sps:$4 sm:$0xff]  }
 0x87d   :  { %v2125_v39 = vadd.f32 %v6195_v27, %v2101_v38  ;;  %v2128_v42 = vmax.f32 %v2124_v34, 0.0  ;;  %v7640_v27 = vld [vmem:[%s9605_s12 + $0x50] ss:$8 sps:$4 sm:$0xff]   ;;  %v7645_v34 = vld [vmem:[%s9605_s12 + $0x64] ss:$8 sps:$4 sm:$0xff]  }
 0x87e   :  { %v2131_v41 = vmax.f32 %v2127_v36, 0.0  ;;  %v6196_v36 = vld [vmem:[#allocation20] ss:$0 sm:$0xff] }
 0x87f   :  { %v2129_v43 = vmax.f32 %v2125_v39, 0.0  ;;  %v6235_v39 = vld [vmem:[%s9606_s22] ss:$0 sm:$0xff]  ;;  %s9633_s22 = sld [smem:[#allocation83_spill]] }
 0x880   :  { %v2149_v44 = vpack.c.bf16 %v2131_v41, %v2130_v40 }
 0x881   :  { %v2148_v45 = vpack.c.bf16 %v2129_v43, %v2128_v42  ;;  %v6236_v42 = vld [vmem:[%s9607_s23] ss:$0 sm:$0xff]  ;;  %s9634_s23 = sld [smem:[#allocation84_spill]] }
 0x883   :  { %7194 = vmatprep.mubr.bf16.mxu0 %v2148_v45 }
 0x884   :  { %7195 = vmatmul.mubr.bf16.vlgmr.msra.gmra.mrb[16].mxu0 %v2149_v44 }
 0x885   :  { %2415 = vmatpush1.bf16.msra.mxu0 %v7589_v46  ;;  %2446 = vmatprep.mubr.bf16.mxu0 %v8443_v26 }
 0x886   :  { %2416 = vmatprep.subr.bf16.mxu0 %v7594_v47 }
 0x889   :  { %2417 = vmatpush1.bf16.msra.mxu0 %v7592_v48 }
 0x88a   :  { %2418 = vmatprep.subr.bf16.mxu0 %v7597_v49 }
 0x88d   :  { %2419 = vmatpush1.bf16.msra.mxu0 %v7595_v50 }
 0x88e   :  { %2420 = vmatprep.subr.bf16.mxu0 %v7600_v51 }
 0x891   :  { %2421 = vmatpush1.bf16.msra.mxu0 %v7598_v52 }
 0x892   :  { %2422 = vmatprep.subr.bf16.mxu0 %v7603_v53 }
 0x895   :  { %2423 = vmatpush1.bf16.msra.mxu0 %v7601_v56 }
 0x896   :  { %2424 = vmatprep.subr.bf16.mxu0 %v7606_v58 }
 0x899   :  { %2425 = vmatpush1.bf16.msra.mxu0 %v7604_v60 }
 0x89a   :  { %2426 = vmatprep.subr.bf16.mxu0 %v7609_v61 }
 0x89d   :  { %2427 = vmatpush1.bf16.msra.mxu0 %v7607_v62 }
 0x89e   :  { %2428 = vmatprep.subr.bf16.mxu0 %v7612_v63 }
 0x8a1   :  { %2429 = vmatpush1.bf16.msra.mxu0 %v7610_v2 }
 0x8a2   :  { %2513 = vmatprep.subr.bf16.mxu0 %v7615_v3 }
 0x8a4   :  { %2447 = vmatmul.mubr.bf16.vlgmr.msra.gmra.mrb[20].mxu0 %v8936_v54  ;;  %v7627_v54 = vld [vmem:[%s9605_s12 + $0x4] ss:$8 sps:$4 sm:$0xff]  }
 0x8a5   :  { %2456 = vmatprep.mubr.bf16.mxu0 %v8443_v26  ;;  %2514 = vmatpush1.bf16.msra.mxu0 %v7613_v4 }
 0x8a6   :  { %2515 = vmatprep.subr.bf16.mxu0 %v7618_v5 }
 0x8a9   :  { %2516 = vmatpush1.bf16.msra.mxu0 %v7616_v0  ;;  %v7667_v0 = vld [vmem:[%s9608_s26 + $0x40] sm:$0xff]  }
 0x8aa   :  { %2517 = vmatprep.subr.bf16.mxu0 %v7621_v1  ;;  %v7668_v1 = vld [vmem:[%s9608_s26] sm:$0xff]  }
 0x8ac   :  { %2457 = vmatmul.mubr.bf16.gmra.mrb[24].mxu0 %v8938_v55  ;;  %v7628_v55 = vld [vmem:[%s9605_s12 + $0x10] ss:$8 sps:$4 sm:$0xff]  }
 0x8ad   :  { %2518 = vmatpush1.bf16.msra.mxu0 %v7619_v7  ;;  %2545 = vmatprep.mubr.bf16.mxu0 %v8443_v26  ;;  %v7669_v7 = vld [vmem:[%s9608_s26 + $0x48] sm:$0xff]  }
 0x8ae   :  { %2519 = vmatprep.subr.bf16.mxu0 %v7624_v8  ;;  %v7670_v8 = vld [vmem:[%s9608_s26 + $0x8] sm:$0xff]  }
 0x8b1   :  { %2520 = vmatpush1.bf16.msra.mxu0 %v7622_v6  ;;  %v7671_v6 = vld [vmem:[%s9608_s26 + $0x50] sm:$0xff]  }
 0x8b2   :  { %2690 = vmatprep.subr.bf16.mxu0 %v7627_v54  ;;  %v7672_v54 = vld [vmem:[%s9608_s26 + $0x10] sm:$0xff]  }
 0x8b4   :  { %6233 = vmatmul.mubr.msk.bf16.vlgmr.msra.gmra.mrb[20].mxu0 %vm524_vm0, %v8854_v31  ;;  %v7966_v31 = vld [vmem:[#allocation22] ss:$0 sm:$0xff] }
 0x8b5   :  { %2691 = vmatpush1.bf16.msra.mxu0 %v7625_v9  ;;  %2555 = vmatprep.mubr.bf16.mxu0 %v8443_v26  ;;  %v2263_v18 = vmul.f32 %v7966_v31, %v8942_v57  ;;  %v2264_v20 = vmul.f32 %v7966_v31, %v8946_v59  ;;  %v7648_v57 = vld [vmem:[%s9605_s12 + $0x74] ss:$8 sps:$4 sm:$0xff]   ;;  %v7646_v59 = vld [vmem:[%s9605_s12 + $0x70] ss:$8 sps:$4 sm:$0xff]   ;;  %s9632_s12 = sld [smem:[#allocation81_spill]] }
 0x8b6   :  { %2692 = vmatprep.subr.bf16.mxu0 %v7630_v10  ;;  %v7673_v9 = vld [vmem:[%s9608_s26 + $0x58] sm:$0xff]  }
 0x8b7   :  { %v2274_v23 = vadd.f32 %v7967_v22, %v2263_v18  ;;  %v2275_v25 = vadd.f32 %v7967_v22, %v2264_v20  ;;  %v7674_v10 = vld [vmem:[%s9608_s26 + $0x18] sm:$0xff]   ;;  %v2751_v18 = vld [vmem:[%s9609_s28] sm:$0x3]  ;;  %s9636_s28 = sld [smem:[#allocation82_spill]] }
 0x8b9   :  { %2693 = vmatpush1.bf16.msra.mxu0 %v7628_v55  ;;  %v2278_v29 = vmax.f32 %v2274_v23, 0.0  ;;  %v2279_v30 = vmax.f32 %v2275_v25, 0.0  ;;  %v7675_v55 = vld [vmem:[%s9608_s26 + $0x60] sm:$0xff]  }
 0x8ba   :  { %2694 = vmatprep.subr.bf16.mxu0 %v7633_v11  ;;  %v7676_v11 = vld [vmem:[%s9608_s26 + $0x20] sm:$0xff]  }
 0x8bb   :  { %v2289_v32 = vpack.c.bf16 %v2279_v30, %v2278_v29 }
 0x8bd   :  { %2695 = vmatpush1.bf16.msra.mxu0 %v7631_v12  ;;  %v7677_v12 = vld [vmem:[%s9608_s26 + $0x68] sm:$0xff]  }
 0x8be   :  { %2696 = vmatprep.subr.bf16.mxu0 %v7636_v13  ;;  %6234 = vmatmul.mubr.msk.bf16.gmra.mrb[24].mxu0 %vm524_vm0, %v2289_v32  ;;  %v7678_v13 = vld [vmem:[%s9608_s26 + $0x28] sm:$0xff]  }
 0x8bf   :  { %2722 = vmatprep.mubr.bf16.mxu0 %v8443_v26 }
 0x8c1   :  { %2697 = vmatpush1.bf16.msra.mxu0 %v7634_v14  ;;  %v7679_v14 = vld [vmem:[%s9608_s26 + $0x70] sm:$0xff]  }
 0x8c2   :  { %2698 = vmatprep.subr.bf16.mxu0 %v7639_v15  ;;  %v2753_v15 = vlaneseq }
 0x8c5   :  { %2699 = vmatpush1.bf16.msra.mxu0 %v7637_v17  ;;  %v2754_v17 = vshrl.u32 %v2753_v15, 7  ;;  %v7682_v15 = vld [vmem:[%s9608_s26 + $0x38] sm:$0xff]  }
 0x8c6   :  { %2700 = vmatprep.subr.bf16.mxu0 %v7642_v21 }
 0x8c7   :  { %v9071_v31 = vsub.s32 0, %v2754_v17  ;;  %v9074_v20 = vsub.s32 1, %v2754_v17 }
 0x8c9   :  { %2701 = vmatpush1.bf16.msra.mxu0 %v7640_v27  ;;  %v2756_v21 = vrot.slane %v2751_v18, %v9071_v31  ;;  %v2760_v22 = vrot.slane %v2751_v18, %v9074_v20 }
 0x8ca   :  { %2702 = vmatprep.subr.bf16.mxu0 %v7645_v34 }
 0x8cd   :  { %2703 = vmatpush1.bf16.msra.mxu0 %v7643_v35 }
 0x8ce   :  { %2704 = vmatprep.subr.bf16.mxu0 %v7648_v57 }
 0x8d1   :  { %2705 = vmatpush1.bf16.msra.mxu0 %v7646_v59 }
 0x8d2   :  { %6811 = vmatprep.subr.bf16.mxu0 %v7667_v0  ;;  %v7656_v0 = vld [vmem:[%s9608_s26 + $0x90] sm:$0xff]  }
 0x957   :  { %v7196_v38 = vpop.f32.mrb[16].mxu0 }
 0x958   :  { %v2248_v40 = vadd.f32 %v7196_v38, %v6196_v36  ;;  %v2239_v41 = vpop.f32.mrb[17].mxu0 }
 0x959   :  { %v2240_v43 = vadd.f32 %v6196_v36, %v2239_v41  ;;  %v7197_v44 = vpop.f32.mrb[18].mxu0 }
 0x95a   :  { %v2575_v45 = vmul.f32 %v6235_v39, %v2248_v40  ;;  %v2251_v46 = vadd.f32 %v7197_v44, %v6196_v36  ;;  %v2242_v47 = vpop.f32.mrb[19].mxu0 }
 0x95b   :  { %v2573_v48 = vmul.f32 %v6235_v39, %v2240_v43  ;;  %v2243_v49 = vadd.f32 %v6196_v36, %v2242_v47 }
 0x95c   :  { %v2586_v50 = vadd.f32 %v6236_v42, %v2575_v45  ;;  %v2576_v51 = vmul.f32 %v6235_v39, %v2251_v46  ;;  %v9053_v52 = vpack.c.bf16 %v2251_v46, %v2248_v40 }
 0x95d   :  { %v2584_v53 = vadd.f32 %v6236_v42, %v2573_v48  ;;  %v2574_v56 = vmul.f32 %v6235_v39, %v2243_v49  ;;  %v9055_v58 = vpack.c.bf16 %v2243_v49, %v2240_v43 }
 0x95e   :  { %v2587_v60 = vadd.f32 %v6236_v42, %v2576_v51  ;;  %v2590_v62 = vmax.f32 %v2586_v50, 0.0 }
 0x95f   :  { %v2585_v61 = vadd.f32 %v6236_v42, %v2574_v56  ;;  %v2588_v2 = vmax.f32 %v2584_v53, 0.0 }
 0x960   :  { %v2591_v63 = vmax.f32 %v2587_v60, 0.0 }
 0x961   :  { %v2589_v3 = vmax.f32 %v2585_v61, 0.0  ;;  %v7649_v61 = vld [vmem:[%s9610_s20] sm:$0xff]  }
 0x962   :  { %v2609_v4 = vpack.c.bf16 %v2591_v63, %v2590_v62  ;;  %v7651_v62 = vld [vmem:[%s9608_s26 + $0xc0] sm:$0xff]   ;;  %v7650_v63 = vld [vmem:[%s9610_s20 + $0x8] sm:$0xff]  }
 0x963   :  { %v2608_v5 = vpack.c.bf16 %v2589_v3, %v2588_v2  ;;  %v7652_v2 = vld [vmem:[%s9608_s26 + $0x80] sm:$0xff]   ;;  %v7653_v3 = vld [vmem:[%s9608_s26 + $0xc8] sm:$0xff]  }
 0x965   :  { %2723 = vmatmul.mubr.bf16.vlgmr.msra.gmra.mrb[20].mxu0 %v2608_v5  ;;  %v7655_v5 = vld [vmem:[%s9608_s26 + $0xd0] sm:$0xff]  }
 0x966   :  { %2732 = vmatprep.mubr.bf16.mxu0 %v8443_v26  ;;  %6812 = vmatpush3.bf16.msra.mxu0 %v7668_v1  ;;  %v7657_v1 = vld [vmem:[%s9608_s26 + $0xd8] sm:$0xff]  }
 0x967   :  { %6813 = vmatprep.subr.bf16.mxu0 %v7669_v7  ;;  %v7658_v7 = vld [vmem:[%s9608_s26 + $0x98] sm:$0xff]  }
 0x96a   :  { %6814 = vmatpush3.bf16.msra.mxu0 %v7670_v8  ;;  %v7659_v8 = vld [vmem:[%s9608_s26 + $0xe0] sm:$0xff]  }
 0x96b   :  { %6815 = vmatprep.subr.bf16.mxu0 %v7671_v6  ;;  %v7660_v6 = vld [vmem:[%s9608_s26 + $0xa0] sm:$0xff]  }
 0x96d   :  { %2733 = vmatmul.mubr.bf16.gmra.mrb[24].mxu0 %v2609_v4  ;;  %v7654_v4 = vld [vmem:[%s9608_s26 + $0x88] sm:$0xff]  }
 0x96e   :  { %6816 = vmatpush3.bf16.msra.mxu0 %v7672_v54  ;;  %v7661_v54 = vld [vmem:[%s9608_s26 + $0xe8] sm:$0xff]  }
 0x96f   :  { %6817 = vmatprep.subr.bf16.mxu0 %v7673_v9  ;;  %v7662_v9 = vld [vmem:[%s9608_s26 + $0xa8] sm:$0xff]  }
 0x972   :  { %6818 = vmatpush3.bf16.msra.mxu0 %v7674_v10  ;;  %v7663_v10 = vld [vmem:[%s9608_s26 + $0xf0] sm:$0xff]  }
 0x973   :  { %6819 = vmatprep.subr.bf16.mxu0 %v7675_v55  ;;  %v7664_v55 = vld [vmem:[%s9608_s26 + $0xb0] sm:$0xff]  }
 0x976   :  { %6820 = vmatpush3.bf16.msra.mxu0 %v7676_v11  ;;  %v7665_v11 = vld [vmem:[%s9608_s26 + $0xf8] sm:$0xff]  }
 0x977   :  { %6821 = vmatprep.subr.bf16.mxu0 %v7677_v12  ;;  %v7666_v12 = vld [vmem:[%s9608_s26 + $0xb8] sm:$0xff]  }
 0x97a   :  { %6822 = vmatpush3.bf16.msra.mxu0 %v7678_v13  ;;  %v7680_v13 = vld [vmem:[%s9608_s26 + $0x30] sm:$0xff]  }
 0x97b   :  { %6823 = vmatprep.subr.bf16.mxu0 %v7679_v14  ;;  %v7681_v14 = vld [vmem:[%s9608_s26 + $0x78] sm:$0xff]  }
 0x97e   :  { %6824 = vmatpush3.bf16.msra.mxu0 %v7680_v13 }
 0x97f   :  { %6825 = vmatprep.subr.bf16.mxu0 %v7681_v14 }
 0x982   :  { %6826 = vmatpush3.bf16.msra.mxu0 %v7682_v15 }
 0xa38   :  { %v2724_v23 = vpop.f32.mrb[20].mxu0 }
 0xa39   :  { %v2763_v25 = vadd.f32 %v2756_v21, %v2724_v23  ;;  %v2726_v27 = vpop.f32.mrb[21].mxu0 }
 0xa3a   :  { %v2764_v29 = vadd.f32 %v2760_v22, %v2726_v27  ;;  %v2728_v30 = vpop.f32.mrb[22].mxu0 }
 0xa3b   :  { %v2765_v32 = vadd.f32 %v2756_v21, %v2728_v30  ;;  %v2730_v34 = vpop.f32.mrb[23].mxu0  ;;  %v2771_v57 = vmax.f32 %v2763_v25, 0.0 }
 0xa3c   :  { %v2766_v35 = vadd.f32 %v2760_v22, %v2730_v34  ;;  %v2772_v36 = vmax.f32 %v2764_v29, 0.0 }
 0xa3d   :  { %v2773_v59 = vmax.f32 %v2765_v32, 0.0 }
 0xa3e   :  { %v2774_v38 = vmax.f32 %v2766_v35, 0.0 }
 0xa3f   :  { %v9078_v39 = vpack.c.bf16 %v2773_v59, %v2771_v57  ;;  %v7684_v57 = vld [vmem:[%s9608_s26 + $0x140] sm:$0xff]   ;;  %v7683_v59 = vld [vmem:[%s9610_s20 + $0x10] sm:$0xff]   ;;  %s9637_s20 = sld [smem:[#allocation85_spill]] }
 0xa40   :  { %v2780_v40 = vpack.c.bf16 %v2774_v38, %v2772_v36  ;;  %v2734_v41 = vpop.f32.mrb[24].mxu0  ;;  %v7685_v36 = vld [vmem:[%s9608_s26 + $0x100] sm:$0xff]   ;;  %v7686_v38 = vld [vmem:[%s9608_s26 + $0x148] sm:$0xff]  }
 0xa41   :  { %v2767_v42 = vadd.f32 %v2756_v21, %v2734_v41  ;;  %v2736_v43 = vpop.f32.mrb[25].mxu0  ;;  %v7689_v41 = vld [vmem:[%s9608_s26 + $0x110] sm:$0xff]  }
 0xa42   :  { %v2768_v44 = vadd.f32 %v2760_v22, %v2736_v43  ;;  %v2738_v45 = vpop.f32.mrb[26].mxu0  ;;  %2793 = vmatprep.subr.bf16.mxu1 %v2780_v40  ;;  %v7691_v43 = vld [vmem:[%s9608_s26 + $0x118] sm:$0xff]  }
 0xa43   :  { %v2769_v46 = vadd.f32 %v2756_v21, %v2738_v45  ;;  %v2740_v47 = vpop.f32.mrb[27].mxu0  ;;  %2794 = vmatpush1.bf16.msra.mxu1 %v9078_v39  ;;  %v2775_v49 = vmax.f32 %v2767_v42, 0.0  ;;  %v7690_v42 = vld [vmem:[%s9608_s26 + $0x158] sm:$0xff]   ;;  %v7693_v45 = vld [vmem:[%s9608_s26 + $0x120] sm:$0xff]  }
 0xa44   :  { %v2770_v48 = vadd.f32 %v2760_v22, %v2740_v47  ;;  %v2776_v51 = vmax.f32 %v2768_v44, 0.0  ;;  %v7692_v44 = vld [vmem:[%s9608_s26 + $0x160] sm:$0xff]   ;;  %v7695_v47 = vld [vmem:[%s9608_s26 + $0x128] sm:$0xff]  }
 0xa45   :  { %v2777_v50 = vmax.f32 %v2769_v46, 0.0  ;;  %v7694_v46 = vld [vmem:[%s9608_s26 + $0x168] sm:$0xff]  }
 0xa46   :  { %v2778_v53 = vmax.f32 %v2770_v48, 0.0  ;;  %v7696_v48 = vld [vmem:[%s9608_s26 + $0x170] sm:$0xff]  }
 0xa47   :  { %v9081_v56 = vpack.c.bf16 %v2777_v50, %v2775_v49  ;;  %v7697_v49 = vld [vmem:[%s9608_s26 + $0x130] sm:$0xff]   ;;  %v7698_v50 = vld [vmem:[%s9608_s26 + $0x178] sm:$0xff]  }
 0xa48   :  { %v9083_v60 = vpack.c.bf16 %v2778_v53, %v2776_v51  ;;  %v7699_v51 = vld [vmem:[%s9608_s26 + $0x138] sm:$0xff]   ;;  %v8444_v53 = vmov 0.0  }
 0xa49   :  { %7198 = vmatprep.subr.bf16.mxu0 %v8444_v53 }
 0xa4a   :  { %2795 = vmatprep.subr.bf16.mxu1 %v9083_v60 }
 0xa4b   :  { %2796 = vmatpush1.bf16.msra.mxu1 %v9081_v56 }
 0xa4c   :  { %2881 = vmatprep.subr.bf16.mxu1 %v2780_v40 }
 0xa4e   :  { %6254 = vmatmul.mubr.msk.bf16.vlgmr.msra.gmra.mrb[28].mxu1 %vm600_vm1, %v7649_v61  ;;  %v7704_v61 = vld [vmem:[%s9611_s9 + $0x10] sm:$0xff]  }
 0xa4f   :  { %2882 = vmatpush1.bf16.msra.mxu1 %v9078_v39  ;;  %2913 = vmatprep.mubr.bf16.mxu1 %v8443_v26 }
 0xa50   :  { %2883 = vmatprep.subr.bf16.mxu1 %v9083_v60 }
 0xa53   :  { %2884 = vmatpush1.bf16.msra.mxu1 %v9081_v56 }
 0xa54   :  { %6789 = vmatprep.subr.bf16.mxu1 %v7651_v62  ;;  %v7706_v62 = vld [vmem:[%s9611_s9 + $0x18] sm:$0xff]  }
 0xa56   :  { %6258 = vmatmul.mubr.msk.bf16.vlgmr.msra.gmra.mrb[32].mxu1 %vm600_vm1, %v7650_v63  ;;  %v7708_v63 = vld [vmem:[%s9611_s9 + $0x20] sm:$0xff]  }
 0xa57   :  { %6790 = vmatpush3.bf16.msra.mxu1 %v7652_v2 }
 0xa58   :  { %6791 = vmatprep.subr.bf16.mxu1 %v7653_v3 }
 0xa5b   :  { %6792 = vmatpush3.bf16.msra.mxu1 %v7654_v4 }
 0xa5c   :  { %6793 = vmatprep.subr.bf16.mxu1 %v7655_v5 }
 0xa5f   :  { %6794 = vmatpush3.bf16.msra.mxu1 %v7656_v0 }
 0xa60   :  { %6795 = vmatprep.subr.bf16.mxu1 %v7657_v1 }
 0xa63   :  { %6796 = vmatpush3.bf16.msra.mxu1 %v7658_v7 }
 0xa64   :  { %6797 = vmatprep.subr.bf16.mxu1 %v7659_v8 }
 0xa67   :  { %6798 = vmatpush3.bf16.msra.mxu1 %v7660_v6 }
 0xa68   :  { %6799 = vmatprep.subr.bf16.mxu1 %v7661_v54 }
 0xa6b   :  { %6800 = vmatpush3.bf16.msra.mxu1 %v7662_v9 }
 0xa6c   :  { %6801 = vmatprep.subr.bf16.mxu1 %v7663_v10 }
 0xa6f   :  { %6802 = vmatpush3.bf16.msra.mxu1 %v7664_v55 }
 0xa70   :  { %6803 = vmatprep.subr.bf16.mxu1 %v7665_v11 }
 0xa73   :  { %6804 = vmatpush3.bf16.msra.mxu1 %v7666_v12 }
 0xa74   :  { %3244 = vmatprep.subr.bf16.mxu1 %v2780_v40  ;;  %v7688_v40 = vld [vmem:[%s9608_s26 + $0x150] sm:$0xff]  }
 0xb21   :  { %v2827_v17 = vpop.f32.mrb[28].mxu1 }
 0xb22   :  { %v2829_v18 = vpop.f32.mrb[29].mxu1 }
 0xb23   :  { %v2831_v21 = vpop.f32.mrb[30].mxu1 }
 0xb24   :  { %v2868_v22 = vpack.c.bf16 %v2831_v21, %v2827_v17  ;;  %v2833_v23 = vpop.f32.mrb[31].mxu1  ;;  %v7700_v21 = vld [vmem:[%s9612_s6] sm:$0xff]   ;;  %s8446_s6 = smov [#allocation28]  }
 0xb25   :  { %v2869_v25 = vpack.c.bf16 %v2833_v23, %v2829_v18  ;;  %v7713_v23 = vld [vmem:[%s9614_s1 + $0x20] sm:$0xff]   ;;  %s5923_s13 = sshll.u32 %s8446_s6, 4  ;;  %s5924_s13 = int_to_ptr.vmem [resolvable:$true] %s5923_s13 }
 0xb26   :  { %p8325_p3 = scmp.lt.s32.totalorder %s5924_s13, %s5924_s13 }
 0xb27   :  { %3224 = vmatprep.mubr.bf16.mxu0 %v2869_v25  ;;  %v7714_v25 = vld [vmem:[%s9611_s9 + $0x38] sm:$0xff]  }
 0xb28   :  { %3225 = vmatmul.mubr.bf16.vlgmr.msra.gmra.mrb[28].mxu0 %v2868_v22  ;;  %v7712_v22 = vld [vmem:[%s9611_s9 + $0x30] sm:$0xff]  }
 0xb29   :  { %v2915_v27 = vpop.f32.mrb[32].mxu1  ;;  %7214 = vmatprep.mubr.msk.bf16.mxu0 %vm8445_vm2, %v8444_v53 }
 0xb2a   :  { %v2917_v29 = vpop.f32.mrb[33].mxu1 }
 0xb2b   :  { %v2919_v30 = vpop.f32.mrb[34].mxu1 }
 0xb2c   :  { %v2957_v32 = vpack.c.bf16 %v2919_v30, %v2915_v27  ;;  %v2921_v34 = vpop.f32.mrb[35].mxu1  ;;  %v7715_v27 = vld [vmem:[%s9614_s1 + $0x28] sm:$0xff]   ;;  %v7719_v30 = vld [vmem:[%s9614_s1 + $0x38] sm:$0xff]  }
 0xb2d   :  { %v2958_v35 = vpack.c.bf16 %v2921_v34, %v2917_v29  ;;  %v7717_v29 = vld [vmem:[%s9614_s1 + $0x30] sm:$0xff]  }
 0xb2f   :  { %3087 = vmatprep.mubr.bf16.mxu1 %v2958_v35 }
 0xb30   :  { %3088 = vmatmul.mubr.bf16.vlgmr.msra.gmra.mrb[36].mxu1 %v2957_v32 }
 0xb31   :  { %3245 = vmatpush1.bf16.msra.mxu1 %v9078_v39  ;;  %3276 = vmatprep.mubr.bf16.mxu1 %v8443_v26  ;;  %v7687_v39 = vld [vmem:[%s9608_s26 + $0x108] sm:$0xff]   ;;  %s9635_s26 = sld [smem:[#allocation80_spill]] }
 0xb32   :  { %3246 = vmatprep.subr.bf16.mxu1 %v9083_v60  ;;  %v7703_v60 = vld [vmem:[%s9611_s9 + $0x8] sm:$0xff]  }
 0xb35   :  { %3247 = vmatpush1.bf16.msra.mxu1 %v9081_v56  ;;  %v7702_v56 = vld [vmem:[%s9611_s9] sm:$0xff]  }
 0xb36   :  { %6833 = vmatprep.subr.bf16.mxu1 %v7684_v57  ;;  %7199 = vmatpush3.bf16.msra.mxu0 %v7702_v56  ;;  %v7718_v56 = vld [vmem:[%s9616_s30 + $0x8] sm:$0xff]  }
 0xb37   :  { %7200 = vmatprep.subr.bf16.mxu0 %v8444_v53 }
 0xb38   :  { %6326 = vmatmul.mubr.msk.bf16.vlgmr.msra.gmra.mrb[40].mxu1 %vm600_vm1, %v7683_v59  ;;  %v6375_v59 = vld [vmem:[%s9615_s21] ss:$0 sm:$0xff] }
 0xb39   :  { %6834 = vmatpush3.bf16.msra.mxu1 %v7685_v36 }
 0xb3a   :  { %6835 = vmatprep.subr.bf16.mxu1 %v7686_v38  ;;  %7201 = vmatpush3.bf16.msra.mxu0 %v7703_v60 }
 0xb3b   :  { %7202 = vmatprep.subr.bf16.mxu0 %v8444_v53 }
 0xb3d   :  { %6836 = vmatpush3.bf16.msra.mxu1 %v7687_v39 }
 0xb3e   :  { %6837 = vmatprep.subr.bf16.mxu1 %v7688_v40  ;;  %7203 = vmatpush3.bf16.msra.mxu0 %v7704_v61 }
 0xb3f   :  { %7204 = vmatprep.subr.bf16.mxu0 %v8444_v53 }
 0xb41   :  { %6838 = vmatpush3.bf16.msra.mxu1 %v7689_v41 }
 0xb42   :  { %6839 = vmatprep.subr.bf16.mxu1 %v7690_v42  ;;  %7205 = vmatpush3.bf16.msra.mxu0 %v7706_v62 }
 0xb43   :  { %7206 = vmatprep.subr.bf16.mxu0 %v8444_v53 }
 0xb45   :  { %6840 = vmatpush3.bf16.msra.mxu1 %v7691_v43 }
 0xb46   :  { %6841 = vmatprep.subr.bf16.mxu1 %v7692_v44  ;;  %7207 = vmatpush3.bf16.msra.mxu0 %v7708_v63 }
 0xb47   :  { %7208 = vmatprep.subr.bf16.mxu0 %v8444_v53 }
 0xb49   :  { %6842 = vmatpush3.bf16.msra.mxu1 %v7693_v45 }
 0xb4a   :  { %6843 = vmatprep.subr.bf16.mxu1 %v7694_v46 }
 0xb4d   :  { %6844 = vmatpush3.bf16.msra.mxu1 %v7695_v47 }
 0xb4e   :  { %6845 = vmatprep.subr.bf16.mxu1 %v7696_v48  ;;  %v7716_v48 = vld [vmem:[%s9616_s30] sm:$0xff]  }
 0xb51   :  { %6846 = vmatpush3.bf16.msra.mxu1 %v7697_v49 }
 0xb52   :  { %6847 = vmatprep.subr.bf16.mxu1 %v7698_v50 }
 0xb55   :  { %6848 = vmatpush3.bf16.msra.mxu1 %v7699_v51 }
 0xb56   :  { %7218 = vmatprep.subr.bf16.mxu1 %v8444_v53 }
 0xbfb   :  { %v6827_v2 = vpop.f32.mrb[28].mxu0 }
 0xbfc   :  { %v6828_v3 = vpop.f32.mrb[29].mxu0 }
 0xbfd   :  { %v6829_v4 = vadd.f32 %v6828_v3, %v6827_v2  ;;  %v6830_v5 = vpop.f32.mrb[30].mxu0  ;;  %v7720_v2 = vld [vmem:[%s9616_s30 + $0x10] sm:$0xff]  }
 0xbfe   :  { %v6831_v0 = vpop.f32.mrb[31].mxu0 }
 0xbff   :  { %v6832_v1 = vadd.f32 %v6831_v0, %v6830_v5  ;;  %v7722_v5 = vld [vmem:[%s9616_s30 + $0x20] sm:$0xff]   ;;  %v7723_v0 = vld [vmem:[%s9616_s30 + $0x28] sm:$0xff]  }
 0xc03   :  { %v6805_v7 = vpop.f32.mrb[36].mxu1 }
 0xc04   :  { %v6806_v8 = vpop.f32.mrb[37].mxu1 }
 0xc05   :  { %v6807_v6 = vadd.f32 %v6806_v8, %v6805_v7  ;;  %v6808_v54 = vpop.f32.mrb[38].mxu1  ;;  %v7725_v7 = vld [vmem:[%s9616_s30 + $0x38] sm:$0xff]   ;;  %v7728_v8 = vld [vmem:[%s9617_s2 + $0x4] ss:$8 sps:$4 sm:$0xff]  }
 0xc06   :  { %v6809_v9 = vpop.f32.mrb[39].mxu1 }
 0xc07   :  { %v9150_v10 = vadd.f32 %v6829_v4, %v6807_v6  ;;  %v6810_v55 = vadd.f32 %v6809_v9, %v6808_v54  ;;  %v7721_v4 = vld [vmem:[%s9616_s30 + $0x18] sm:$0xff]   ;;  %v7726_v6 = vld [vmem:[%s9617_s2] ss:$8 sps:$4 sm:$0xff]  }
 0xc08   :  { %v7731_v54 = vld [vmem:[%s9617_s2 + $0x14] ss:$8 sps:$4 sm:$0xff]   ;;  %v7729_v9 = vld [vmem:[%s9617_s2 + $0x10] ss:$8 sps:$4 sm:$0xff]  }
 0xc09   :  { %v9152_v11 = vadd.f32 %v6832_v1, %v6810_v55  ;;  %v7724_v1 = vld [vmem:[%s9616_s30 + $0x30] sm:$0xff]   ;;  %v7732_v55 = vld [vmem:[%s9617_s2 + $0x20] ss:$8 sps:$4 sm:$0xff]  }
 0xc0b   :  { %v3278_v12 = vpop.f32.mrb[40].mxu1 }
 0xc0c   :  { %v3280_v13 = vpop.f32.mrb[41].mxu1 }
 0xc0d   :  { %v3282_v14 = vpop.f32.mrb[42].mxu1 }
 0xc0e   :  { %v3320_v15 = vpack.c.bf16 %v3282_v14, %v3278_v12  ;;  %v3284_v17 = vpop.f32.mrb[43].mxu1  ;;  %v7737_v12 = vld [vmem:[%s9617_s2 + $0x34] ss:$8 sps:$4 sm:$0xff]   ;;  %v6376_v14 = vld [vmem:[%s9619_s7] ss:$0 sm:$0xff] }
 0xc0f   :  { %v3321_v18 = vpack.c.bf16 %v3284_v17, %v3280_v13  ;;  %v7740_v13 = vld [vmem:[%s9618_s27 + $0x4] ss:$8 sps:$4 sm:$0xff]   ;;  %v6427_v17 = vld [vmem:[%s9620_s10] ss:$0 sm:$0xff] }
 0xc11   :  { %3450 = vmatprep.mubr.bf16.mxu1 %v3321_v18 }
 0xc12   :  { %3451 = vmatmul.mubr.bf16.vlgmr.msra.gmra.mrb[44].mxu1 %v3320_v15 }
 0xc13   :  { %7219 = vmatpush3.bf16.msra.mxu1 %v3587_v37  ;;  %7222 = vmatprep.mubr.msk.bf16.mxu1 %vm8445_vm2, %v8444_v53  ;;  %v7711_v37 = vld [vmem:[%s9614_s1 + $0x18] sm:$0xff]  }
 0xc14   :  { %7220 = vmatprep.subr.bf16.mxu1 %v8444_v53 }
 0xc17   :  { %7221 = vmatpush3.bf16.msra.mxu1 %v3588_v33  ;;  %v7710_v33 = vld [vmem:[%s9611_s9 + $0x28] sm:$0xff]   ;;  %s9638_s9 = sld [smem:[#allocation86_spill]] }
 0xc18   :  { %7246 = vmatprep.subr.bf16.mxu1 %v8444_v53  ;;  %7209 = vmatpush3.bf16.msra.mxu0 %v7710_v33 }
 0xc19   :  { %7210 = vmatprep.subr.bf16.mxu0 %v8444_v53 }
 0xc1a   :  { %7223 = vmatmul.mubr.msk.bf16.vlgmr.msra.gmra.mrb[48].mxu1 %vm600_vm1, %v7700_v21 }
 0xc1b   :  { %7247 = vmatpush3.bf16.msra.mxu1 %v9055_v58  ;;  %7250 = vmatprep.mubr.msk.bf16.mxu1 %vm8445_vm2, %v8444_v53 }
 0xc1c   :  { %7248 = vmatprep.subr.bf16.mxu1 %v8444_v53  ;;  %7211 = vmatpush3.bf16.msra.mxu0 %v7712_v22 }
 0xc1d   :  { %7212 = vmatprep.subr.bf16.mxu0 %v8444_v53 }
 0xc1f   :  { %7249 = vmatpush3.bf16.msra.mxu1 %v9053_v52 }
 0xc20   :  { %7254 = vmatprep.subr.bf16.mxu1 %v8444_v53  ;;  %7213 = vmatpush3.bf16.msra.mxu0 %v7714_v25  ;;  %v6407_v25 = vld [vmem:[%s9622_s14] ss:$0 sm:$0xff] }
 0xc21   :  { %7226 = vmatprep.subr.bf16.mxu0 %v8444_v53 }
 0xc22   :  { %7251 = vmatmul.mubr.msk.bf16.vlgmr.msra.gmra.mrb[52].mxu1 %vm600_vm1, %v7701_v19  ;;  %v6428_v19 = vld [vmem:[%s9621_s11] ss:$0 sm:$0xff] }
 0xc23   :  { %7255 = vmatpush3.bf16.msra.mxu1 %v7705_v28  ;;  %7270 = vmatprep.mubr.msk.bf16.mxu1 %vm8445_vm2, %v8444_v53 }
 0xc24   :  { %7256 = vmatprep.subr.bf16.mxu1 %v8444_v53 }
 0xc27   :  { %7257 = vmatpush3.bf16.msra.mxu1 %v7707_v16 }
 0xc28   :  { %7258 = vmatprep.subr.bf16.mxu1 %v8444_v53 }
 0xc2b   :  { %7259 = vmatpush3.bf16.msra.mxu1 %v7709_v24 }
 0xc2c   :  { %7260 = vmatprep.subr.bf16.mxu1 %v8444_v53 }
 0xc2f   :  { %7261 = vmatpush3.bf16.msra.mxu1 %v7711_v37 }
 0xc30   :  { %7262 = vmatprep.subr.bf16.mxu1 %v8444_v53 }
 0xc33   :  { %7263 = vmatpush3.bf16.msra.mxu1 %v7713_v23 }
 0xc34   :  { %7264 = vmatprep.subr.bf16.mxu1 %v8444_v53 }
 0xc37   :  { %7265 = vmatpush3.bf16.msra.mxu1 %v7715_v27 }
 0xc38   :  { %7266 = vmatprep.subr.bf16.mxu1 %v8444_v53 }
 0xc3b   :  { %7267 = vmatpush3.bf16.msra.mxu1 %v7717_v29 }
 0xc3c   :  { %7268 = vmatprep.subr.bf16.mxu1 %v8444_v53 }
 0xc3f   :  { %7269 = vmatpush3.bf16.msra.mxu1 %v7719_v30  ;;  %v6408_v30 = vld [vmem:[%s9623_s3] ss:$0 sm:$0xff] }
 0xce5   :  { %v6849_v32 = vpop.f32.mrb[44].mxu1 }
 0xce6   :  { %v6850_v34 = vpop.f32.mrb[45].mxu1 }
 0xce7   :  { %v6851_v35 = vadd.f32 %v6850_v34, %v6849_v32  ;;  %v6852_v57 = vpop.f32.mrb[46].mxu1 }
 0xce8   :  { %v6853_v36 = vpop.f32.mrb[47].mxu1 }
 0xce9   :  { %v3459_v38 = vadd.f32 %v6851_v35, %v9150_v10  ;;  %v6854_v39 = vadd.f32 %v6853_v36, %v6852_v57  ;;  %v7734_v10 = vld [vmem:[%s9617_s2 + $0x24] ss:$8 sps:$4 sm:$0xff]  }
 0xceb   :  { %v3468_v40 = vadd.f32 %v6375_v59, %v3459_v38  ;;  %v3460_v41 = vadd.f32 %v6854_v39, %v9152_v11  ;;  %v7735_v11 = vld [vmem:[%s9617_s2 + $0x30] ss:$8 sps:$4 sm:$0xff]  }
 0xced   :  { %v3469_v42 = vadd.f32 %v6375_v59, %v3460_v41  ;;  %v3631_v43 = vpop.f32.mrb[48].mxu1  ;;  %v3470_v45 = vmax.f32 %v3468_v40, 0.0 }
 0xcee   :  { %v7224_v44 = vpop.f32.mrb[49].mxu1 }
 0xcef   :  { %v3471_v46 = vmax.f32 %v3469_v42, 0.0  ;;  %v3634_v47 = vpop.f32.mrb[50].mxu1  ;;  %v7738_v44 = vld [vmem:[%s9618_s27] ss:$8 sps:$4 sm:$0xff]  }
 0xcf0   :  { %v3654_v49 = vpack.c.bf16 %v3634_v47, %v3631_v43  ;;  %v7225_v50 = vpop.f32.mrb[51].mxu1  ;;  %v7741_v47 = vld [vmem:[%s9618_s27 + $0x10] ss:$8 sps:$4 sm:$0xff]  }
 0xcf1   :  { %v3488_v51 = vpack.c.bf16 %v3471_v46, %v3470_v45  ;;  %v7743_v46 = vld [vmem:[%s9618_s27 + $0x14] ss:$8 sps:$4 sm:$0xff]  }
 0xcf2   :  { %v7749_v50 = vld [vmem:[%s9618_s27 + $0x34] ss:$8 sps:$4 sm:$0xff]  }
 0xcf3   :  { %7215 = vmatmul.mubr.bf16.vlgmr.msra.gmra.mrb[32].mxu0 %v3488_v51  ;;  %v7747_v51 = vld [vmem:[%s9618_s27 + $0x30] ss:$8 sps:$4 sm:$0xff]  }
 0xcf4   :  { %7227 = vmatpush3.bf16.msra.mxu0 %v7716_v48  ;;  %7242 = vmatprep.mubr.msk.bf16.mxu0 %vm8445_vm2, %v8444_v53  ;;  %v7746_v48 = vld [vmem:[%s9618_s27 + $0x24] ss:$8 sps:$4 sm:$0xff]  }
 0xcf5   :  { %7228 = vmatprep.subr.bf16.mxu0 %v8444_v53  ;;  %v3819_v60 = vpop.f32.mrb[52].mxu1 }
 0xcf6   :  { %v7252_v61 = vpop.f32.mrb[53].mxu1 }
 0xcf7   :  { %v3822_v62 = vpop.f32.mrb[54].mxu1 }
 0xcf8   :  { %7229 = vmatpush3.bf16.msra.mxu0 %v7718_v56  ;;  %v3842_v63 = vpack.c.bf16 %v3822_v62, %v3819_v60  ;;  %v7253_v3 = vpop.f32.mrb[55].mxu1  ;;  %v7752_v56 = vld [vmem:[%s9624_s15 + $0x4] ss:$8 sps:$4 sm:$0xff]   ;;  %v6395_v60 = vld [vmem:[%s9625_s4] ss:$0 sm:$0xff] }
 0xcf9   :  { %7230 = vmatprep.subr.bf16.mxu0 %v8444_v53  ;;  %v6396_v62 = vld [vmem:[%s9626_s24] ss:$0 sm:$0xff] }
 0xcfa   :  { %7271 = vmatmul.mubr.bf16.vlgmr.msra.gmra.mrb[56].mxu1 %v3842_v63 }
 0xcfb   :  { %4362 = vmatprep.mubr.bf16.mxu1 %v8443_v26 }
 0xcfc   :  { %7231 = vmatpush3.bf16.msra.mxu0 %v7720_v2 }
 0xcfd   :  { %7232 = vmatprep.subr.bf16.mxu0 %v8444_v53 }
 0xd00   :  { %7233 = vmatpush3.bf16.msra.mxu0 %v7721_v4 }
 0xd01   :  { %7234 = vmatprep.subr.bf16.mxu0 %v8444_v53 }
 0xd04   :  { %7235 = vmatpush3.bf16.msra.mxu0 %v7722_v5 }
 0xd05   :  { %7236 = vmatprep.subr.bf16.mxu0 %v8444_v53 }
 0xd08   :  { %7237 = vmatpush3.bf16.msra.mxu0 %v7723_v0 }
 0xd09   :  { %7238 = vmatprep.subr.bf16.mxu0 %v8444_v53 }
 0xd0c   :  { %7239 = vmatpush3.bf16.msra.mxu0 %v7724_v1 }
 0xd0d   :  { %7240 = vmatprep.subr.bf16.mxu0 %v8444_v53 }
 0xd10   :  { %7241 = vmatpush3.bf16.msra.mxu0 %v7725_v7 }
 0xd11   :  { %4004 = vmatprep.subr.bf16.mxu0 %v7728_v8 }
 0xd13   :  { %7243 = vmatmul.mubr.bf16.vlgmr.msra.gmra.mrb[36].mxu0 %v3654_v49  ;;  %v7744_v49 = vld [vmem:[%s9618_s27 + $0x20] ss:$8 sps:$4 sm:$0xff]  }
 0xd14   :  { %4036 = vmatprep.mubr.bf16.mxu0 %v8443_v26  ;;  %4005 = vmatpush1.bf16.msra.mxu0 %v7726_v6  ;;  %v7750_v6 = vld [vmem:[%s9624_s15] ss:$8 sps:$4 sm:$0xff]  }
 0xd15   :  { %4006 = vmatprep.subr.bf16.mxu0 %v7731_v54 }
 0xd18   :  { %4007 = vmatpush1.bf16.msra.mxu0 %v7729_v9  ;;  %v7755_v9 = vld [vmem:[%s9624_s15 + $0x14] ss:$8 sps:$4 sm:$0xff]  }
 0xd19   :  { %4008 = vmatprep.subr.bf16.mxu0 %v7734_v10  ;;  %v7753_v10 = vld [vmem:[%s9624_s15 + $0x10] ss:$8 sps:$4 sm:$0xff]  }
 0xd1c   :  { %4009 = vmatpush1.bf16.msra.mxu0 %v7732_v55  ;;  %v7758_v55 = vld [vmem:[%s9624_s15 + $0x24] ss:$8 sps:$4 sm:$0xff]  }
 0xd1d   :  { %4010 = vmatprep.subr.bf16.mxu0 %v7737_v12  ;;  %v7761_v12 = vld [vmem:[%s9624_s15 + $0x34] ss:$8 sps:$4 sm:$0xff]  }
 0xd20   :  { %4011 = vmatpush1.bf16.msra.mxu0 %v7735_v11  ;;  %v7756_v11 = vld [vmem:[%s9624_s15 + $0x20] ss:$8 sps:$4 sm:$0xff]  }
 0xd21   :  { %4090 = vmatprep.subr.bf16.mxu0 %v7740_v13  ;;  %v7759_v13 = vld [vmem:[%s9624_s15 + $0x30] ss:$8 sps:$4 sm:$0xff]  }
 0xdc6   :  { %v3578_v15 = vpop.f32.mrb[32].mxu0 }
 0xdc7   :  { %v9230_v18 = vadd.f32 %v6376_v14, %v3578_v15  ;;  %v7216_v21 = vpop.f32.mrb[33].mxu0  ;;  %v7762_v15 = vld [vmem:[%s9624_s15 + $0x40] ss:$8 sps:$4 sm:$0xff]  }
 0xdc8   :  { %v3581_v28 = vpop.f32.mrb[34].mxu0  ;;  %v7765_v21 = vld [vmem:[%s9624_s15 + $0x50] ss:$8 sps:$4 sm:$0xff]  }
 0xdc9   :  { %v4140_v16 = vmul.f32 %v6427_v17, %v9230_v18  ;;  %v9234_v24 = vadd.f32 %v6376_v14, %v3581_v28  ;;  %v7217_v33 = vpop.f32.mrb[35].mxu0  ;;  %v7764_v14 = vld [vmem:[%s9624_s15 + $0x44] ss:$8 sps:$4 sm:$0xff]   ;;  %v7768_v28 = vld [vmem:[%s9624_s15 + $0x60] ss:$8 sps:$4 sm:$0xff]  }
 0xdca   :  { %v7771_v33 = vld [vmem:[%s9624_s15 + $0x70] ss:$8 sps:$4 sm:$0xff]  }
 0xdcb   :  { %v4149_v37 = vadd.f32 %v6428_v19, %v4140_v16  ;;  %v4141_v22 = vmul.f32 %v6427_v17, %v9234_v24  ;;  %v5458_v23 = vpack.c.bf16 %v9234_v24, %v9230_v18  ;;  %v7767_v17 = vld [vmem:[%s9624_s15 + $0x54] ss:$8 sps:$4 sm:$0xff]  }
 0xdcc   :  { %v7773_v16 = vld [vmem:[%s9624_s15 + $0x74] ss:$8 sps:$4 sm:$0xff]  }
 0xdcd   :  { %v4150_v27 = vadd.f32 %v6428_v19, %v4141_v22  ;;  %v3925_v29 = vpop.f32.mrb[56].mxu1  ;;  %v4151_v35 = vmax.f32 %v4149_v37, 0.0  ;;  %v7770_v19 = vld [vmem:[%s9624_s15 + $0x64] ss:$8 sps:$4 sm:$0xff]   ;;  %v4297_v37 = vld [vmem:[%s9627_s0] sm:$0x3] }
 0xdce   :  { %v3939_v32 = vmul.f32 %v6407_v25, %v3925_v29  ;;  %v7272_v34 = vpop.f32.mrb[57].mxu1  ;;  %v4302_v22 = vrot.slane %v4297_v37, %v9071_v31  ;;  %v7939_v18 = vld [vmem:[%s9634_s23 + $0x10] sm:$0xff]   ;;  %v7940_v24 = vld [vmem:[%s9634_s23 + $0x18] sm:$0xff]  }
 0xdcf   :  { %v4152_v57 = vmax.f32 %v4150_v27, 0.0  ;;  %v3928_v59 = vpop.f32.mrb[58].mxu1 }
 0xdd0   :  { %v3948_v36 = vadd.f32 %v6408_v30, %v3939_v32  ;;  %v3940_v38 = vmul.f32 %v6407_v25, %v3928_v59  ;;  %v7273_v39 = vpop.f32.mrb[59].mxu1  ;;  %v4306_v25 = vrot.slane %v4297_v37, %v9074_v20 }
 0xdd1   :  { %v9241_v40 = vpack.c.bf16 %v4152_v57, %v4151_v35 }
 0xdd2   :  { %v3950_v41 = vmax.f32 %v3948_v36, 0.0  ;;  %v3949_v42 = vadd.f32 %v6408_v30, %v3940_v38 }
 0xdd4   :  { %v3951_v43 = vmax.f32 %v3949_v42, 0.0 }
 0xdd6   :  { %v3960_v45 = vpack.c.bf16 %v3951_v43, %v3950_v41  ;;  %v7774_v43 = vld [vmem:[%s9628_s16] sm:$0xff]  }
 0xdd8   :  { %6417 = vmatmul.mubr.msk.bf16.vlgmr.msra.gmra.mrb[40].mxu0 %vm524_vm0, %v3960_v45  ;;  %v7779_v45 = vld [vmem:[%s9629_s19 + $0x104] ss:$8 sps:$4 sm:$0xff]  }
 0xdd9   :  { %4091 = vmatpush1.bf16.msra.mxu0 %v7738_v44  ;;  %4122 = vmatprep.mubr.bf16.mxu0 %v8443_v26  ;;  %v7776_v44 = vld [vmem:[%s9628_s16 + $0x10] sm:$0xff]  }
 0xdda   :  { %4092 = vmatprep.subr.bf16.mxu0 %v7743_v46  ;;  %v7775_v46 = vld [vmem:[%s9628_s16 + $0x8] sm:$0xff]  }
 0xddd   :  { %4093 = vmatpush1.bf16.msra.mxu0 %v7741_v47  ;;  %v7777_v47 = vld [vmem:[%s9629_s19 + $0x100] ss:$8 sps:$4 sm:$0xff]  }
 0xdde   :  { %4094 = vmatprep.subr.bf16.mxu0 %v7746_v48  ;;  %v7782_v48 = vld [vmem:[%s9629_s19 + $0x114] ss:$8 sps:$4 sm:$0xff]  }
 0xde1   :  { %4095 = vmatpush1.bf16.msra.mxu0 %v7744_v49  ;;  %v7780_v49 = vld [vmem:[%s9629_s19 + $0x110] ss:$8 sps:$4 sm:$0xff]  }
 0xde2   :  { %4096 = vmatprep.subr.bf16.mxu0 %v7749_v50  ;;  %v7785_v50 = vld [vmem:[%s9629_s19 + $0x124] ss:$8 sps:$4 sm:$0xff]  }
 0xde5   :  { %4097 = vmatpush1.bf16.msra.mxu0 %v7747_v51  ;;  %v7783_v51 = vld [vmem:[%s9629_s19 + $0x120] ss:$8 sps:$4 sm:$0xff]  }
 0xde6   :  { %v3737_v61 = vpop.f32.mrb[36].mxu0  ;;  %4250 = vmatprep.subr.bf16.mxu0 %v7752_v56  ;;  %v7786_v56 = vld [vmem:[%s9629_s19 + $0x130] ss:$8 sps:$4 sm:$0xff]  }
 0xde7   :  { %v3751_v63 = vmul.f32 %v6395_v60, %v3737_v61  ;;  %v7244_v2 = vpop.f32.mrb[37].mxu0  ;;  %v7789_v61 = vld [vmem:[%s9629_s19 + $0x140] ss:$8 sps:$4 sm:$0xff]  }
 0xde8   :  { %v3740_v3 = vpop.f32.mrb[38].mxu0  ;;  %v7797_v2 = vld [vmem:[%s9629_s19 + $0x164] ss:$8 sps:$4 sm:$0xff]  }
 0xde9   :  { %v3760_v4 = vadd.f32 %v6396_v62, %v3751_v63  ;;  %v3752_v5 = vmul.f32 %v6395_v60, %v3740_v3  ;;  %v7245_v0 = vpop.f32.mrb[39].mxu0  ;;  %v7791_v60 = vld [vmem:[%s9629_s19 + $0x144] ss:$8 sps:$4 sm:$0xff]   ;;  %v7792_v63 = vld [vmem:[%s9629_s19 + $0x150] ss:$8 sps:$4 sm:$0xff]  }
 0xdea   :  { %v7795_v3 = vld [vmem:[%s9629_s19 + $0x160] ss:$8 sps:$4 sm:$0xff]   ;;  %v7803_v0 = vld [vmem:[%s9629_s19 + $0x184] ss:$8 sps:$4 sm:$0xff]  }
 0xdeb   :  { %v3761_v1 = vadd.f32 %v6396_v62, %v3752_v5  ;;  %v3762_v7 = vmax.f32 %v3760_v4, 0.0  ;;  %v7794_v62 = vld [vmem:[%s9629_s19 + $0x154] ss:$8 sps:$4 sm:$0xff]   ;;  %v7798_v5 = vld [vmem:[%s9629_s19 + $0x170] ss:$8 sps:$4 sm:$0xff]  }
 0xdec   :  { %v7800_v4 = vld [vmem:[%s9629_s19 + $0x174] ss:$8 sps:$4 sm:$0xff]  }
 0xded   :  { %v3763_v8 = vmax.f32 %v3761_v1, 0.0  ;;  %v7801_v1 = vld [vmem:[%s9629_s19 + $0x180] ss:$8 sps:$4 sm:$0xff]  }
 0xdef   :  { %v3772_v54 = vpack.c.bf16 %v3763_v8, %v3762_v7  ;;  %v7806_v7 = vld [vmem:[%s9629_s19 + $0x194] ss:$8 sps:$4 sm:$0xff]   ;;  %v7804_v8 = vld [vmem:[%s9629_s19 + $0x190] ss:$8 sps:$4 sm:$0xff]  }
 0xdf1   :  { %6426 = vmatmul.mubr.msk.bf16.vlgmr.msra.gmra.mrb[40].mxu0 %vm524_vm0, %v3772_v54  ;;  %v7807_v54 = vld [vmem:[%s9629_s19 + $0x1a0] ss:$8 sps:$4 sm:$0xff]  }
 0xdf2   :  { %4251 = vmatpush1.bf16.msra.mxu0 %v7750_v6  ;;  %4282 = vmatprep.mubr.bf16.mxu0 %v8443_v26  ;;  %v7809_v6 = vld [vmem:[%s9629_s19 + $0x1a4] ss:$8 sps:$4 sm:$0xff]  }
 0xdf3   :  { %4252 = vmatprep.subr.bf16.mxu0 %v7755_v9  ;;  %v7812_v9 = vld [vmem:[%s9629_s19 + $0x1b4] ss:$8 sps:$4 sm:$0xff]  }
 0xdf6   :  { %4253 = vmatpush1.bf16.msra.mxu0 %v7753_v10  ;;  %v7810_v10 = vld [vmem:[%s9629_s19 + $0x1b0] ss:$8 sps:$4 sm:$0xff]  }
 0xdf7   :  { %4254 = vmatprep.subr.bf16.mxu0 %v7758_v55  ;;  %v7815_v55 = vld [vmem:[%s9629_s19 + $0x1c4] ss:$8 sps:$4 sm:$0xff]  }
 0xdfa   :  { %4255 = vmatpush1.bf16.msra.mxu0 %v7756_v11  ;;  %v7813_v11 = vld [vmem:[%s9629_s19 + $0x1c0] ss:$8 sps:$4 sm:$0xff]  }
 0xdfb   :  { %4256 = vmatprep.subr.bf16.mxu0 %v7761_v12  ;;  %v7818_v12 = vld [vmem:[%s9629_s19 + $0x1d4] ss:$8 sps:$4 sm:$0xff]  }
 0xdfe   :  { %4257 = vmatpush1.bf16.msra.mxu0 %v7759_v13  ;;  %v7816_v13 = vld [vmem:[%s9629_s19 + $0x1d0] ss:$8 sps:$4 sm:$0xff]  }
 0xdff   :  { %4258 = vmatprep.subr.bf16.mxu0 %v7764_v14  ;;  %v7819_v14 = vld [vmem:[%s9629_s19 + $0x1e0] ss:$8 sps:$4 sm:$0xff]  }
 0xe02   :  { %4259 = vmatpush1.bf16.msra.mxu0 %v7762_v15  ;;  %v7821_v15 = vld [vmem:[%s9629_s19 + $0x1e4] ss:$8 sps:$4 sm:$0xff]  }
 0xe03   :  { %4260 = vmatprep.subr.bf16.mxu0 %v7767_v17  ;;  %v7824_v17 = vld [vmem:[%s9629_s19 + $0x1f4] ss:$8 sps:$4 sm:$0xff]  }
 0xe06   :  { %4261 = vmatpush1.bf16.msra.mxu0 %v7765_v21  ;;  %v7822_v21 = vld [vmem:[%s9629_s19 + $0x1f0] ss:$8 sps:$4 sm:$0xff]  }
 0xe07   :  { %4262 = vmatprep.subr.bf16.mxu0 %v7770_v19  ;;  %v7827_v19 = vld [vmem:[%s9629_s19 + $0x4] ss:$8 sps:$4 sm:$0xff]  }
 0xe0a   :  { %4263 = vmatpush1.bf16.msra.mxu0 %v7768_v28 }
 0xe0b   :  { %4264 = vmatprep.subr.bf16.mxu0 %v7773_v16 }
 0xe0e   :  { %4265 = vmatpush1.bf16.msra.mxu0 %v7771_v33 }
 0xe11   :  { %4283 = vmatmul.mubr.bf16.vlgmr.msra.gmra.mrb[40].mxu0 %v9241_v40 }
 0xe12   :  { %4945 = vmatprep.mubr.bf16.mxu0 %v8443_v26 }
 0xee4   :  { %v4284_v27 = vpop.f32.mrb[40].mxu0 }
 0xee5   :  { %v4309_v29 = vadd.f32 %v4302_v22, %v4284_v27  ;;  %v4286_v30 = vpop.f32.mrb[41].mxu0 }
 0xee6   :  { %v4310_v32 = vadd.f32 %v4306_v25, %v4286_v30  ;;  %v4288_v34 = vpop.f32.mrb[42].mxu0 }
 0xee7   :  { %v4311_v35 = vadd.f32 %v4302_v22, %v4288_v34  ;;  %v4290_v57 = vpop.f32.mrb[43].mxu0  ;;  %v4313_v36 = vmax.f32 %v4309_v29, 0.0 }
 0xee8   :  { %v4312_v59 = vadd.f32 %v4306_v25, %v4290_v57  ;;  %v4314_v39 = vmax.f32 %v4310_v32, 0.0 }
 0xee9   :  { %v4315_v38 = vmax.f32 %v4311_v35, 0.0 }
 0xeea   :  { %v4316_v40 = vmax.f32 %v4312_v59, 0.0 }
 0xeeb   :  { %v4317_v41 = vpack.c.bf16 %v4315_v38, %v4313_v36 }
 0xeec   :  { %v4318_v42 = vpack.c.bf16 %v4316_v40, %v4314_v39 }
 0xeee   :  { %4330 = vmatprep.subr.bf16.mxu1 %v4318_v42  ;;  %4913 = vmatprep.subr.bf16.mxu0 %v4318_v42 }
 0xeef   :  { %4331 = vmatpush1.bf16.msra.mxu1 %v4317_v41  ;;  %4914 = vmatpush1.bf16.msra.mxu0 %v4317_v41 }
 0xef0   :  { %4418 = vmatprep.subr.bf16.mxu1 %v4318_v42  ;;  %v7830_v42 = vld [vmem:[%s9629_s19 + $0x14] ss:$8 sps:$4 sm:$0xff]  }
 0xef2   :  { %6446 = vmatmul.mubr.msk.bf16.vlgmr.msra.gmra.mrb[60].mxu1 %vm4326_vm3, %v7774_v43  ;;  %6550 = vmatmul.mubr.msk.bf16.vlgmr.msra.gmra.mrb[44].mxu0 %vm4326_vm3, %v7776_v44  ;;  %v7921_v43 = vld [vmem:[%s9630_s29 + $0x40] sm:$0xff]  }
 0xef3   :  { %4419 = vmatpush1.bf16.msra.mxu1 %v4317_v41  ;;  %4450 = vmatprep.mubr.bf16.mxu1 %v8443_v26  ;;  %v7788_v26 = vld [vmem:[%s9629_s19 + $0x134] ss:$8 sps:$4 sm:$0xff]   ;;  %v7825_v41 = vld [vmem:[%s9629_s19] ss:$8 sps:$4 sm:$0xff]  }
 0xef4   :  { %4656 = vmatprep.subr.bf16.mxu1 %v7779_v45  ;;  %v7922_v44 = vld [vmem:[%s9630_s29] sm:$0xff]   ;;  %v7923_v45 = vld [vmem:[%s9630_s29 + $0x48] sm:$0xff]   ;;  %6888 = vmatprep.subr.bf16.mxu0 %v7921_v43  ;;  %v7884_v43 = vld [vmem:[%s9629_s19 + $0x234] ss:$8 sps:$4 sm:$0xff]  }
 0xef5   :  { %6889 = vmatpush3.bf16.msra.mxu0 %v7922_v44  ;;  %v7891_v44 = vld [vmem:[%s9629_s19 + $0x260] ss:$8 sps:$4 sm:$0xff]  }
 0xef6   :  { %6890 = vmatprep.subr.bf16.mxu0 %v7923_v45  ;;  %v7896_v45 = vld [vmem:[%s9629_s19 + $0x274] ss:$8 sps:$4 sm:$0xff]  }
 0xefa   :  { %6450 = vmatmul.mubr.msk.bf16.vlgmr.msra.gmra.mrb[64].mxu1 %vm4326_vm3, %v7775_v46  ;;  %v7828_v46 = vld [vmem:[%s9629_s19 + $0x10] ss:$8 sps:$4 sm:$0xff]  }
 0xefb   :  { %4657 = vmatpush1.bf16.msra.mxu1 %v7777_v47  ;;  %v7833_v47 = vld [vmem:[%s9629_s19 + $0x24] ss:$8 sps:$4 sm:$0xff]  }
 0xefc   :  { %4658 = vmatprep.subr.bf16.mxu1 %v7782_v48  ;;  %v7924_v48 = vld [vmem:[%s9630_s29 + $0x8] sm:$0xff]  }
 0xefd   :  { %6891 = vmatpush3.bf16.msra.mxu0 %v7924_v48  ;;  %v7897_v48 = vld [vmem:[%s9629_s19 + $0x280] ss:$8 sps:$4 sm:$0xff]  }
 0xeff   :  { %4659 = vmatpush1.bf16.msra.mxu1 %v7780_v49  ;;  %v7925_v49 = vld [vmem:[%s9630_s29 + $0x50] sm:$0xff]  }
 0xf00   :  { %4660 = vmatprep.subr.bf16.mxu1 %v7785_v50  ;;  %v7831_v50 = vld [vmem:[%s9629_s19 + $0x20] ss:$8 sps:$4 sm:$0xff]   ;;  %6892 = vmatprep.subr.bf16.mxu0 %v7925_v49  ;;  %v7902_v49 = vld [vmem:[%s9629_s19 + $0x294] ss:$8 sps:$4 sm:$0xff]  }
 0xf03   :  { %4661 = vmatpush1.bf16.msra.mxu1 %v7783_v51  ;;  %v7836_v51 = vld [vmem:[%s9629_s19 + $0x34] ss:$8 sps:$4 sm:$0xff]  }
 0xf04   :  { %4662 = vmatprep.subr.bf16.mxu1 %v7788_v26  ;;  %v7926_v26 = vld [vmem:[%s9630_s29 + $0x10] sm:$0xff]  }
 0xf05   :  { %6893 = vmatpush3.bf16.msra.mxu0 %v7926_v26  ;;  %v7903_v26 = vld [vmem:[%s9629_s19 + $0x2a0] ss:$8 sps:$4 sm:$0xff]  }
 0xf07   :  { %4663 = vmatpush1.bf16.msra.mxu1 %v7786_v56  ;;  %v7927_v56 = vld [vmem:[%s9630_s29 + $0x58] sm:$0xff]  }
 0xf08   :  { %4664 = vmatprep.subr.bf16.mxu1 %v7791_v60  ;;  %v7834_v60 = vld [vmem:[%s9629_s19 + $0x30] ss:$8 sps:$4 sm:$0xff]   ;;  %6894 = vmatprep.subr.bf16.mxu0 %v7927_v56  ;;  %v7908_v56 = vld [vmem:[%s9629_s19 + $0x2b4] ss:$8 sps:$4 sm:$0xff]  }
 0xf0b   :  { %4665 = vmatpush1.bf16.msra.mxu1 %v7789_v61  ;;  %v7839_v61 = vld [vmem:[%s9629_s19 + $0x44] ss:$8 sps:$4 sm:$0xff]  }
 0xf0c   :  { %4666 = vmatprep.subr.bf16.mxu1 %v7794_v62  ;;  %v7928_v62 = vld [vmem:[%s9630_s29 + $0x18] sm:$0xff]  }
 0xf0d   :  { %6895 = vmatpush3.bf16.msra.mxu0 %v7928_v62  ;;  %v7909_v62 = vld [vmem:[%s9629_s19 + $0x2c0] ss:$8 sps:$4 sm:$0xff]  }
 0xf0f   :  { %4667 = vmatpush1.bf16.msra.mxu1 %v7792_v63  ;;  %v7929_v63 = vld [vmem:[%s9630_s29 + $0x60] sm:$0xff]  }
 0xf10   :  { %4668 = vmatprep.subr.bf16.mxu1 %v7797_v2  ;;  %v7837_v2 = vld [vmem:[%s9629_s19 + $0x40] ss:$8 sps:$4 sm:$0xff]   ;;  %6896 = vmatprep.subr.bf16.mxu0 %v7929_v63  ;;  %v7914_v63 = vld [vmem:[%s9629_s19 + $0x2d4] ss:$8 sps:$4 sm:$0xff]  }
 0xf13   :  { %4669 = vmatpush1.bf16.msra.mxu1 %v7795_v3  ;;  %v7842_v3 = vld [vmem:[%s9629_s19 + $0x54] ss:$8 sps:$4 sm:$0xff]  }
 0xf14   :  { %4670 = vmatprep.subr.bf16.mxu1 %v7800_v4  ;;  %v7930_v4 = vld [vmem:[%s9630_s29 + $0x20] sm:$0xff]  }
 0xf15   :  { %6897 = vmatpush3.bf16.msra.mxu0 %v7930_v4  ;;  %v7915_v4 = vld [vmem:[%s9629_s19 + $0x2e0] ss:$8 sps:$4 sm:$0xff]  }
 0xf17   :  { %4671 = vmatpush1.bf16.msra.mxu1 %v7798_v5  ;;  %v7931_v5 = vld [vmem:[%s9630_s29 + $0x68] sm:$0xff]  }
 0xf18   :  { %4672 = vmatprep.subr.bf16.mxu1 %v7803_v0  ;;  %v7840_v0 = vld [vmem:[%s9629_s19 + $0x50] ss:$8 sps:$4 sm:$0xff]   ;;  %6898 = vmatprep.subr.bf16.mxu0 %v7931_v5  ;;  %v7920_v5 = vld [vmem:[%s9629_s19 + $0x2f4] ss:$8 sps:$4 sm:$0xff]  }
 0xf1b   :  { %4673 = vmatpush1.bf16.msra.mxu1 %v7801_v1  ;;  %v7845_v1 = vld [vmem:[%s9629_s19 + $0x64] ss:$8 sps:$4 sm:$0xff]  }
 0xf1c   :  { %4674 = vmatprep.subr.bf16.mxu1 %v7806_v7  ;;  %v7932_v7 = vld [vmem:[%s9630_s29 + $0x28] sm:$0xff]  }
 0xf1d   :  { %6899 = vmatpush3.bf16.msra.mxu0 %v7932_v7  ;;  %v7934_v7 = vld [vmem:[%s9630_s29 + $0x30] sm:$0xff]  }
 0xf1f   :  { %4675 = vmatpush1.bf16.msra.mxu1 %v7804_v8  ;;  %v7843_v8 = vld [vmem:[%s9629_s19 + $0x60] ss:$8 sps:$4 sm:$0xff]  }
 0xf20   :  { %4676 = vmatprep.subr.bf16.mxu1 %v7809_v6  ;;  %v7848_v6 = vld [vmem:[%s9629_s19 + $0x74] ss:$8 sps:$4 sm:$0xff]  }
 0xf23   :  { %4677 = vmatpush1.bf16.msra.mxu1 %v7807_v54  ;;  %v7846_v54 = vld [vmem:[%s9629_s19 + $0x70] ss:$8 sps:$4 sm:$0xff]  }
 0xf24   :  { %4678 = vmatprep.subr.bf16.mxu1 %v7812_v9  ;;  %v7851_v9 = vld [vmem:[%s9629_s19 + $0x84] ss:$8 sps:$4 sm:$0xff]  }
 0xf27   :  { %4679 = vmatpush1.bf16.msra.mxu1 %v7810_v10  ;;  %v7849_v10 = vld [vmem:[%s9629_s19 + $0x80] ss:$8 sps:$4 sm:$0xff]  }
 0xf28   :  { %4680 = vmatprep.subr.bf16.mxu1 %v7815_v55  ;;  %v7854_v55 = vld [vmem:[%s9629_s19 + $0x94] ss:$8 sps:$4 sm:$0xff]  }
 0xf2b   :  { %4681 = vmatpush1.bf16.msra.mxu1 %v7813_v11  ;;  %v7852_v11 = vld [vmem:[%s9629_s19 + $0x90] ss:$8 sps:$4 sm:$0xff]  }
 0xf2c   :  { %4682 = vmatprep.subr.bf16.mxu1 %v7818_v12  ;;  %v7857_v12 = vld [vmem:[%s9629_s19 + $0xa4] ss:$8 sps:$4 sm:$0xff]  }
 0xf2f   :  { %4683 = vmatpush1.bf16.msra.mxu1 %v7816_v13  ;;  %v7855_v13 = vld [vmem:[%s9629_s19 + $0xa0] ss:$8 sps:$4 sm:$0xff]  }
 0xf30   :  { %4684 = vmatprep.subr.bf16.mxu1 %v7821_v15  ;;  %v7858_v15 = vld [vmem:[%s9629_s19 + $0xb0] ss:$8 sps:$4 sm:$0xff]  }
 0xf33   :  { %4685 = vmatpush1.bf16.msra.mxu1 %v7819_v14  ;;  %v7860_v14 = vld [vmem:[%s9629_s19 + $0xb4] ss:$8 sps:$4 sm:$0xff]  }
 0xf34   :  { %4686 = vmatprep.subr.bf16.mxu1 %v7824_v17  ;;  %v7863_v17 = vld [vmem:[%s9629_s19 + $0xc4] ss:$8 sps:$4 sm:$0xff]  }
 0xf37   :  { %4687 = vmatpush1.bf16.msra.mxu1 %v7822_v21  ;;  %v7861_v21 = vld [vmem:[%s9629_s19 + $0xc0] ss:$8 sps:$4 sm:$0xff]  }
 0xf38   :  { %4859 = vmatprep.subr.bf16.mxu1 %v7827_v19  ;;  %v7866_v19 = vld [vmem:[%s9629_s19 + $0xd4] ss:$8 sps:$4 sm:$0xff]  }
 0xfc5   :  { %v9317_v28 = vpop.f32.mrb[60].mxu1  ;;  %v9323_v27 = vpop.f32.mrb[44].mxu0 }
 0xfc6   :  { %v4366_v16 = vpop.f32.mrb[61].mxu1  ;;  %v9325_v29 = vpop.f32.mrb[45].mxu0 }
 0xfc7   :  { %v9319_v33 = vpop.f32.mrb[62].mxu1  ;;  %v9327_v30 = vpop.f32.mrb[46].mxu0 }
 0xfc8   :  { %v4405_v37 = vpack.c.bf16 %v9319_v33, %v9317_v28  ;;  %v4370_v22 = vpop.f32.mrb[63].mxu1  ;;  %v4989_v34 = vpack.c.bf16 %v9327_v30, %v9323_v27  ;;  %v9331_v35 = vpop.f32.mrb[47].mxu0  ;;  %v7882_v28 = vld [vmem:[%s9629_s19 + $0x230] ss:$8 sps:$4 sm:$0xff]   ;;  %v7887_v33 = vld [vmem:[%s9629_s19 + $0x244] ss:$8 sps:$4 sm:$0xff]  }
 0xfc9   :  { %v4406_v25 = vpack.c.bf16 %v4370_v22, %v4366_v16  ;;  %v4990_v59 = vpack.c.bf16 %v9331_v35, %v9325_v29  ;;  %v7864_v16 = vld [vmem:[%s9629_s19 + $0xd0] ss:$8 sps:$4 sm:$0xff]   ;;  %v7869_v22 = vld [vmem:[%s9629_s19 + $0xe4] ss:$8 sps:$4 sm:$0xff]   ;;  %v7890_v29 = vld [vmem:[%s9629_s19 + $0x254] ss:$8 sps:$4 sm:$0xff]  }
 0xfca   :  { %v7888_v35 = vld [vmem:[%s9629_s19 + $0x250] ss:$8 sps:$4 sm:$0xff]  }
 0xfcd   :  { %v4452_v32 = vpop.f32.mrb[64].mxu1 }
 0xfce   :  { %v4454_v57 = vpop.f32.mrb[65].mxu1 }
 0xfcf   :  { %v4456_v36 = vpop.f32.mrb[66].mxu1 }
 0xfd0   :  { %v4494_v38 = vpack.c.bf16 %v4456_v36, %v4452_v32  ;;  %v4458_v39 = vpop.f32.mrb[67].mxu1  ;;  %v7872_v32 = vld [vmem:[%s9629_s19 + $0xf4] ss:$8 sps:$4 sm:$0xff]   ;;  %v7875_v36 = vld [vmem:[%s9629_s19 + $0x204] ss:$8 sps:$4 sm:$0xff]  }
 0xfd1   :  { %v4495_v40 = vpack.c.bf16 %v4458_v39, %v4454_v57  ;;  %v7870_v57 = vld [vmem:[%s9629_s19 + $0xf0] ss:$8 sps:$4 sm:$0xff]   ;;  %v7878_v39 = vld [vmem:[%s9629_s19 + $0x214] ss:$8 sps:$4 sm:$0xff]  }
 0xfd3   :  { %4688 = vmatprep.mubr.bf16.mxu1 %v4495_v40  ;;  %v7876_v40 = vld [vmem:[%s9629_s19 + $0x210] ss:$8 sps:$4 sm:$0xff]  }
 0xfd4   :  { %4689 = vmatmul.mubr.bf16.vlgmr.msra.gmra.mrb[68].mxu1 %v4494_v38  ;;  %v7873_v38 = vld [vmem:[%s9629_s19 + $0x200] ss:$8 sps:$4 sm:$0xff]  }
 0xfd5   :  { %4860 = vmatpush1.bf16.msra.mxu1 %v7825_v41  ;;  %4891 = vmatprep.mubr.bf16.mxu1 %v4406_v25  ;;  %v7867_v25 = vld [vmem:[%s9629_s19 + $0xe0] ss:$8 sps:$4 sm:$0xff]   ;;  %v7881_v41 = vld [vmem:[%s9629_s19 + $0x224] ss:$8 sps:$4 sm:$0xff]  }
 0xfd6   :  { %4861 = vmatprep.subr.bf16.mxu1 %v7830_v42  ;;  %v7879_v42 = vld [vmem:[%s9629_s19 + $0x220] ss:$8 sps:$4 sm:$0xff]  }
 0xfd9   :  { %4862 = vmatpush1.bf16.msra.mxu1 %v7828_v46  ;;  %v7894_v46 = vld [vmem:[%s9629_s19 + $0x270] ss:$8 sps:$4 sm:$0xff]  }
 0xfda   :  { %4863 = vmatprep.subr.bf16.mxu1 %v7833_v47  ;;  %v7899_v47 = vld [vmem:[%s9629_s19 + $0x284] ss:$8 sps:$4 sm:$0xff]  }
 0xfdd   :  { %4864 = vmatpush1.bf16.msra.mxu1 %v7831_v50  ;;  %v7900_v50 = vld [vmem:[%s9629_s19 + $0x290] ss:$8 sps:$4 sm:$0xff]  }
 0xfde   :  { %4865 = vmatprep.subr.bf16.mxu1 %v7836_v51  ;;  %v7905_v51 = vld [vmem:[%s9629_s19 + $0x2a4] ss:$8 sps:$4 sm:$0xff]  }
 0xfe1   :  { %4866 = vmatpush1.bf16.msra.mxu1 %v7834_v60  ;;  %v7906_v60 = vld [vmem:[%s9629_s19 + $0x2b0] ss:$8 sps:$4 sm:$0xff]  }
 0xfe2   :  { %4867 = vmatprep.subr.bf16.mxu1 %v7839_v61  ;;  %v7911_v61 = vld [vmem:[%s9629_s19 + $0x2c4] ss:$8 sps:$4 sm:$0xff]  }
 0xfe5   :  { %4868 = vmatpush1.bf16.msra.mxu1 %v7837_v2  ;;  %v7912_v2 = vld [vmem:[%s9629_s19 + $0x2d0] ss:$8 sps:$4 sm:$0xff]  }
 0xfe6   :  { %4869 = vmatprep.subr.bf16.mxu1 %v7842_v3  ;;  %v7917_v3 = vld [vmem:[%s9629_s19 + $0x2e4] ss:$8 sps:$4 sm:$0xff]  }
 0xfe9   :  { %4870 = vmatpush1.bf16.msra.mxu1 %v7840_v0  ;;  %v7918_v0 = vld [vmem:[%s9629_s19 + $0x2f0] ss:$8 sps:$4 sm:$0xff]  }
 0xfea   :  { %4871 = vmatprep.subr.bf16.mxu1 %v7845_v1  ;;  %v7933_v1 = vld [vmem:[%s9630_s29 + $0x70] sm:$0xff]  }
 0xfeb   :  { %6900 = vmatprep.subr.bf16.mxu0 %v7933_v1  ;;  %v7956_v1 = vld [vmem:[%s9638_s9 + $0x18] sm:$0xff]  }
 0xfec   :  { %6901 = vmatpush3.bf16.msra.mxu0 %v7934_v7  ;;  %v7957_v7 = vld [vmem:[%s9638_s9 + $0x20] sm:$0xff]  }
 0xfed   :  { %4872 = vmatpush1.bf16.msra.mxu1 %v7843_v8  ;;  %v7935_v8 = vld [vmem:[%s9630_s29 + $0x78] sm:$0xff]  }
 0xfee   :  { %4873 = vmatprep.subr.bf16.mxu1 %v7848_v6  ;;  %v7936_v6 = vld [vmem:[%s9630_s29 + $0x38] sm:$0xff]   ;;  %6902 = vmatprep.subr.bf16.mxu0 %v7935_v8  ;;  %v7958_v8 = vld [vmem:[%s9638_s9 + $0x28] sm:$0xff]  }
 0xff0   :  { %6903 = vmatpush3.bf16.msra.mxu0 %v7936_v6  ;;  %v7959_v6 = vld [vmem:[%s9638_s9 + $0x30] sm:$0xff]  }
 0xff1   :  { %4874 = vmatpush1.bf16.msra.mxu1 %v7846_v54  ;;  %7274 = vmatprep.subr.bf16.mxu0 %v8444_v53  ;;  %v5198_v54 = vld [vmem:[%s9631_s18] sm:$0x3] }
 0xff2   :  { %4875 = vmatprep.subr.bf16.mxu1 %v7851_v9  ;;  %v5203_v9 = vrot.slane %v5198_v54, %v9071_v31  ;;  %v5396_v31 = vld [vmem:[%s9632_s12] sm:$0x1] }
 0xff5   :  { %4876 = vmatpush1.bf16.msra.mxu1 %v7849_v10  ;;  %v5207_v10 = vrot.slane %v5198_v54, %v9074_v20  ;;  %v7937_v20 = vld [vmem:[%s9634_s23] sm:$0xff]   ;;  %v7960_v54 = vld [vmem:[%s9638_s9 + $0x38] sm:$0xff]  }
 0xff6   :  { %4877 = vmatprep.subr.bf16.mxu1 %v7854_v55 }
 0xff9   :  { %4878 = vmatpush1.bf16.msra.mxu1 %v7852_v11 }
 0xffa   :  { %4879 = vmatprep.subr.bf16.mxu1 %v7857_v12 }
 0xffd   :  { %4880 = vmatpush1.bf16.msra.mxu1 %v7855_v13 }
 0xffe   :  { %4881 = vmatprep.subr.bf16.mxu1 %v7860_v14 }
0x1001   :  { %4882 = vmatpush1.bf16.msra.mxu1 %v7858_v15 }
0x1002   :  { %4883 = vmatprep.subr.bf16.mxu1 %v7863_v17 }
0x1005   :  { %4884 = vmatpush1.bf16.msra.mxu1 %v7861_v21 }
0x1006   :  { %4885 = vmatprep.subr.bf16.mxu1 %v7866_v19 }
0x1009   :  { %4886 = vmatpush1.bf16.msra.mxu1 %v7864_v16 }
0x100a   :  { %4887 = vmatprep.subr.bf16.mxu1 %v7869_v22 }
0x100d   :  { %4888 = vmatpush1.bf16.msra.mxu1 %v7867_v25  ;;  %v7942_v25 = vld [vmem:[%s9634_s23 + $0x28] sm:$0xff]  }
0x100e   :  { %4889 = vmatprep.subr.bf16.mxu1 %v7872_v32  ;;  %v7943_v32 = vld [vmem:[%s9634_s23 + $0x30] sm:$0xff]  }
0x1011   :  { %4890 = vmatpush1.bf16.msra.mxu1 %v7870_v57  ;;  %v7944_v57 = vld [vmem:[%s9634_s23 + $0x38] sm:$0xff]  }
0x1012   :  { %5151 = vmatprep.subr.bf16.mxu1 %v7875_v36 }
0x1014   :  { %4892 = vmatmul.mubr.bf16.vlgmr.msra.gmra.mrb[68].mxu1 %v4405_v37  ;;  %v7885_v37 = vld [vmem:[%s9629_s19 + $0x240] ss:$8 sps:$4 sm:$0xff]  }
0x1015   :  { %5152 = vmatpush1.bf16.msra.mxu1 %v7873_v38  ;;  %5183 = vmatprep.mubr.bf16.mxu1 %v4990_v59  ;;  %v7893_v59 = vld [vmem:[%s9629_s19 + $0x264] ss:$8 sps:$4 sm:$0xff]  }
0x1016   :  { %5153 = vmatprep.subr.bf16.mxu1 %v7878_v39 }
0x1019   :  { %5154 = vmatpush1.bf16.msra.mxu1 %v7876_v40 }
0x101a   :  { %5155 = vmatprep.subr.bf16.mxu1 %v7881_v41  ;;  %v6615_v41 = vld [vmem:[%s9635_s26] ss:$0 sm:$0xff] }
0x101d   :  { %5156 = vmatpush1.bf16.msra.mxu1 %v7879_v42 }
0x101e   :  { %5157 = vmatprep.subr.bf16.mxu1 %v7884_v43 }
0x1021   :  { %5158 = vmatpush1.bf16.msra.mxu1 %v7882_v28 }
0x1022   :  { %5159 = vmatprep.subr.bf16.mxu1 %v7887_v33 }
0x1025   :  { %5160 = vmatpush1.bf16.msra.mxu1 %v7885_v37 }
0x1026   :  { %5161 = vmatprep.subr.bf16.mxu1 %v7890_v29 }
0x1029   :  { %5162 = vmatpush1.bf16.msra.mxu1 %v7888_v35 }
0x102a   :  { %5163 = vmatprep.subr.bf16.mxu1 %v7893_v59 }
0x102d   :  { %5164 = vmatpush1.bf16.msra.mxu1 %v7891_v44 }
0x102e   :  { %5165 = vmatprep.subr.bf16.mxu1 %v7896_v45 }
0x1031   :  { %5166 = vmatpush1.bf16.msra.mxu1 %v7894_v46  ;;  %v7945_v46 = vld [vmem:[%s9636_s28] sm:$0xff]  }
0x1032   :  { %5167 = vmatprep.subr.bf16.mxu1 %v7899_v47 }
0x1035   :  { %5168 = vmatpush1.bf16.msra.mxu1 %v7897_v48 }
0x1036   :  { %5169 = vmatprep.subr.bf16.mxu1 %v7902_v49 }
0x1039   :  { %5170 = vmatpush1.bf16.msra.mxu1 %v7900_v50 }
0x103a   :  { %5171 = vmatprep.subr.bf16.mxu1 %v7905_v51  ;;  %v7946_v51 = vld [vmem:[%s9636_s28 + $0x8] sm:$0xff]  }
0x103d   :  { %5172 = vmatpush1.bf16.msra.mxu1 %v7903_v26  ;;  %v7947_v26 = vld [vmem:[%s9636_s28 + $0x10] sm:$0xff]  }
0x103e   :  { %5173 = vmatprep.subr.bf16.mxu1 %v7908_v56  ;;  %v7948_v56 = vld [vmem:[%s9636_s28 + $0x18] sm:$0xff]  }
0x1041   :  { %5174 = vmatpush1.bf16.msra.mxu1 %v7906_v60  ;;  %v7949_v60 = vld [vmem:[%s9636_s28 + $0x20] sm:$0xff]  }
0x1042   :  { %5175 = vmatprep.subr.bf16.mxu1 %v7911_v61  ;;  %v7950_v61 = vld [vmem:[%s9636_s28 + $0x28] sm:$0xff]  }
0x1045   :  { %5176 = vmatpush1.bf16.msra.mxu1 %v7909_v62  ;;  %v7951_v62 = vld [vmem:[%s9636_s28 + $0x30] sm:$0xff]  }
0x1046   :  { %5177 = vmatprep.subr.bf16.mxu1 %v7914_v63  ;;  %v7952_v63 = vld [vmem:[%s9636_s28 + $0x38] sm:$0xff]  }
0x1049   :  { %5178 = vmatpush1.bf16.msra.mxu1 %v7912_v2 }
0x104a   :  { %5179 = vmatprep.subr.bf16.mxu1 %v7917_v3  ;;  %v5695_v3 = vld [vmem:[%s9637_s20] sm:$0x1] }
0x104d   :  { %5180 = vmatpush1.bf16.msra.mxu1 %v7915_v4  ;;  %v7953_v4 = vld [vmem:[%s9638_s9] sm:$0xff]  }
0x104e   :  { %5181 = vmatprep.subr.bf16.mxu1 %v7920_v5  ;;  %v7954_v5 = vld [vmem:[%s9638_s9 + $0x8] sm:$0xff]  }
0x1051   :  { %5182 = vmatpush1.bf16.msra.mxu1 %v7918_v0  ;;  %v7955_v0 = vld [vmem:[%s9638_s9 + $0x10] sm:$0xff]  }
0x1052   :  { %7354 = vmatprep.subr.bf16.mxu1 %v8444_v53 }
0x1054   :  { %5184 = vmatmul.mubr.bf16.vlgmr.msra.gmra.mrb[68].mxu1 %v4989_v34 }
0x1055   :  { %7356 = vmatprep.mubr.msk.bf16.mxu1 %vm8445_vm2, %v8444_v53 }
0x1127   :  { %v5185_v27 = vpop.f32.mrb[68].mxu1 }
0x1128   :  { %v5210_v30 = vadd.f32 %v5203_v9, %v5185_v27  ;;  %v5187_v34 = vpop.f32.mrb[69].mxu1 }
0x1129   :  { %v5211_v55 = vadd.f32 %v5207_v10, %v5187_v34  ;;  %v5189_v11 = vpop.f32.mrb[70].mxu1 }
0x112a   :  { %v5212_v12 = vadd.f32 %v5203_v9, %v5189_v11  ;;  %v5191_v13 = vpop.f32.mrb[71].mxu1  ;;  %v5214_v15 = vmax.f32 %v5210_v30, 0.0 }
0x112b   :  { %v5213_v14 = vadd.f32 %v5207_v10, %v5191_v13  ;;  %v5215_v21 = vmax.f32 %v5211_v55, 0.0 }
0x112c   :  { %v5216_v17 = vmax.f32 %v5212_v12, 0.0 }
0x112d   :  { %v5217_v19 = vmax.f32 %v5213_v14, 0.0 }
0x112e   :  { %v5250_v16 = vpack.c.bf16 %v5216_v17, %v5214_v15 }
0x112f   :  { %v5251_v22 = vpack.c.bf16 %v5217_v19, %v5215_v21  ;;  %v7961_v19 = vld [vmem:[%s8770_s17] sm:$0xff]  }
0x1130   :  { %7355 = vmatpush3.bf16.msra.mxu1 %v7961_v19 }
0x1131   :  { %5387 = vmatprep.mubr.bf16.mxu0 %v5251_v22  ;;  %v6659_v22 = vld [vmem:[%s8765_s5] ss:$0 sm:$0xff]  ;;  %s8320_s5 = scalar_lea.vmem %s5924_s13, 32 }
0x1132   :  { %5388 = vmatmul.mubr.bf16.vlgmr.msra.gmra.mrb[48].mxu0 %v5250_v16  ;;  %p8321_p2 = scmp.ne.s32.totalorder %s5924_s13, %s8320_s5  ;;  %p8326_p4 = scmp.lt.s32.totalorder %s8320_s5, %s8320_s5 }
0x1133   :  { %7275 = vmatpush3.bf16.msra.mxu0 %v9055_v58  ;;  %7278 = vmatprep.mubr.msk.bf16.mxu0 %vm8445_vm2, %v8444_v53  ;;  %v5457_v58 = vld [vmem:[%s9633_s22] sm:$0x1] }
0x1134   :  { %7276 = vmatprep.subr.bf16.mxu0 %v8444_v53  ;;  %p8327_p5 = por %p8326_p4, %p8325_p3 }
0x1136   :  { %p8328_p6 = pnand %p8327_p5, %p8321_p2 }
0x1137   :  { %7277 = vmatpush3.bf16.msra.mxu0 %v9053_v52  ;;  %v7938_v52 = vld [vmem:[%s9634_s23 + $0x8] sm:$0xff]  }
0x1138   :  { %7282 = vmatprep.subr.bf16.mxu0 %v8444_v53 }
0x113a   :  { %7279 = vmatmul.mubr.msk.bf16.vlgmr.msra.gmra.mrb[52].mxu0 %vm600_vm1, %v5396_v31 }
0x113b   :  { %7283 = vmatpush3.bf16.msra.mxu0 %v5458_v23  ;;  %7284 = vmatprep.mubr.msk.bf16.mxu0 %vm8445_vm2, %v8444_v53  ;;  %v7941_v23 = vld [vmem:[%s9634_s23 + $0x20] sm:$0xff]  }
0x113c   :  { %7288 = vmatprep.subr.bf16.mxu0 %v8444_v53 }
0x1142   :  { %7285 = vmatmul.mubr.msk.bf16.vlgmr.msra.gmra.mrb[56].mxu0 %vm4326_vm3, %v5457_v58 }
0x1143   :  { %7289 = vmatpush3.bf16.msra.mxu0 %v7937_v20  ;;  %7304 = vmatprep.mubr.msk.bf16.mxu0 %vm8445_vm2, %v8444_v53 }
0x1144   :  { %7290 = vmatprep.subr.bf16.mxu0 %v8444_v53 }
0x1147   :  { %7291 = vmatpush3.bf16.msra.mxu0 %v7938_v52 }
0x1148   :  { %7292 = vmatprep.subr.bf16.mxu0 %v8444_v53 }
0x114b   :  { %7293 = vmatpush3.bf16.msra.mxu0 %v7939_v18 }
0x114c   :  { %7294 = vmatprep.subr.bf16.mxu0 %v8444_v53 }
0x114f   :  { %7295 = vmatpush3.bf16.msra.mxu0 %v7940_v24 }
0x1150   :  { %7296 = vmatprep.subr.bf16.mxu0 %v8444_v53 }
0x1153   :  { %7297 = vmatpush3.bf16.msra.mxu0 %v7941_v23 }
0x1154   :  { %7298 = vmatprep.subr.bf16.mxu0 %v8444_v53 }
0x1157   :  { %7299 = vmatpush3.bf16.msra.mxu0 %v7942_v25  ;;  %v6660_v25 = vld [vmem:[%s8775_s8] ss:$0 sm:$0xff] }
0x1158   :  { %7300 = vmatprep.subr.bf16.mxu0 %v8444_v53 }
0x115b   :  { %7301 = vmatpush3.bf16.msra.mxu0 %v7943_v32 }
0x115c   :  { %7302 = vmatprep.subr.bf16.mxu0 %v8444_v53 }
0x115f   :  { %7303 = vmatpush3.bf16.msra.mxu0 %v7944_v57 }
0x1160   :  { %7308 = vmatprep.subr.bf16.mxu0 %v8444_v53 }
0x1205   :  { %v6904_v36 = vpop.f32.mrb[48].mxu0 }
0x1206   :  { %v6905_v38 = vpop.f32.mrb[49].mxu0 }
0x1207   :  { %v6906_v39 = vadd.f32 %v6905_v38, %v6904_v36  ;;  %v6907_v40 = vpop.f32.mrb[50].mxu0 }
0x1208   :  { %v6908_v42 = vpop.f32.mrb[51].mxu0 }
0x1209   :  { %v6909_v43 = vadd.f32 %v6908_v42, %v6907_v40  ;;  %v5390_v28 = vadd.f32 %v6906_v39, %v6615_v41 }
0x120b   :  { %v5393_v33 = vadd.f32 %v6909_v43, %v6615_v41 }
0x120d   :  { %v5696_v37 = vpack.c.bf16 %v5393_v33, %v5390_v28  ;;  %v5434_v29 = vpop.f32.mrb[52].mxu0 }
0x120e   :  { %v7280_v35 = vpop.f32.mrb[53].mxu0  ;;  %v5456_v2 = vpack.c.bf16 %v5434_v29, %v5434_v29 }
0x120f   :  { %v5437_v59 = vpop.f32.mrb[54].mxu0 }
0x1210   :  { %v7281_v44 = vpop.f32.mrb[55].mxu0 }
0x1215   :  { %v5496_v45 = vpop.f32.mrb[56].mxu0 }
0x1216   :  { %v5518_v47 = vpack.c.bf16 %v5496_v45, %v5496_v45  ;;  %v7286_v48 = vpop.f32.mrb[57].mxu0 }
0x1217   :  { %v5499_v49 = vpop.f32.mrb[58].mxu0 }
0x1218   :  { %7305 = vmatmul.mubr.bf16.vlgmr.msra.gmra.mrb[60].mxu0 %v5518_v47  ;;  %v7287_v50 = vpop.f32.mrb[59].mxu0 }
0x1219   :  { %7309 = vmatpush3.bf16.msra.mxu0 %v7945_v46  ;;  %7324 = vmatprep.mubr.msk.bf16.mxu0 %vm8445_vm2, %v8444_v53 }
0x121a   :  { %7310 = vmatprep.subr.bf16.mxu0 %v8444_v53 }
0x121d   :  { %7311 = vmatpush3.bf16.msra.mxu0 %v7946_v51 }
0x121e   :  { %7312 = vmatprep.subr.bf16.mxu0 %v8444_v53 }
0x1221   :  { %7313 = vmatpush3.bf16.msra.mxu0 %v7947_v26 }
0x1222   :  { %7314 = vmatprep.subr.bf16.mxu0 %v8444_v53 }
0x1225   :  { %7315 = vmatpush3.bf16.msra.mxu0 %v7948_v56 }
0x1226   :  { %7316 = vmatprep.subr.bf16.mxu0 %v8444_v53 }
0x1229   :  { %7317 = vmatpush3.bf16.msra.mxu0 %v7949_v60 }
0x122a   :  { %7318 = vmatprep.subr.bf16.mxu0 %v8444_v53 }
0x122d   :  { %7319 = vmatpush3.bf16.msra.mxu0 %v7950_v61 }
0x122e   :  { %7320 = vmatprep.subr.bf16.mxu0 %v8444_v53 }
0x1231   :  { %7321 = vmatpush3.bf16.msra.mxu0 %v7951_v62 }
0x1232   :  { %7322 = vmatprep.subr.bf16.mxu0 %v8444_v53 }
0x1235   :  { %7323 = vmatpush3.bf16.msra.mxu0 %v7952_v63 }
0x1236   :  { %7328 = vmatprep.subr.bf16.mxu0 %v8444_v53 }
0x1238   :  { %7325 = vmatmul.mubr.bf16.vlgmr.msra.gmra.mrb[64].mxu0 %v5456_v2 }
0x1239   :  { %7329 = vmatpush3.bf16.msra.mxu0 %v5696_v37  ;;  %7330 = vmatprep.mubr.msk.bf16.mxu0 %vm8445_vm2, %v8444_v53 }
0x123a   :  { %7334 = vmatprep.subr.bf16.mxu0 %v8444_v53 }
0x1240   :  { %7331 = vmatmul.mubr.msk.bf16.vlgmr.msra.gmra.mrb[68].mxu0 %vm4326_vm3, %v5695_v3 }
0x1241   :  { %7350 = vmatprep.mubr.msk.bf16.mxu0 %vm8445_vm2, %v8444_v53  ;;  %7335 = vmatpush3.bf16.msra.mxu0 %v7953_v4 }
0x1242   :  { %7336 = vmatprep.subr.bf16.mxu0 %v8444_v53 }
0x1245   :  { %7337 = vmatpush3.bf16.msra.mxu0 %v7954_v5 }
0x1246   :  { %7338 = vmatprep.subr.bf16.mxu0 %v8444_v53 }
0x1249   :  { %7339 = vmatpush3.bf16.msra.mxu0 %v7955_v0 }
0x124a   :  { %7340 = vmatprep.subr.bf16.mxu0 %v8444_v53 }
0x124d   :  { %7341 = vmatpush3.bf16.msra.mxu0 %v7956_v1 }
0x124e   :  { %7342 = vmatprep.subr.bf16.mxu0 %v8444_v53 }
0x1251   :  { %7343 = vmatpush3.bf16.msra.mxu0 %v7957_v7 }
0x1252   :  { %7344 = vmatprep.subr.bf16.mxu0 %v8444_v53 }
0x1255   :  { %7345 = vmatpush3.bf16.msra.mxu0 %v7958_v8 }
0x1256   :  { %7346 = vmatprep.subr.bf16.mxu0 %v8444_v53 }
0x1259   :  { %7347 = vmatpush3.bf16.msra.mxu0 %v7959_v6 }
0x125a   :  { %7348 = vmatprep.subr.bf16.mxu0 %v8444_v53 }
0x125d   :  { %7349 = vmatpush3.bf16.msra.mxu0 %v7960_v54 }
0x12eb   :  { %v5601_v9 = vpop.f32.mrb[60].mxu0 }
0x12ec   :  { %v7306_v10 = vpop.f32.mrb[61].mxu0 }
0x12ed   :  { %v5604_v27 = vpop.f32.mrb[62].mxu0 }
0x12ee   :  { %v7307_v30 = vpop.f32.mrb[63].mxu0 }
0x130b   :  { %v5689_v34 = vpop.f32.mrb[64].mxu0 }
0x130c   :  { %v5690_v55 = vadd.f32 %v5689_v34, %v5601_v9  ;;  %v7326_v11 = vpop.f32.mrb[65].mxu0 }
0x130d   :  { %v5692_v12 = vpop.f32.mrb[66].mxu0 }
0x130e   :  { %v7327_v13 = vpop.f32.mrb[67].mxu0 }
0x1313   :  { %v5734_v14 = vpop.f32.mrb[68].mxu0 }
0x1314   :  { %v5756_v15 = vpack.c.bf16 %v5734_v14, %v5734_v14  ;;  %v7332_v17 = vpop.f32.mrb[69].mxu0 }
0x1315   :  { %v5737_v21 = vpop.f32.mrb[70].mxu0 }
0x1316   :  { %7351 = vmatmul.mubr.bf16.vlgmr.msra.gmra.mrb[72].mxu0 %v5756_v15  ;;  %v7333_v53 = vpop.f32.mrb[71].mxu0 }
0x13e9   :  { %v5839_v16 = vpop.f32.mrb[72].mxu0 }
0x13ea   :  { %v5845_v31 = vadd.f32 %v5839_v16, %v5690_v55  ;;  %v7352_v58 = vpop.f32.mrb[73].mxu0 }
0x13eb   :  { %v5842_v20 = vpop.f32.mrb[74].mxu0 }
0x13ec   :  { %v5853_v52 = vadd.f32 %v6659_v22, %v5845_v31  ;;  %v7353_v18 = vpop.f32.mrb[75].mxu0 }
0x13ee   :  { %v5854_v24 = vmax.f32 %v5853_v52, 0.0 }
0x13f0   :  { %v5857_v23 = vpack.c.bf16 %v5854_v24, %v5854_v24 }
0x13f2   :  { %7357 = vmatmul.mubr.msk.bf16.vlgmr.msra.gmra.mrb[72].mxu1 %vm4326_vm3, %v5857_v23 }
0x14c5   :  { %v5908_v32 = vpop.f32.mrb[72].mxu1 }
0x14c6   :  { %v5909_v57 = vadd.f32 %v6660_v25, %v5908_v32  ;;  %v7358_v36 = vpop.f32.mrb[73].mxu1 }
0x14c7   :  { %v5911_v38 = vpop.f32.mrb[74].mxu1 }
0x14c8   :  { %v5914_v39 = vmax.f32 %v5909_v57, 0.0  ;;  %v7359_v40 = vpop.f32.mrb[75].mxu1 }
0x14ca   :  { %5916 = vst.msk [vmem:[#allocation28] sm:$0x3] %vm5915_vm4, %v5914_v39 }
0x14cb   :  { %8331 = shalt.err (!%p8328_p6)
}
0x14cc   :  { %s8332_s17 = scalar_lea.hbm %s8780_s25, 32 }
0x14cd   :  { %p8333_p7 = scmp.ne.s32.totalorder %s8780_s25, %s8332_s17  ;;  %p8336_p8 = scmp.lt.u32.totalorder %s8332_s17, %s8780_s25 }
0x14cf   :  { %p8338_p9 = pnand %p8336_p8, %p8333_p7 }
0x14d1   :  { %8341 = shalt.err (!%p8338_p9)
}
0x14d2   :  { %5926 = dma.vmem_to_hbm [thread:$0]  %s5924_s13, 32, %s8780_s25, [#allocation4]  }
0x14d3   :  { %8360 = dma.done.wait [#allocation4], 32  }
0x14d4   :  { %8361 = vsyncadd [#allocation4], 4294967264 }
0x14d5   :  { %5930 = vsyncpa [#allocation3], 1 }
0x14d6   :  { %5931 = vsyncpa [#allocation6], 1 }
0x14d7   :  { %5932 = vsyncpa [#allocation9], 1 }
0x14d8   :  { %5933 = vsyncpa [#allocation12], 1 }
0x14d9   :  { %5934 = vsyncpa [#allocation15], 1 }
0x14da   :  { %5935 = vsyncpa [#allocation18], 1 }
0x14db   :  { %5936 = vsyncpa [#allocation21], 1 }
0x14dc   :  { %5937 = vsyncpa [#allocation24], 1 }
0x14dd   :  { %5938 = vsyncpa [#allocation27], 1 }
0x14de   :  { %5939 = vsyncpa [#allocation4], 1 }

</bundles_post_ra>
